<compile_context>
chip_gen: v7x
topology: tpu7x:2x2x1
jax: 0.10.0
libtpu: 0.0.40
codegen_flags: <defaults>
</compile_context>

<pallas_src>
import functools

import jax
import jax.numpy as jnp
from jax import lax
from jax.experimental import pallas as pl
from jax.experimental.pallas import tpu as pltpu


def _vmem_limit_bytes():
    """~48 MiB fits v7x's 64 MiB/TC with headroom; raise toward 96 MiB on 128-MiB parts."""
    cap = 0
    try:
        cap = int(getattr(pltpu.get_tpu_info(), "vmem_capacity_bytes", 0))
    except Exception:
        cap = 0
    if cap >= 128 * 1024 * 1024:
        return 96 * 1024 * 1024
    return 48 * 1024 * 1024


def _shift2(x, dy, dx, H, W):
    """Neighbour view of a (H, W) array: out[y, x] pairs with x[y+dy, x+dx] for interior
    pixels (XLU rotations).  Entries that wrap across the image boundary are neutralised
    downstream by the census transform border mask / zeroed edge weights, and this helper
    is shared by both kernels so census pairs always use the same convention."""
    out = x
    sy = (-dy) % H
    if sy:
        out = pltpu.roll(out, shift=sy, axis=0)
    sx = (-dx) % W
    if sx:
        out = pltpu.roll(out, shift=sx, axis=1)
    return out


# ----------------------------------------------------------------------------
# Kernel 1 (one-time precompute, flow independent, reused for all iterations):
#   ternary census transform of img1 (bf16), edge-aware smoothness weights,
#   grayscale of img2 (bf16 MXU operand).
# ----------------------------------------------------------------------------
def _precompute_kernel(img1_ref, img2_ref, cen1_ref, edgew_ref, g2gray_ref, *,
                       C, H, W, radius, edge_weight):
    # grayscale of both images (census operates on 0..255 grayscale)
    g1 = img1_ref[0, 0]
    g2 = img2_ref[0, 0]
    for c in range(1, C):
        g1 = g1 + img1_ref[0, c]
        g2 = g2 + img2_ref[0, c]
    g1 = g1 * (255.0 / C)
    g2 = g2 * (255.0 / C)
    g2gray_ref[0] = g2.astype(jnp.bfloat16)

    # ternary census transform of img1, stored bf16 (values in (-1, 1))
    idx = 0
    for dy in range(-radius, radius + 1):
        for dx in range(-radius, radius + 1):
            t1 = _shift2(g1, dy, dx, H, W) - g1
            t1 = t1 * lax.rsqrt(0.81 + t1 * t1)
            cen1_ref[0, idx] = t1.astype(jnp.bfloat16)
            idx += 1

    # edge-aware 1st-order smoothness weights; pairs that wrap across the image boundary
    # get weight 0 (iota step test is independent of the rotate-direction convention).
    adx = jnp.zeros((H, W), jnp.float32)
    ady = jnp.zeros((H, W), jnp.float32)
    for c in range(C):
        ic = img1_ref[0, c]
        adx = adx + jnp.abs(_shift2(ic, 0, 1, H, W) - ic)
        ady = ady + jnp.abs(_shift2(ic, 1, 0, H, W) - ic)
    adx = adx * (1.0 / C)
    ady = ady * (1.0 / C)
    ox = lax.broadcasted_iota(jnp.int32, (H, W), 1).astype(jnp.float32)
    oy = lax.broadcasted_iota(jnp.int32, (H, W), 0).astype(jnp.float32)
    step_x = jnp.abs(_shift2(ox, 0, 1, H, W) - ox)
    step_y = jnp.abs(_shift2(oy, 1, 0, H, W) - oy)
    ewx = jnp.where((step_x > 0.5) & (step_x < 1.5), jnp.exp(-adx * edge_weight), 0.0)
    ewy = jnp.where((step_y > 0.5) & (step_y < 1.5), jnp.exp(-ady * edge_weight), 0.0)
    edgew_ref[0, 0] = ewx
    edgew_ref[0, 1] = ewy


def precompute_terms(img1, img2, *, radius, edge_weight):
    B, C, H, W = img1.shape
    if 2 * radius + 1 > min(H, W):
        raise ValueError("census_radius too large for the image size")
    noff = (2 * radius + 1) ** 2
    cen1, edgew, g2gray = pl.pallas_call(
        functools.partial(_precompute_kernel, C=C, H=H, W=W, radius=radius,
                          edge_weight=edge_weight),
        out_shape=(jax.ShapeDtypeStruct((B, noff, H, W), jnp.bfloat16),
                   jax.ShapeDtypeStruct((B, 2, H, W), jnp.float32),
                   jax.ShapeDtypeStruct((B, H, W), jnp.bfloat16)),
        grid=(B,),
        in_specs=[pl.BlockSpec((1, C, H, W), lambda b: (b, 0, 0, 0)),
                  pl.BlockSpec((1, C, H, W), lambda b: (b, 0, 0, 0))],
        out_specs=(pl.BlockSpec((1, noff, H, W), lambda b: (b, 0, 0, 0)),
                   pl.BlockSpec((1, 2, H, W), lambda b: (b, 0, 0, 0)),
                   pl.BlockSpec((1, H, W), lambda b: (b, 0, 0))),
        compiler_params=pltpu.CompilerParams(
            dimension_semantics=("parallel",),
            vmem_limit_bytes=_vmem_limit_bytes()),
    )(img1.astype(jnp.float32), img2.astype(jnp.float32))
    return g2gray, cen1, edgew


# ----------------------------------------------------------------------------
# Kernel 2 (fused, one pallas_call per flow iteration):
#   row-tiled separable bilinear warp (bf16 MXU) + border mask + census loss partial sum
#   + edge-aware 1st-order smoothness partial sums + EPE partial sum.
#   Single packed (8, 128) writeback per batch element.
# ----------------------------------------------------------------------------
def _energy_kernel(flow_ref, target_ref, g2gray_ref, cen1_ref, edgew_ref, out_ref,
                   g2s_ref, txs_ref, tys_ref, *, H, W, radius):
    u = flow_ref[0, 0]                                        # (H, W) flow-x
    v = flow_ref[0, 1]                                        # (H, W) flow-y
    oxi = lax.broadcasted_iota(jnp.int32, (H, W), 1)
    oyi = lax.broadcasted_iota(jnp.int32, (H, W), 0)
    tx = oxi.astype(jnp.float32) + u                          # sampling coordinates
    ty = oyi.astype(jnp.float32) + v
    txs_ref[...] = tx
    tys_ref[...] = ty

    # border mask: 1 where the flow keeps the sample inside the image
    mask = ((tx >= 0.0) & (tx <= float(W - 1)) &
            (ty >= 0.0) & (ty <= float(H - 1))).astype(jnp.float32)

    # ---- separable bilinear warp, tiled over output rows (bounded VMEM, bf16 MXU) ----
    #   g2[y, x] = sum_iy tri(ty-iy) * (sum_ix tri(tx-ix) * g2src[iy, ix])
    g2src = g2gray_ref[0]                                     # (H, W) bf16 MXU operand
    ixs = lax.broadcasted_iota(jnp.int32, (W, 1), 0).astype(jnp.float32)
    iys = lax.broadcasted_iota(jnp.int32, (H, 1), 0).astype(jnp.float32)

    def warp_row(y, carry):
        tx_row = txs_ref[pl.ds(y, 1), :]                      # (1, W) output-row coords
        ty_row = tys_ref[pl.ds(y, 1), :]
        bwx = jnp.maximum(0.0, 1.0 - jnp.abs(tx_row - ixs))   # (W_src, W_out)
        a = jnp.dot(g2src, bwx.astype(jnp.bfloat16),
                    preferred_element_type=jnp.float32)       # (H_src, W_out) f32 acc
        bwy = jnp.maximum(0.0, 1.0 - jnp.abs(ty_row - iys))   # (H_src, W_out)
        g2s_ref[pl.ds(y, 1), :] = jnp.sum(bwy * a, axis=0, keepdims=True)
        return carry

    lax.fori_loop(0, H, warp_row, 0)
    g2 = g2s_ref[...]                                         # (H, W) warped grayscale

    # ---- census (ternary transform + soft hamming distance + charbonnier) ----
    dist = jnp.zeros((H, W), jnp.float32)
    idx = 0
    for dy in range(-radius, radius + 1):
        for dx in range(-radius, radius + 1):
            t2 = _shift2(g2, dy, dx, H, W) - g2
            t2 = t2 * lax.rsqrt(0.81 + t2 * t2)
            d = cen1_ref[0, idx].astype(jnp.float32) - t2
            d = d * d
            dist = dist + d * pl.reciprocal(0.1 + d, approx=True)
            idx += 1
    tmask = ((oyi >= radius) & (oyi < H - radius) &
             (oxi >= radius) & (oxi < W - radius)).astype(jnp.float32)
    # generalized Charbonnier: (x^2 + eps^2)^alpha, alpha=0.45, eps=1e-3
    err = jnp.exp(0.45 * jnp.log(dist * dist + 1e-6))
    census_sum = jnp.sum(mask * tmask * err)

    # ---- edge-aware 1st-order smoothness (precomputed, zero-padded edge weights) ----
    ewx = edgew_ref[0, 0]
    ewy = edgew_ref[0, 1]
    sx = jnp.sum(ewx * (jnp.abs(_shift2(u, 0, 1, H, W) - u)
                        + jnp.abs(_shift2(v, 0, 1, H, W) - v)))
    sy = jnp.sum(ewy * (jnp.abs(_shift2(u, 1, 0, H, W) - u)
                        + jnp.abs(_shift2(v, 1, 0, H, W) - v)))

    # ---- EPE partial sum (wrapper only consumes it from the flow1 invocation) ----
    du = u - target_ref[0, 0]
    dv = v - target_ref[0, 1]
    epe_sum = jnp.sum(jnp.sqrt(du * du + dv * dv))

    # single packed (8, 128) writeback: rows 0..3 = census, sx, sy, epe
    row = lax.broadcasted_iota(jnp.int32, (8, 128), 0)
    out_ref[0] = jnp.where(row == 0, census_sum,
                 jnp.where(row == 1, sx,
                 jnp.where(row == 2, sy,
                 jnp.where(row == 3, epe_sum, 0.0))))


def fused_energy_terms(flow, target, g2gray, cen1, edgew, *, radius):
    B, _, H, W = flow.shape
    noff = cen1.shape[1]
    sums = pl.pallas_call(
        functools.partial(_energy_kernel, H=H, W=W, radius=radius),
        out_shape=jax.ShapeDtypeStruct((B, 8, 128), jnp.float32),
        grid=(B,),
        in_specs=[pl.BlockSpec((1, 2, H, W), lambda b: (b, 0, 0, 0)),     # flow
                  pl.BlockSpec((1, 2, H, W), lambda b: (b, 0, 0, 0)),     # target (EPE)
                  pl.BlockSpec((1, H, W), lambda b: (b, 0, 0)),           # grayscale img2
                  pl.BlockSpec((1, noff, H, W), lambda b: (b, 0, 0, 0)),  # census(img1)
                  pl.BlockSpec((1, 2, H, W), lambda b: (b, 0, 0, 0))],    # edge weights
        out_specs=pl.BlockSpec((1, 8, 128), lambda b: (b, 0, 0)),
        scratch_shapes=[pltpu.VMEM((H, W), jnp.float32),   # warped grayscale
                        pltpu.VMEM((H, W), jnp.float32),   # tx
                        pltpu.VMEM((H, W), jnp.float32)],  # ty
        compiler_params=pltpu.CompilerParams(
            dimension_semantics=("parallel",),
            vmem_limit_bytes=_vmem_limit_bytes()),
    )(flow.astype(jnp.float32), target.astype(jnp.float32), g2gray, cen1, edgew)

    # census_loss: charbonnier normalized by B * 1 * H * W
    census = jnp.sum(sums[:, 0, 0]) / float(B * H * W)
    # smooth_grad_1st: loss_x = w_x*|dx|/2, return loss_x.mean()/2 + loss_y.mean()/2
    n_x = float(B * 2 * H * (W - 1))
    n_y = float(B * 2 * (H - 1) * W)
    smooth_1st = (jnp.sum(sums[:, 1, 0]) / (4.0 * n_x)
                  + jnp.sum(sums[:, 2, 0]) / (4.0 * n_y))
    epe = jnp.sum(sums[:, 3, 0]) / float(B * H * W)
    return census, smooth_1st, epe


# ----------------------------------------------------------------------------
# UnsupervisedSequence (forward pass). No learnable parameters in the module.
# ----------------------------------------------------------------------------
class UnsupervisedSequence:
    def __init__(self, color_weight=0.0, gradient_weight=0.0, census_weight=1.0,
                 census_radius=3, smooth_1st_weight=1.0, smooth_2nd_weight=0.0,
                 edge_weight=150.0, decay=0.8, training=True):
        self._color_weight = color_weight
        self._gradient_weight = gradient_weight
        self._census_weight = census_weight
        self._census_radius = census_radius
        self._smooth_1st_weight = smooth_1st_weight
        self._smooth_2nd_weight = smooth_2nd_weight
        self._edge_weight = edge_weight
        self._decay = decay
        self.training = training

    def _precompute(self, img1, img2):
        return precompute_terms(img1, img2, radius=self._census_radius,
                                edge_weight=self._edge_weight)

    def _energy_from_cache(self, flow, target, cache):
        g2gray, cen1, edgew = cache
        census, smooth_1st, epe = fused_energy_terms(
            flow, target, g2gray, cen1, edgew, radius=self._census_radius)
        energy_dict = {}
        if self._census_weight > 0:
            energy_dict['census'] = self._census_weight * census
        if self._smooth_1st_weight > 0:
            energy_dict['smooth_1st'] = self._smooth_1st_weight * smooth_1st
        # TODO(synk): color / gradient / smooth_2nd terms not implemented — their weights
        # default to 0 in the reference module, so they never contribute here.
        energy = 0.0
        for value in energy_dict.values():
            energy = energy + value
        return energy, energy_dict, epe

    def energy(self, flow, img1, img2):
        cache = self._precompute(img1, img2)
        energy, energy_dict, _ = self._energy_from_cache(flow, flow, cache)
        return energy, energy_dict

    def forward(self, output_dict, target_dict):
        loss_dict = {}
        target = target_dict['target1']
        img1 = target_dict['input1o']
        img2 = target_dict['input2o']
        niter = len([key for key in output_dict if key.startswith('flow')])

        # flow-independent census / edge-weight / grayscale terms: computed once
        cache = self._precompute(img1, img2)

        sequence_energy = 0.0
        sequence_energy_dict = {}
        epe = None
        for it in range(niter):
            flow = output_dict[f'flow{it + 1}']
            energy, energy_dict, epe_it = self._energy_from_cache(flow, target, cache)
            if it == 0:
                epe = epe_it            # EPE is folded into the flow1 kernel invocation
            sequence_energy = sequence_energy + (self._decay ** it) * energy
            if not self.training:
                if it == 0:
                    sequence_energy_dict = dict(energy_dict)
                    continue
                for key in energy_dict:
                    sequence_energy_dict[key] = (sequence_energy_dict[key]
                                                 + (self._decay ** it) * energy_dict[key])
        loss_dict['energy'] = sequence_energy
        loss_dict['epe'] = epe
        if not self.training:
            loss_dict = {**loss_dict, **sequence_energy_dict}
        return loss_dict

    __call__ = forward


if __name__ == "__main__":
    B, H, W = 2, 16, 16
    key = jax.random.PRNGKey(0)
    k = jax.random.split(key, 6)
    img1 = jax.random.uniform(k[0], (B, 3, H, W), jnp.float32)
    img2 = jax.random.uniform(k[1], (B, 3, H, W), jnp.float32)
    flow1 = jax.random.normal(k[2], (B, 2, H, W), jnp.float32) * 2.0
    flow2 = jax.random.normal(k[3], (B, 2, H, W), jnp.float32) * 2.0
    flow3 = jax.random.normal(k[4], (B, 2, H, W), jnp.float32) * 2.0
    target = jax.random.normal(k[5], (B, 2, H, W), jnp.float32) * 2.0

    output_dict = {'flow1': flow1, 'flow2': flow2, 'flow3': flow3}
    target_dict = {'target1': target, 'input1o': img1, 'input2o': img2}

    loss_fn = UnsupervisedSequence(training=True)
    loss_dict = loss_fn(output_dict, target_dict)
    jax.block_until_ready(loss_dict)
    print("KERNEL_OK")
</pallas_src>

<mosaic_0001>
module attributes {stable_mosaic.version = 11 : i64} {
  func.func @_precompute_kernel(%arg0: i32, %arg1: memref<1x3x16x16xf32, #tpu.memory_space<vmem>>, %arg2: memref<1x3x16x16xf32, #tpu.memory_space<vmem>>, %arg3: memref<1x49x16x16xbf16, #tpu.memory_space<vmem>>, %arg4: memref<1x2x16x16xf32, #tpu.memory_space<vmem>>, %arg5: memref<1x16x16xbf16, #tpu.memory_space<vmem>>) attributes {dimension_semantics = [#tpu.dimension_semantics<parallel>], iteration_bounds = array<i64: 2>, scalar_prefetch = 0 : i64, scratch_operands = 0 : i64, tpu.core_type = #tpu.core_type<tc>, window_params = [{transform_indices = @transform_0, window_bounds = array<i64: 1, 3, 16, 16>}, {transform_indices = @transform_1, window_bounds = array<i64: 1, 3, 16, 16>}, {transform_indices = @transform_2, window_bounds = array<i64: 1, 49, 16, 16>}, {transform_indices = @transform_3, window_bounds = array<i64: 1, 2, 16, 16>}, {transform_indices = @transform_4, window_bounds = array<i64: 1, 16, 16>}]} {
    %c0 = arith.constant 0 : index
    %c0_0 = arith.constant 0 : index
    %c0_1 = arith.constant 0 : index
    %c0_2 = arith.constant 0 : index
    %0 = vector.load %arg1[%c0, %c0_0, %c0_1, %c0_2] : memref<1x3x16x16xf32, #tpu.memory_space<vmem>>, vector<1x1x16x16xf32>
    %1 = vector.shape_cast %0 : vector<1x1x16x16xf32> to vector<16x16xf32>
    %c0_3 = arith.constant 0 : index
    %c0_4 = arith.constant 0 : index
    %c0_5 = arith.constant 0 : index
    %c0_6 = arith.constant 0 : index
    %2 = vector.load %arg2[%c0_3, %c0_4, %c0_5, %c0_6] : memref<1x3x16x16xf32, #tpu.memory_space<vmem>>, vector<1x1x16x16xf32>
    %3 = vector.shape_cast %2 : vector<1x1x16x16xf32> to vector<16x16xf32>
    %c0_7 = arith.constant 0 : index
    %c1 = arith.constant 1 : index
    %c0_8 = arith.constant 0 : index
    %c0_9 = arith.constant 0 : index
    %4 = vector.load %arg1[%c0_7, %c1, %c0_8, %c0_9] : memref<1x3x16x16xf32, #tpu.memory_space<vmem>>, vector<1x1x16x16xf32>
    %5 = vector.shape_cast %4 : vector<1x1x16x16xf32> to vector<16x16xf32>
    %6 = arith.addf %1, %5 : vector<16x16xf32>
    %c0_10 = arith.constant 0 : index
    %c1_11 = arith.constant 1 : index
    %c0_12 = arith.constant 0 : index
    %c0_13 = arith.constant 0 : index
    %7 = vector.load %arg2[%c0_10, %c1_11, %c0_12, %c0_13] : memref<1x3x16x16xf32, #tpu.memory_space<vmem>>, vector<1x1x16x16xf32>
    %8 = vector.shape_cast %7 : vector<1x1x16x16xf32> to vector<16x16xf32>
    %9 = arith.addf %3, %8 : vector<16x16xf32>
    %c0_14 = arith.constant 0 : index
    %c2 = arith.constant 2 : index
    %c0_15 = arith.constant 0 : index
    %c0_16 = arith.constant 0 : index
    %10 = vector.load %arg1[%c0_14, %c2, %c0_15, %c0_16] : memref<1x3x16x16xf32, #tpu.memory_space<vmem>>, vector<1x1x16x16xf32>
    %11 = vector.shape_cast %10 : vector<1x1x16x16xf32> to vector<16x16xf32>
    %12 = arith.addf %6, %11 : vector<16x16xf32>
    %c0_17 = arith.constant 0 : index
    %c2_18 = arith.constant 2 : index
    %c0_19 = arith.constant 0 : index
    %c0_20 = arith.constant 0 : index
    %13 = vector.load %arg2[%c0_17, %c2_18, %c0_19, %c0_20] : memref<1x3x16x16xf32, #tpu.memory_space<vmem>>, vector<1x1x16x16xf32>
    %14 = vector.shape_cast %13 : vector<1x1x16x16xf32> to vector<16x16xf32>
    %15 = arith.addf %9, %14 : vector<16x16xf32>
    %cst = arith.constant 8.500000e+01 : f32
    %16 = vector.broadcast %cst : f32 to vector<16x16xf32>
    %17 = arith.mulf %12, %16 : vector<16x16xf32>
    %cst_21 = arith.constant 8.500000e+01 : f32
    %18 = vector.broadcast %cst_21 : f32 to vector<16x16xf32>
    %19 = arith.mulf %15, %18 : vector<16x16xf32>
    %20 = arith.truncf %19 : vector<16x16xf32> to vector<16x16xbf16>
    %c0_22 = arith.constant 0 : index
    %c0_23 = arith.constant 0 : index
    %c0_24 = arith.constant 0 : index
    %21 = vector.load %arg5[%c0_22, %c0_23, %c0_24] : memref<1x16x16xbf16, #tpu.memory_space<vmem>>, vector<1x16x16xbf16>
    %22 = vector.shape_cast %21 : vector<1x16x16xbf16> to vector<16x16xbf16>
    %23 = vector.shape_cast %20 : vector<16x16xbf16> to vector<1x16x16xbf16>
    tpu.vector_store %arg5[%c0_22, %c0_23, %c0_24], %23 {strides = array<i32>} : memref<1x16x16xbf16, #tpu.memory_space<vmem>>, vector<1x16x16xbf16>,
    %c3_i32 = arith.constant 3 : i32
    %24 = tpu.dynamic_rotate %17 by %c3_i32 dim 0 : vector<16x16xf32>, i32 -> vector<16x16xf32>
    %c3_i32_25 = arith.constant 3 : i32
    %25 = tpu.dynamic_rotate %24 by %c3_i32_25 dim 1 : vector<16x16xf32>, i32 -> vector<16x16xf32>
    %26 = arith.subf %25, %17 : vector<16x16xf32>
    %27 = arith.mulf %26, %26 : vector<16x16xf32>
    %cst_26 = arith.constant 8.100000e-01 : f32
    %28 = vector.broadcast %cst_26 : f32 to vector<16x16xf32>
    %29 = arith.addf %28, %27 : vector<16x16xf32>
    %30 = math.rsqrt %29 : vector<16x16xf32>
    %31 = arith.mulf %26, %30 : vector<16x16xf32>
    %32 = arith.truncf %31 : vector<16x16xf32> to vector<16x16xbf16>
    %c0_27 = arith.constant 0 : index
    %c0_28 = arith.constant 0 : index
    %c0_29 = arith.constant 0 : index
    %c0_30 = arith.constant 0 : index
    %33 = vector.load %arg3[%c0_27, %c0_28, %c0_29, %c0_30] : memref<1x49x16x16xbf16, #tpu.memory_space<vmem>>, vector<1x1x16x16xbf16>
    %34 = vector.shape_cast %33 : vector<1x1x16x16xbf16> to vector<16x16xbf16>
    %35 = vector.shape_cast %32 : vector<16x16xbf16> to vector<1x1x16x16xbf16>
    tpu.vector_store %arg3[%c0_27, %c0_28, %c0_29, %c0_30], %35 {strides = array<i32>} : memref<1x49x16x16xbf16, #tpu.memory_space<vmem>>, vector<1x1x16x16xbf16>,
    %c3_i32_31 = arith.constant 3 : i32
    %36 = tpu.dynamic_rotate %17 by %c3_i32_31 dim 0 : vector<16x16xf32>, i32 -> vector<16x16xf32>
    %c2_i32 = arith.constant 2 : i32
    %37 = tpu.dynamic_rotate %36 by %c2_i32 dim 1 : vector<16x16xf32>, i32 -> vector<16x16xf32>
    %38 = arith.subf %37, %17 : vector<16x16xf32>
    %39 = arith.mulf %38, %38 : vector<16x16xf32>
    %cst_32 = arith.constant 8.100000e-01 : f32
    %40 = vector.broadcast %cst_32 : f32 to vector<16x16xf32>
    %41 = arith.addf %40, %39 : vector<16x16xf32>
    %42 = math.rsqrt %41 : vector<16x16xf32>
    %43 = arith.mulf %38, %42 : vector<16x16xf32>
    %44 = arith.truncf %43 : vector<16x16xf32> to vector<16x16xbf16>
    %c0_33 = arith.constant 0 : index
    %c1_34 = arith.constant 1 : index
    %c0_35 = arith.constant 0 : index
    %c0_36 = arith.constant 0 : index
    %45 = vector.load %arg3[%c0_33, %c1_34, %c0_35, %c0_36] : memref<1x49x16x16xbf16, #tpu.memory_space<vmem>>, vector<1x1x16x16xbf16>
    %46 = vector.shape_cast %45 : vector<1x1x16x16xbf16> to vector<16x16xbf16>
    %47 = vector.shape_cast %44 : vector<16x16xbf16> to vector<1x1x16x16xbf16>
    tpu.vector_store %arg3[%c0_33, %c1_34, %c0_35, %c0_36], %47 {strides = array<i32>} : memref<1x49x16x16xbf16, #tpu.memory_space<vmem>>, vector<1x1x16x16xbf16>,
    %c3_i32_37 = arith.constant 3 : i32
    %48 = tpu.dynamic_rotate %17 by %c3_i32_37 dim 0 : vector<16x16xf32>, i32 -> vector<16x16xf32>
    %c1_i32 = arith.constant 1 : i32
    %49 = tpu.dynamic_rotate %48 by %c1_i32 dim 1 : vector<16x16xf32>, i32 -> vector<16x16xf32>
    %50 = arith.subf %49, %17 : vector<16x16xf32>
    %51 = arith.mulf %50, %50 : vector<16x16xf32>
    %cst_38 = arith.constant 8.100000e-01 : f32
    %52 = vector.broadcast %cst_38 : f32 to vector<16x16xf32>
    %53 = arith.addf %52, %51 : vector<16x16xf32>
    %54 = math.rsqrt %53 : vector<16x16xf32>
    %55 = arith.mulf %50, %54 : vector<16x16xf32>
    %56 = arith.truncf %55 : vector<16x16xf32> to vector<16x16xbf16>
    %c0_39 = arith.constant 0 : index
    %c2_40 = arith.constant 2 : index
    %c0_41 = arith.constant 0 : index
    %c0_42 = arith.constant 0 : index
    %57 = vector.load %arg3[%c0_39, %c2_40, %c0_41, %c0_42] : memref<1x49x16x16xbf16, #tpu.memory_space<vmem>>, vector<1x1x16x16xbf16>
    %58 = vector.shape_cast %57 : vector<1x1x16x16xbf16> to vector<16x16xbf16>
    %59 = vector.shape_cast %56 : vector<16x16xbf16> to vector<1x1x16x16xbf16>
    tpu.vector_store %arg3[%c0_39, %c2_40, %c0_41, %c0_42], %59 {strides = array<i32>} : memref<1x49x16x16xbf16, #tpu.memory_space<vmem>>, vector<1x1x16x16xbf16>,
    %c3_i32_43 = arith.constant 3 : i32
    %60 = tpu.dynamic_rotate %17 by %c3_i32_43 dim 0 : vector<16x16xf32>, i32 -> vector<16x16xf32>
    %61 = arith.subf %60, %17 : vector<16x16xf32>
    %62 = arith.mulf %61, %61 : vector<16x16xf32>
    %cst_44 = arith.constant 8.100000e-01 : f32
    %63 = vector.broadcast %cst_44 : f32 to vector<16x16xf32>
    %64 = arith.addf %63, %62 : vector<16x16xf32>
    %65 = math.rsqrt %64 : vector<16x16xf32>
    %66 = arith.mulf %61, %65 : vector<16x16xf32>
    %67 = arith.truncf %66 : vector<16x16xf32> to vector<16x16xbf16>
    %c0_45 = arith.constant 0 : index
    %c3 = arith.constant 3 : index
    %c0_46 = arith.constant 0 : index
    %c0_47 = arith.constant 0 : index
    %68 = vector.load %arg3[%c0_45, %c3, %c0_46, %c0_47] : memref<1x49x16x16xbf16, #tpu.memory_space<vmem>>, vector<1x1x16x16xbf16>
    %69 = vector.shape_cast %68 : vector<1x1x16x16xbf16> to vector<16x16xbf16>
    %70 = vector.shape_cast %67 : vector<16x16xbf16> to vector<1x1x16x16xbf16>
    tpu.vector_store %arg3[%c0_45, %c3, %c0_46, %c0_47], %70 {strides = array<i32>} : memref<1x49x16x16xbf16, #tpu.memory_space<vmem>>, vector<1x1x16x16xbf16>,
    %c3_i32_48 = arith.constant 3 : i32
    %71 = tpu.dynamic_rotate %17 by %c3_i32_48 dim 0 : vector<16x16xf32>, i32 -> vector<16x16xf32>
    %c15_i32 = arith.constant 15 : i32
    %72 = tpu.dynamic_rotate %71 by %c15_i32 dim 1 : vector<16x16xf32>, i32 -> vector<16x16xf32>
    %73 = arith.subf %72, %17 : vector<16x16xf32>
    %74 = arith.mulf %73, %73 : vector<16x16xf32>
    %cst_49 = arith.constant 8.100000e-01 : f32
    %75 = vector.broadcast %cst_49 : f32 to vector<16x16xf32>
    %76 = arith.addf %75, %74 : vector<16x16xf32>
    %77 = math.rsqrt %76 : vector<16x16xf32>
    %78 = arith.mulf %73, %77 : vector<16x16xf32>
    %79 = arith.truncf %78 : vector<16x16xf32> to vector<16x16xbf16>
    %c0_50 = arith.constant 0 : index
    %c4 = arith.constant 4 : index
    %c0_51 = arith.constant 0 : index
    %c0_52 = arith.constant 0 : index
    %80 = vector.load %arg3[%c0_50, %c4, %c0_51, %c0_52] : memref<1x49x16x16xbf16, #tpu.memory_space<vmem>>, vector<1x1x16x16xbf16>
    %81 = vector.shape_cast %80 : vector<1x1x16x16xbf16> to vector<16x16xbf16>
    %82 = vector.shape_cast %79 : vector<16x16xbf16> to vector<1x1x16x16xbf16>
    tpu.vector_store %arg3[%c0_50, %c4, %c0_51, %c0_52], %82 {strides = array<i32>} : memref<1x49x16x16xbf16, #tpu.memory_space<vmem>>, vector<1x1x16x16xbf16>,
    %c3_i32_53 = arith.constant 3 : i32
    %83 = tpu.dynamic_rotate %17 by %c3_i32_53 dim 0 : vector<16x16xf32>, i32 -> vector<16x16xf32>
    %c14_i32 = arith.constant 14 : i32
    %84 = tpu.dynamic_rotate %83 by %c14_i32 dim 1 : vector<16x16xf32>, i32 -> vector<16x16xf32>
    %85 = arith.subf %84, %17 : vector<16x16xf32>
    %86 = arith.mulf %85, %85 : vector<16x16xf32>
    %cst_54 = arith.constant 8.100000e-01 : f32
    %87 = vector.broadcast %cst_54 : f32 to vector<16x16xf32>
    %88 = arith.addf %87, %86 : vector<16x16xf32>
    %89 = math.rsqrt %88 : vector<16x16xf32>
    %90 = arith.mulf %85, %89 : vector<16x16xf32>
    %91 = arith.truncf %90 : vector<16x16xf32> to vector<16x16xbf16>
    %c0_55 = arith.constant 0 : index
    %c5 = arith.constant 5 : index
    %c0_56 = arith.constant 0 : index
    %c0_57 = arith.constant 0 : index
    %92 = vector.load %arg3[%c0_55, %c5, %c0_56, %c0_57] : memref<1x49x16x16xbf16, #tpu.memory_space<vmem>>, vector<1x1x16x16xbf16>
    %93 = vector.shape_cast %92 : vector<1x1x16x16xbf16> to vector<16x16xbf16>
    %94 = vector.shape_cast %91 : vector<16x16xbf16> to vector<1x1x16x16xbf16>
    tpu.vector_store %arg3[%c0_55, %c5, %c0_56, %c0_57], %94 {strides = array<i32>} : memref<1x49x16x16xbf16, #tpu.memory_space<vmem>>, vector<1x1x16x16xbf16>,
    %c3_i32_58 = arith.constant 3 : i32
    %95 = tpu.dynamic_rotate %17 by %c3_i32_58 dim 0 : vector<16x16xf32>, i32 -> vector<16x16xf32>
    %c13_i32 = arith.constant 13 : i32
    %96 = tpu.dynamic_rotate %95 by %c13_i32 dim 1 : vector<16x16xf32>, i32 -> vector<16x16xf32>
    %97 = arith.subf %96, %17 : vector<16x16xf32>
    %98 = arith.mulf %97, %97 : vector<16x16xf32>
    %cst_59 = arith.constant 8.100000e-01 : f32
    %99 = vector.broadcast %cst_59 : f32 to vector<16x16xf32>
    %100 = arith.addf %99, %98 : vector<16x16xf32>
    %101 = math.rsqrt %100 : vector<16x16xf32>
    %102 = arith.mulf %97, %101 : vector<16x16xf32>
    %103 = arith.truncf %102 : vector<16x16xf32> to vector<16x16xbf16>
    %c0_60 = arith.constant 0 : index
    %c6 = arith.constant 6 : index
    %c0_61 = arith.constant 0 : index
    %c0_62 = arith.constant 0 : index
    %104 = vector.load %arg3[%c0_60, %c6, %c0_61, %c0_62] : memref<1x49x16x16xbf16, #tpu.memory_space<vmem>>, vector<1x1x16x16xbf16>
    %105 = vector.shape_cast %104 : vector<1x1x16x16xbf16> to vector<16x16xbf16>
    %106 = vector.shape_cast %103 : vector<16x16xbf16> to vector<1x1x16x16xbf16>
    tpu.vector_store %arg3[%c0_60, %c6, %c0_61, %c0_62], %106 {strides = array<i32>} : memref<1x49x16x16xbf16, #tpu.memory_space<vmem>>, vector<1x1x16x16xbf16>,
    %c2_i32_63 = arith.constant 2 : i32
    %107 = tpu.dynamic_rotate %17 by %c2_i32_63 dim 0 : vector<16x16xf32>, i32 -> vector<16x16xf32>
    %c3_i32_64 = arith.constant 3 : i32
    %108 = tpu.dynamic_rotate %107 by %c3_i32_64 dim 1 : vector<16x16xf32>, i32 -> vector<16x16xf32>
    %109 = arith.subf %108, %17 : vector<16x16xf32>
    %110 = arith.mulf %109, %109 : vector<16x16xf32>
    %cst_65 = arith.constant 8.100000e-01 : f32
    %111 = vector.broadcast %cst_65 : f32 to vector<16x16xf32>
    %112 = arith.addf %111, %110 : vector<16x16xf32>
    %113 = math.rsqrt %112 : vector<16x16xf32>
    %114 = arith.mulf %109, %113 : vector<16x16xf32>
    %115 = arith.truncf %114 : vector<16x16xf32> to vector<16x16xbf16>
    %c0_66 = arith.constant 0 : index
    %c7 = arith.constant 7 : index
    %c0_67 = arith.constant 0 : index
    %c0_68 = arith.constant 0 : index
    %116 = vector.load %arg3[%c0_66, %c7, %c0_67, %c0_68] : memref<1x49x16x16xbf16, #tpu.memory_space<vmem>>, vector<1x1x16x16xbf16>
    %117 = vector.shape_cast %116 : vector<1x1x16x16xbf16> to vector<16x16xbf16>
    %118 = vector.shape_cast %115 : vector<16x16xbf16> to vector<1x1x16x16xbf16>
    tpu.vector_store %arg3[%c0_66, %c7, %c0_67, %c0_68], %118 {strides = array<i32>} : memref<1x49x16x16xbf16, #tpu.memory_space<vmem>>, vector<1x1x16x16xbf16>,
    %c2_i32_69 = arith.constant 2 : i32
    %119 = tpu.dynamic_rotate %17 by %c2_i32_69 dim 0 : vector<16x16xf32>, i32 -> vector<16x16xf32>
    %c2_i32_70 = arith.constant 2 : i32
    %120 = tpu.dynamic_rotate %119 by %c2_i32_70 dim 1 : vector<16x16xf32>, i32 -> vector<16x16xf32>
    %121 = arith.subf %120, %17 : vector<16x16xf32>
    %122 = arith.mulf %121, %121 : vector<16x16xf32>
    %cst_71 = arith.constant 8.100000e-01 : f32
    %123 = vector.broadcast %cst_71 : f32 to vector<16x16xf32>
    %124 = arith.addf %123, %122 : vector<16x16xf32>
    %125 = math.rsqrt %124 : vector<16x16xf32>
    %126 = arith.mulf %121, %125 : vector<16x16xf32>
    %127 = arith.truncf %126 : vector<16x16xf32> to vector<16x16xbf16>
    %c0_72 = arith.constant 0 : index
    %c8 = arith.constant 8 : index
    %c0_73 = arith.constant 0 : index
    %c0_74 = arith.constant 0 : index
    %128 = vector.load %arg3[%c0_72, %c8, %c0_73, %c0_74] : memref<1x49x16x16xbf16, #tpu.memory_space<vmem>>, vector<1x1x16x16xbf16>
    %129 = vector.shape_cast %128 : vector<1x1x16x16xbf16> to vector<16x16xbf16>
    %130 = vector.shape_cast %127 : vector<16x16xbf16> to vector<1x1x16x16xbf16>
    tpu.vector_store %arg3[%c0_72, %c8, %c0_73, %c0_74], %130 {strides = array<i32>} : memref<1x49x16x16xbf16, #tpu.memory_space<vmem>>, vector<1x1x16x16xbf16>,
    %c2_i32_75 = arith.constant 2 : i32
    %131 = tpu.dynamic_rotate %17 by %c2_i32_75 dim 0 : vector<16x16xf32>, i32 -> vector<16x16xf32>
    %c1_i32_76 = arith.constant 1 : i32
    %132 = tpu.dynamic_rotate %131 by %c1_i32_76 dim 1 : vector<16x16xf32>, i32 -> vector<16x16xf32>
    %133 = arith.subf %132, %17 : vector<16x16xf32>
    %134 = arith.mulf %133, %133 : vector<16x16xf32>
    %cst_77 = arith.constant 8.100000e-01 : f32
    %135 = vector.broadcast %cst_77 : f32 to vector<16x16xf32>
    %136 = arith.addf %135, %134 : vector<16x16xf32>
    %137 = math.rsqrt %136 : vector<16x16xf32>
    %138 = arith.mulf %133, %137 : vector<16x16xf32>
    %139 = arith.truncf %138 : vector<16x16xf32> to vector<16x16xbf16>
    %c0_78 = arith.constant 0 : index
    %c9 = arith.constant 9 : index
    %c0_79 = arith.constant 0 : index
    %c0_80 = arith.constant 0 : index
    %140 = vector.load %arg3[%c0_78, %c9, %c0_79, %c0_80] : memref<1x49x16x16xbf16, #tpu.memory_space<vmem>>, vector<1x1x16x16xbf16>
    %141 = vector.shape_cast %140 : vector<1x1x16x16xbf16> to vector<16x16xbf16>
    %142 = vector.shape_cast %139 : vector<16x16xbf16> to vector<1x1x16x16xbf16>
    tpu.vector_store %arg3[%c0_78, %c9, %c0_79, %c0_80], %142 {strides = array<i32>} : memref<1x49x16x16xbf16, #tpu.memory_space<vmem>>, vector<1x1x16x16xbf16>,
    %c2_i32_81 = arith.constant 2 : i32
    %143 = tpu.dynamic_rotate %17 by %c2_i32_81 dim 0 : vector<16x16xf32>, i32 -> vector<16x16xf32>
    %144 = arith.subf %143, %17 : vector<16x16xf32>
    %145 = arith.mulf %144, %144 : vector<16x16xf32>
    %cst_82 = arith.constant 8.100000e-01 : f32
    %146 = vector.broadcast %cst_82 : f32 to vector<16x16xf32>
    %147 = arith.addf %146, %145 : vector<16x16xf32>
    %148 = math.rsqrt %147 : vector<16x16xf32>
    %149 = arith.mulf %144, %148 : vector<16x16xf32>
    %150 = arith.truncf %149 : vector<16x16xf32> to vector<16x16xbf16>
    %c0_83 = arith.constant 0 : index
    %c10 = arith.constant 10 : index
    %c0_84 = arith.constant 0 : index
    %c0_85 = arith.constant 0 : index
    %151 = vector.load %arg3[%c0_83, %c10, %c0_84, %c0_85] : memref<1x49x16x16xbf16, #tpu.memory_space<vmem>>, vector<1x1x16x16xbf16>
    %152 = vector.shape_cast %151 : vector<1x1x16x16xbf16> to vector<16x16xbf16>
    %153 = vector.shape_cast %150 : vector<16x16xbf16> to vector<1x1x16x16xbf16>
    tpu.vector_store %arg3[%c0_83, %c10, %c0_84, %c0_85], %153 {strides = array<i32>} : memref<1x49x16x16xbf16, #tpu.memory_space<vmem>>, vector<1x1x16x16xbf16>,
    %c2_i32_86 = arith.constant 2 : i32
    %154 = tpu.dynamic_rotate %17 by %c2_i32_86 dim 0 : vector<16x16xf32>, i32 -> vector<16x16xf32>
    %c15_i32_87 = arith.constant 15 : i32
    %155 = tpu.dynamic_rotate %154 by %c15_i32_87 dim 1 : vector<16x16xf32>, i32 -> vector<16x16xf32>
    %156 = arith.subf %155, %17 : vector<16x16xf32>
    %157 = arith.mulf %156, %156 : vector<16x16xf32>
    %cst_88 = arith.constant 8.100000e-01 : f32
    %158 = vector.broadcast %cst_88 : f32 to vector<16x16xf32>
    %159 = arith.addf %158, %157 : vector<16x16xf32>
    %160 = math.rsqrt %159 : vector<16x16xf32>
    %161 = arith.mulf %156, %160 : vector<16x16xf32>
    %162 = arith.truncf %161 : vector<16x16xf32> to vector<16x16xbf16>
    %c0_89 = arith.constant 0 : index
    %c11 = arith.constant 11 : index
    %c0_90 = arith.constant 0 : index
    %c0_91 = arith.constant 0 : index
    %163 = vector.load %arg3[%c0_89, %c11, %c0_90, %c0_91] : memref<1x49x16x16xbf16, #tpu.memory_space<vmem>>, vector<1x1x16x16xbf16>
    %164 = vector.shape_cast %163 : vector<1x1x16x16xbf16> to vector<16x16xbf16>
    %165 = vector.shape_cast %162 : vector<16x16xbf16> to vector<1x1x16x16xbf16>
    tpu.vector_store %arg3[%c0_89, %c11, %c0_90, %c0_91], %165 {strides = array<i32>} : memref<1x49x16x16xbf16, #tpu.memory_space<vmem>>, vector<1x1x16x16xbf16>,
    %c2_i32_92 = arith.constant 2 : i32
    %166 = tpu.dynamic_rotate %17 by %c2_i32_92 dim 0 : vector<16x16xf32>, i32 -> vector<16x16xf32>
    %c14_i32_93 = arith.constant 14 : i32
    %167 = tpu.dynamic_rotate %166 by %c14_i32_93 dim 1 : vector<16x16xf32>, i32 -> vector<16x16xf32>
    %168 = arith.subf %167, %17 : vector<16x16xf32>
    %169 = arith.mulf %168, %168 : vector<16x16xf32>
    %cst_94 = arith.constant 8.100000e-01 : f32
    %170 = vector.broadcast %cst_94 : f32 to vector<16x16xf32>
    %171 = arith.addf %170, %169 : vector<16x16xf32>
    %172 = math.rsqrt %171 : vector<16x16xf32>
    %173 = arith.mulf %168, %172 : vector<16x16xf32>
    %174 = arith.truncf %173 : vector<16x16xf32> to vector<16x16xbf16>
    %c0_95 = arith.constant 0 : index
    %c12 = arith.constant 12 : index
    %c0_96 = arith.constant 0 : index
    %c0_97 = arith.constant 0 : index
    %175 = vector.load %arg3[%c0_95, %c12, %c0_96, %c0_97] : memref<1x49x16x16xbf16, #tpu.memory_space<vmem>>, vector<1x1x16x16xbf16>
    %176 = vector.shape_cast %175 : vector<1x1x16x16xbf16> to vector<16x16xbf16>
    %177 = vector.shape_cast %174 : vector<16x16xbf16> to vector<1x1x16x16xbf16>
    tpu.vector_store %arg3[%c0_95, %c12, %c0_96, %c0_97], %177 {strides = array<i32>} : memref<1x49x16x16xbf16, #tpu.memory_space<vmem>>, vector<1x1x16x16xbf16>,
    %c2_i32_98 = arith.constant 2 : i32
    %178 = tpu.dynamic_rotate %17 by %c2_i32_98 dim 0 : vector<16x16xf32>, i32 -> vector<16x16xf32>
    %c13_i32_99 = arith.constant 13 : i32
    %179 = tpu.dynamic_rotate %178 by %c13_i32_99 dim 1 : vector<16x16xf32>, i32 -> vector<16x16xf32>
    %180 = arith.subf %179, %17 : vector<16x16xf32>
    %181 = arith.mulf %180, %180 : vector<16x16xf32>
    %cst_100 = arith.constant 8.100000e-01 : f32
    %182 = vector.broadcast %cst_100 : f32 to vector<16x16xf32>
    %183 = arith.addf %182, %181 : vector<16x16xf32>
    %184 = math.rsqrt %183 : vector<16x16xf32>
    %185 = arith.mulf %180, %184 : vector<16x16xf32>
    %186 = arith.truncf %185 : vector<16x16xf32> to vector<16x16xbf16>
    %c0_101 = arith.constant 0 : index
    %c13 = arith.constant 13 : index
    %c0_102 = arith.constant 0 : index
    %c0_103 = arith.constant 0 : index
    %187 = vector.load %arg3[%c0_101, %c13, %c0_102, %c0_103] : memref<1x49x16x16xbf16, #tpu.memory_space<vmem>>, vector<1x1x16x16xbf16>
    %188 = vector.shape_cast %187 : vector<1x1x16x16xbf16> to vector<16x16xbf16>
    %189 = vector.shape_cast %186 : vector<16x16xbf16> to vector<1x1x16x16xbf16>
    tpu.vector_store %arg3[%c0_101, %c13, %c0_102, %c0_103], %189 {strides = array<i32>} : memref<1x49x16x16xbf16, #tpu.memory_space<vmem>>, vector<1x1x16x16xbf16>,
    %c1_i32_104 = arith.constant 1 : i32
    %190 = tpu.dynamic_rotate %17 by %c1_i32_104 dim 0 : vector<16x16xf32>, i32 -> vector<16x16xf32>
    %c3_i32_105 = arith.constant 3 : i32
    %191 = tpu.dynamic_rotate %190 by %c3_i32_105 dim 1 : vector<16x16xf32>, i32 -> vector<16x16xf32>
    %192 = arith.subf %191, %17 : vector<16x16xf32>
    %193 = arith.mulf %192, %192 : vector<16x16xf32>
    %cst_106 = arith.constant 8.100000e-01 : f32
    %194 = vector.broadcast %cst_106 : f32 to vector<16x16xf32>
    %195 = arith.addf %194, %193 : vector<16x16xf32>
    %196 = math.rsqrt %195 : vector<16x16xf32>
    %197 = arith.mulf %192, %196 : vector<16x16xf32>
    %198 = arith.truncf %197 : vector<16x16xf32> to vector<16x16xbf16>
    %c0_107 = arith.constant 0 : index
    %c14 = arith.constant 14 : index
    %c0_108 = arith.constant 0 : index
    %c0_109 = arith.constant 0 : index
    %199 = vector.load %arg3[%c0_107, %c14, %c0_108, %c0_109] : memref<1x49x16x16xbf16, #tpu.memory_space<vmem>>, vector<1x1x16x16xbf16>
    %200 = vector.shape_cast %199 : vector<1x1x16x16xbf16> to vector<16x16xbf16>
    %201 = vector.shape_cast %198 : vector<16x16xbf16> to vector<1x1x16x16xbf16>
    tpu.vector_store %arg3[%c0_107, %c14, %c0_108, %c0_109], %201 {strides = array<i32>} : memref<1x49x16x16xbf16, #tpu.memory_space<vmem>>, vector<1x1x16x16xbf16>,
    %c1_i32_110 = arith.constant 1 : i32
    %202 = tpu.dynamic_rotate %17 by %c1_i32_110 dim 0 : vector<16x16xf32>, i32 -> vector<16x16xf32>
    %c2_i32_111 = arith.constant 2 : i32
    %203 = tpu.dynamic_rotate %202 by %c2_i32_111 dim 1 : vector<16x16xf32>, i32 -> vector<16x16xf32>
    %204 = arith.subf %203, %17 : vector<16x16xf32>
    %205 = arith.mulf %204, %204 : vector<16x16xf32>
    %cst_112 = arith.constant 8.100000e-01 : f32
    %206 = vector.broadcast %cst_112 : f32 to vector<16x16xf32>
    %207 = arith.addf %206, %205 : vector<16x16xf32>
    %208 = math.rsqrt %207 : vector<16x16xf32>
    %209 = arith.mulf %204, %208 : vector<16x16xf32>
    %210 = arith.truncf %209 : vector<16x16xf32> to vector<16x16xbf16>
    %c0_113 = arith.constant 0 : index
    %c15 = arith.constant 15 : index
    %c0_114 = arith.constant 0 : index
    %c0_115 = arith.constant 0 : index
    %211 = vector.load %arg3[%c0_113, %c15, %c0_114, %c0_115] : memref<1x49x16x16xbf16, #tpu.memory_space<vmem>>, vector<1x1x16x16xbf16>
    %212 = vector.shape_cast %211 : vector<1x1x16x16xbf16> to vector<16x16xbf16>
    %213 = vector.shape_cast %210 : vector<16x16xbf16> to vector<1x1x16x16xbf16>
    tpu.vector_store %arg3[%c0_113, %c15, %c0_114, %c0_115], %213 {strides = array<i32>} : memref<1x49x16x16xbf16, #tpu.memory_space<vmem>>, vector<1x1x16x16xbf16>,
    %c1_i32_116 = arith.constant 1 : i32
    %214 = tpu.dynamic_rotate %17 by %c1_i32_116 dim 0 : vector<16x16xf32>, i32 -> vector<16x16xf32>
    %c1_i32_117 = arith.constant 1 : i32
    %215 = tpu.dynamic_rotate %214 by %c1_i32_117 dim 1 : vector<16x16xf32>, i32 -> vector<16x16xf32>
    %216 = arith.subf %215, %17 : vector<16x16xf32>
    %217 = arith.mulf %216, %216 : vector<16x16xf32>
    %cst_118 = arith.constant 8.100000e-01 : f32
    %218 = vector.broadcast %cst_118 : f32 to vector<16x16xf32>
    %219 = arith.addf %218, %217 : vector<16x16xf32>
    %220 = math.rsqrt %219 : vector<16x16xf32>
    %221 = arith.mulf %216, %220 : vector<16x16xf32>
    %222 = arith.truncf %221 : vector<16x16xf32> to vector<16x16xbf16>
    %c0_119 = arith.constant 0 : index
    %c16 = arith.constant 16 : index
    %c0_120 = arith.constant 0 : index
    %c0_121 = arith.constant 0 : index
    %223 = vector.load %arg3[%c0_119, %c16, %c0_120, %c0_121] : memref<1x49x16x16xbf16, #tpu.memory_space<vmem>>, vector<1x1x16x16xbf16>
    %224 = vector.shape_cast %223 : vector<1x1x16x16xbf16> to vector<16x16xbf16>
    %225 = vector.shape_cast %222 : vector<16x16xbf16> to vector<1x1x16x16xbf16>
    tpu.vector_store %arg3[%c0_119, %c16, %c0_120, %c0_121], %225 {strides = array<i32>} : memref<1x49x16x16xbf16, #tpu.memory_space<vmem>>, vector<1x1x16x16xbf16>,
    %c1_i32_122 = arith.constant 1 : i32
    %226 = tpu.dynamic_rotate %17 by %c1_i32_122 dim 0 : vector<16x16xf32>, i32 -> vector<16x16xf32>
    %227 = arith.subf %226, %17 : vector<16x16xf32>
    %228 = arith.mulf %227, %227 : vector<16x16xf32>
    %cst_123 = arith.constant 8.100000e-01 : f32
    %229 = vector.broadcast %cst_123 : f32 to vector<16x16xf32>
    %230 = arith.addf %229, %228 : vector<16x16xf32>
    %231 = math.rsqrt %230 : vector<16x16xf32>
    %232 = arith.mulf %227, %231 : vector<16x16xf32>
    %233 = arith.truncf %232 : vector<16x16xf32> to vector<16x16xbf16>
    %c0_124 = arith.constant 0 : index
    %c17 = arith.constant 17 : index
    %c0_125 = arith.constant 0 : index
    %c0_126 = arith.constant 0 : index
    %234 = vector.load %arg3[%c0_124, %c17, %c0_125, %c0_126] : memref<1x49x16x16xbf16, #tpu.memory_space<vmem>>, vector<1x1x16x16xbf16>
    %235 = vector.shape_cast %234 : vector<1x1x16x16xbf16> to vector<16x16xbf16>
    %236 = vector.shape_cast %233 : vector<16x16xbf16> to vector<1x1x16x16xbf16>
    tpu.vector_store %arg3[%c0_124, %c17, %c0_125, %c0_126], %236 {strides = array<i32>} : memref<1x49x16x16xbf16, #tpu.memory_space<vmem>>, vector<1x1x16x16xbf16>,
    %c1_i32_127 = arith.constant 1 : i32
    %237 = tpu.dynamic_rotate %17 by %c1_i32_127 dim 0 : vector<16x16xf32>, i32 -> vector<16x16xf32>
    %c15_i32_128 = arith.constant 15 : i32
    %238 = tpu.dynamic_rotate %237 by %c15_i32_128 dim 1 : vector<16x16xf32>, i32 -> vector<16x16xf32>
    %239 = arith.subf %238, %17 : vector<16x16xf32>
    %240 = arith.mulf %239, %239 : vector<16x16xf32>
    %cst_129 = arith.constant 8.100000e-01 : f32
    %241 = vector.broadcast %cst_129 : f32 to vector<16x16xf32>
    %242 = arith.addf %241, %240 : vector<16x16xf32>
    %243 = math.rsqrt %242 : vector<16x16xf32>
    %244 = arith.mulf %239, %243 : vector<16x16xf32>
    %245 = arith.truncf %244 : vector<16x16xf32> to vector<16x16xbf16>
    %c0_130 = arith.constant 0 : index
    %c18 = arith.constant 18 : index
    %c0_131 = arith.constant 0 : index
    %c0_132 = arith.constant 0 : index
    %246 = vector.load %arg3[%c0_130, %c18, %c0_131, %c0_132] : memref<1x49x16x16xbf16, #tpu.memory_space<vmem>>, vector<1x1x16x16xbf16>
    %247 = vector.shape_cast %246 : vector<1x1x16x16xbf16> to vector<16x16xbf16>
    %248 = vector.shape_cast %245 : vector<16x16xbf16> to vector<1x1x16x16xbf16>
    tpu.vector_store %arg3[%c0_130, %c18, %c0_131, %c0_132], %248 {strides = array<i32>} : memref<1x49x16x16xbf16, #tpu.memory_space<vmem>>, vector<1x1x16x16xbf16>,
    %c1_i32_133 = arith.constant 1 : i32
    %249 = tpu.dynamic_rotate %17 by %c1_i32_133 dim 0 : vector<16x16xf32>, i32 -> vector<16x16xf32>
    %c14_i32_134 = arith.constant 14 : i32
    %250 = tpu.dynamic_rotate %249 by %c14_i32_134 dim 1 : vector<16x16xf32>, i32 -> vector<16x16xf32>
    %251 = arith.subf %250, %17 : vector<16x16xf32>
    %252 = arith.mulf %251, %251 : vector<16x16xf32>
    %cst_135 = arith.constant 8.100000e-01 : f32
    %253 = vector.broadcast %cst_135 : f32 to vector<16x16xf32>
    %254 = arith.addf %253, %252 : vector<16x16xf32>
    %255 = math.rsqrt %254 : vector<16x16xf32>
    %256 = arith.mulf %251, %255 : vector<16x16xf32>
    %257 = arith.truncf %256 : vector<16x16xf32> to vector<16x16xbf16>
    %c0_136 = arith.constant 0 : index
    %c19 = arith.constant 19 : index
    %c0_137 = arith.constant 0 : index
    %c0_138 = arith.constant 0 : index
    %258 = vector.load %arg3[%c0_136, %c19, %c0_137, %c0_138] : memref<1x49x16x16xbf16, #tpu.memory_space<vmem>>, vector<1x1x16x16xbf16>
    %259 = vector.shape_cast %258 : vector<1x1x16x16xbf16> to vector<16x16xbf16>
    %260 = vector.shape_cast %257 : vector<16x16xbf16> to vector<1x1x16x16xbf16>
    tpu.vector_store %arg3[%c0_136, %c19, %c0_137, %c0_138], %260 {strides = array<i32>} : memref<1x49x16x16xbf16, #tpu.memory_space<vmem>>, vector<1x1x16x16xbf16>,
    %c1_i32_139 = arith.constant 1 : i32
    %261 = tpu.dynamic_rotate %17 by %c1_i32_139 dim 0 : vector<16x16xf32>, i32 -> vector<16x16xf32>
    %c13_i32_140 = arith.constant 13 : i32
    %262 = tpu.dynamic_rotate %261 by %c13_i32_140 dim 1 : vector<16x16xf32>, i32 -> vector<16x16xf32>
    %263 = arith.subf %262, %17 : vector<16x16xf32>
    %264 = arith.mulf %263, %263 : vector<16x16xf32>
    %cst_141 = arith.constant 8.100000e-01 : f32
    %265 = vector.broadcast %cst_141 : f32 to vector<16x16xf32>
    %266 = arith.addf %265, %264 : vector<16x16xf32>
    %267 = math.rsqrt %266 : vector<16x16xf32>
    %268 = arith.mulf %263, %267 : vector<16x16xf32>
    %269 = arith.truncf %268 : vector<16x16xf32> to vector<16x16xbf16>
    %c0_142 = arith.constant 0 : index
    %c20 = arith.constant 20 : index
    %c0_143 = arith.constant 0 : index
    %c0_144 = arith.constant 0 : index
    %270 = vector.load %arg3[%c0_142, %c20, %c0_143, %c0_144] : memref<1x49x16x16xbf16, #tpu.memory_space<vmem>>, vector<1x1x16x16xbf16>
    %271 = vector.shape_cast %270 : vector<1x1x16x16xbf16> to vector<16x16xbf16>
    %272 = vector.shape_cast %269 : vector<16x16xbf16> to vector<1x1x16x16xbf16>
    tpu.vector_store %arg3[%c0_142, %c20, %c0_143, %c0_144], %272 {strides = array<i32>} : memref<1x49x16x16xbf16, #tpu.memory_space<vmem>>, vector<1x1x16x16xbf16>,
    %c3_i32_145 = arith.constant 3 : i32
    %273 = tpu.dynamic_rotate %17 by %c3_i32_145 dim 1 : vector<16x16xf32>, i32 -> vector<16x16xf32>
    %274 = arith.subf %273, %17 : vector<16x16xf32>
    %275 = arith.mulf %274, %274 : vector<16x16xf32>
    %cst_146 = arith.constant 8.100000e-01 : f32
    %276 = vector.broadcast %cst_146 : f32 to vector<16x16xf32>
    %277 = arith.addf %276, %275 : vector<16x16xf32>
    %278 = math.rsqrt %277 : vector<16x16xf32>
    %279 = arith.mulf %274, %278 : vector<16x16xf32>
    %280 = arith.truncf %279 : vector<16x16xf32> to vector<16x16xbf16>
    %c0_147 = arith.constant 0 : index
    %c21 = arith.constant 21 : index
    %c0_148 = arith.constant 0 : index
    %c0_149 = arith.constant 0 : index
    %281 = vector.load %arg3[%c0_147, %c21, %c0_148, %c0_149] : memref<1x49x16x16xbf16, #tpu.memory_space<vmem>>, vector<1x1x16x16xbf16>
    %282 = vector.shape_cast %281 : vector<1x1x16x16xbf16> to vector<16x16xbf16>
    %283 = vector.shape_cast %280 : vector<16x16xbf16> to vector<1x1x16x16xbf16>
    tpu.vector_store %arg3[%c0_147, %c21, %c0_148, %c0_149], %283 {strides = array<i32>} : memref<1x49x16x16xbf16, #tpu.memory_space<vmem>>, vector<1x1x16x16xbf16>,
    %c2_i32_150 = arith.constant 2 : i32
    %284 = tpu.dynamic_rotate %17 by %c2_i32_150 dim 1 : vector<16x16xf32>, i32 -> vector<16x16xf32>
    %285 = arith.subf %284, %17 : vector<16x16xf32>
    %286 = arith.mulf %285, %285 : vector<16x16xf32>
    %cst_151 = arith.constant 8.100000e-01 : f32
    %287 = vector.broadcast %cst_151 : f32 to vector<16x16xf32>
    %288 = arith.addf %287, %286 : vector<16x16xf32>
    %289 = math.rsqrt %288 : vector<16x16xf32>
    %290 = arith.mulf %285, %289 : vector<16x16xf32>
    %291 = arith.truncf %290 : vector<16x16xf32> to vector<16x16xbf16>
    %c0_152 = arith.constant 0 : index
    %c22 = arith.constant 22 : index
    %c0_153 = arith.constant 0 : index
    %c0_154 = arith.constant 0 : index
    %292 = vector.load %arg3[%c0_152, %c22, %c0_153, %c0_154] : memref<1x49x16x16xbf16, #tpu.memory_space<vmem>>, vector<1x1x16x16xbf16>
    %293 = vector.shape_cast %292 : vector<1x1x16x16xbf16> to vector<16x16xbf16>
    %294 = vector.shape_cast %291 : vector<16x16xbf16> to vector<1x1x16x16xbf16>
    tpu.vector_store %arg3[%c0_152, %c22, %c0_153, %c0_154], %294 {strides = array<i32>} : memref<1x49x16x16xbf16, #tpu.memory_space<vmem>>, vector<1x1x16x16xbf16>,
    %c1_i32_155 = arith.constant 1 : i32
    %295 = tpu.dynamic_rotate %17 by %c1_i32_155 dim 1 : vector<16x16xf32>, i32 -> vector<16x16xf32>
    %296 = arith.subf %295, %17 : vector<16x16xf32>
    %297 = arith.mulf %296, %296 : vector<16x16xf32>
    %cst_156 = arith.constant 8.100000e-01 : f32
    %298 = vector.broadcast %cst_156 : f32 to vector<16x16xf32>
    %299 = arith.addf %298, %297 : vector<16x16xf32>
    %300 = math.rsqrt %299 : vector<16x16xf32>
    %301 = arith.mulf %296, %300 : vector<16x16xf32>
    %302 = arith.truncf %301 : vector<16x16xf32> to vector<16x16xbf16>
    %c0_157 = arith.constant 0 : index
    %c23 = arith.constant 23 : index
    %c0_158 = arith.constant 0 : index
    %c0_159 = arith.constant 0 : index
    %303 = vector.load %arg3[%c0_157, %c23, %c0_158, %c0_159] : memref<1x49x16x16xbf16, #tpu.memory_space<vmem>>, vector<1x1x16x16xbf16>
    %304 = vector.shape_cast %303 : vector<1x1x16x16xbf16> to vector<16x16xbf16>
    %305 = vector.shape_cast %302 : vector<16x16xbf16> to vector<1x1x16x16xbf16>
    tpu.vector_store %arg3[%c0_157, %c23, %c0_158, %c0_159], %305 {strides = array<i32>} : memref<1x49x16x16xbf16, #tpu.memory_space<vmem>>, vector<1x1x16x16xbf16>,
    %306 = arith.subf %17, %17 : vector<16x16xf32>
    %307 = arith.mulf %306, %306 : vector<16x16xf32>
    %cst_160 = arith.constant 8.100000e-01 : f32
    %308 = vector.broadcast %cst_160 : f32 to vector<16x16xf32>
    %309 = arith.addf %308, %307 : vector<16x16xf32>
    %310 = math.rsqrt %309 : vector<16x16xf32>
    %311 = arith.mulf %306, %310 : vector<16x16xf32>
    %312 = arith.truncf %311 : vector<16x16xf32> to vector<16x16xbf16>
    %c0_161 = arith.constant 0 : index
    %c24 = arith.constant 24 : index
    %c0_162 = arith.constant 0 : index
    %c0_163 = arith.constant 0 : index
    %313 = vector.load %arg3[%c0_161, %c24, %c0_162, %c0_163] : memref<1x49x16x16xbf16, #tpu.memory_space<vmem>>, vector<1x1x16x16xbf16>
    %314 = vector.shape_cast %313 : vector<1x1x16x16xbf16> to vector<16x16xbf16>
    %315 = vector.shape_cast %312 : vector<16x16xbf16> to vector<1x1x16x16xbf16>
    tpu.vector_store %arg3[%c0_161, %c24, %c0_162, %c0_163], %315 {strides = array<i32>} : memref<1x49x16x16xbf16, #tpu.memory_space<vmem>>, vector<1x1x16x16xbf16>,
    %c15_i32_164 = arith.constant 15 : i32
    %316 = tpu.dynamic_rotate %17 by %c15_i32_164 dim 1 : vector<16x16xf32>, i32 -> vector<16x16xf32>
    %317 = arith.subf %316, %17 : vector<16x16xf32>
    %318 = arith.mulf %317, %317 : vector<16x16xf32>
    %cst_165 = arith.constant 8.100000e-01 : f32
    %319 = vector.broadcast %cst_165 : f32 to vector<16x16xf32>
    %320 = arith.addf %319, %318 : vector<16x16xf32>
    %321 = math.rsqrt %320 : vector<16x16xf32>
    %322 = arith.mulf %317, %321 : vector<16x16xf32>
    %323 = arith.truncf %322 : vector<16x16xf32> to vector<16x16xbf16>
    %c0_166 = arith.constant 0 : index
    %c25 = arith.constant 25 : index
    %c0_167 = arith.constant 0 : index
    %c0_168 = arith.constant 0 : index
    %324 = vector.load %arg3[%c0_166, %c25, %c0_167, %c0_168] : memref<1x49x16x16xbf16, #tpu.memory_space<vmem>>, vector<1x1x16x16xbf16>
    %325 = vector.shape_cast %324 : vector<1x1x16x16xbf16> to vector<16x16xbf16>
    %326 = vector.shape_cast %323 : vector<16x16xbf16> to vector<1x1x16x16xbf16>
    tpu.vector_store %arg3[%c0_166, %c25, %c0_167, %c0_168], %326 {strides = array<i32>} : memref<1x49x16x16xbf16, #tpu.memory_space<vmem>>, vector<1x1x16x16xbf16>,
    %c14_i32_169 = arith.constant 14 : i32
    %327 = tpu.dynamic_rotate %17 by %c14_i32_169 dim 1 : vector<16x16xf32>, i32 -> vector<16x16xf32>
    %328 = arith.subf %327, %17 : vector<16x16xf32>
    %329 = arith.mulf %328, %328 : vector<16x16xf32>
    %cst_170 = arith.constant 8.100000e-01 : f32
    %330 = vector.broadcast %cst_170 : f32 to vector<16x16xf32>
    %331 = arith.addf %330, %329 : vector<16x16xf32>
    %332 = math.rsqrt %331 : vector<16x16xf32>
    %333 = arith.mulf %328, %332 : vector<16x16xf32>
    %334 = arith.truncf %333 : vector<16x16xf32> to vector<16x16xbf16>
    %c0_171 = arith.constant 0 : index
    %c26 = arith.constant 26 : index
    %c0_172 = arith.constant 0 : index
    %c0_173 = arith.constant 0 : index
    %335 = vector.load %arg3[%c0_171, %c26, %c0_172, %c0_173] : memref<1x49x16x16xbf16, #tpu.memory_space<vmem>>, vector<1x1x16x16xbf16>
    %336 = vector.shape_cast %335 : vector<1x1x16x16xbf16> to vector<16x16xbf16>
    %337 = vector.shape_cast %334 : vector<16x16xbf16> to vector<1x1x16x16xbf16>
    tpu.vector_store %arg3[%c0_171, %c26, %c0_172, %c0_173], %337 {strides = array<i32>} : memref<1x49x16x16xbf16, #tpu.memory_space<vmem>>, vector<1x1x16x16xbf16>,
    %c13_i32_174 = arith.constant 13 : i32
    %338 = tpu.dynamic_rotate %17 by %c13_i32_174 dim 1 : vector<16x16xf32>, i32 -> vector<16x16xf32>
    %339 = arith.subf %338, %17 : vector<16x16xf32>
    %340 = arith.mulf %339, %339 : vector<16x16xf32>
    %cst_175 = arith.constant 8.100000e-01 : f32
    %341 = vector.broadcast %cst_175 : f32 to vector<16x16xf32>
    %342 = arith.addf %341, %340 : vector<16x16xf32>
    %343 = math.rsqrt %342 : vector<16x16xf32>
    %344 = arith.mulf %339, %343 : vector<16x16xf32>
    %345 = arith.truncf %344 : vector<16x16xf32> to vector<16x16xbf16>
    %c0_176 = arith.constant 0 : index
    %c27 = arith.constant 27 : index
    %c0_177 = arith.constant 0 : index
    %c0_178 = arith.constant 0 : index
    %346 = vector.load %arg3[%c0_176, %c27, %c0_177, %c0_178] : memref<1x49x16x16xbf16, #tpu.memory_space<vmem>>, vector<1x1x16x16xbf16>
    %347 = vector.shape_cast %346 : vector<1x1x16x16xbf16> to vector<16x16xbf16>
    %348 = vector.shape_cast %345 : vector<16x16xbf16> to vector<1x1x16x16xbf16>
    tpu.vector_store %arg3[%c0_176, %c27, %c0_177, %c0_178], %348 {strides = array<i32>} : memref<1x49x16x16xbf16, #tpu.memory_space<vmem>>, vector<1x1x16x16xbf16>,
    %c15_i32_179 = arith.constant 15 : i32
    %349 = tpu.dynamic_rotate %17 by %c15_i32_179 dim 0 : vector<16x16xf32>, i32 -> vector<16x16xf32>
    %c3_i32_180 = arith.constant 3 : i32
    %350 = tpu.dynamic_rotate %349 by %c3_i32_180 dim 1 : vector<16x16xf32>, i32 -> vector<16x16xf32>
    %351 = arith.subf %350, %17 : vector<16x16xf32>
    %352 = arith.mulf %351, %351 : vector<16x16xf32>
    %cst_181 = arith.constant 8.100000e-01 : f32
    %353 = vector.broadcast %cst_181 : f32 to vector<16x16xf32>
    %354 = arith.addf %353, %352 : vector<16x16xf32>
    %355 = math.rsqrt %354 : vector<16x16xf32>
    %356 = arith.mulf %351, %355 : vector<16x16xf32>
    %357 = arith.truncf %356 : vector<16x16xf32> to vector<16x16xbf16>
    %c0_182 = arith.constant 0 : index
    %c28 = arith.constant 28 : index
    %c0_183 = arith.constant 0 : index
    %c0_184 = arith.constant 0 : index
    %358 = vector.load %arg3[%c0_182, %c28, %c0_183, %c0_184] : memref<1x49x16x16xbf16, #tpu.memory_space<vmem>>, vector<1x1x16x16xbf16>
    %359 = vector.shape_cast %358 : vector<1x1x16x16xbf16> to vector<16x16xbf16>
    %360 = vector.shape_cast %357 : vector<16x16xbf16> to vector<1x1x16x16xbf16>
    tpu.vector_store %arg3[%c0_182, %c28, %c0_183, %c0_184], %360 {strides = array<i32>} : memref<1x49x16x16xbf16, #tpu.memory_space<vmem>>, vector<1x1x16x16xbf16>,
    %c15_i32_185 = arith.constant 15 : i32
    %361 = tpu.dynamic_rotate %17 by %c15_i32_185 dim 0 : vector<16x16xf32>, i32 -> vector<16x16xf32>
    %c2_i32_186 = arith.constant 2 : i32
    %362 = tpu.dynamic_rotate %361 by %c2_i32_186 dim 1 : vector<16x16xf32>, i32 -> vector<16x16xf32>
    %363 = arith.subf %362, %17 : vector<16x16xf32>
    %364 = arith.mulf %363, %363 : vector<16x16xf32>
    %cst_187 = arith.constant 8.100000e-01 : f32
    %365 = vector.broadcast %cst_187 : f32 to vector<16x16xf32>
    %366 = arith.addf %365, %364 : vector<16x16xf32>
    %367 = math.rsqrt %366 : vector<16x16xf32>
    %368 = arith.mulf %363, %367 : vector<16x16xf32>
    %369 = arith.truncf %368 : vector<16x16xf32> to vector<16x16xbf16>
    %c0_188 = arith.constant 0 : index
    %c29 = arith.constant 29 : index
    %c0_189 = arith.constant 0 : index
    %c0_190 = arith.constant 0 : index
    %370 = vector.load %arg3[%c0_188, %c29, %c0_189, %c0_190] : memref<1x49x16x16xbf16, #tpu.memory_space<vmem>>, vector<1x1x16x16xbf16>
    %371 = vector.shape_cast %370 : vector<1x1x16x16xbf16> to vector<16x16xbf16>
    %372 = vector.shape_cast %369 : vector<16x16xbf16> to vector<1x1x16x16xbf16>
    tpu.vector_store %arg3[%c0_188, %c29, %c0_189, %c0_190], %372 {strides = array<i32>} : memref<1x49x16x16xbf16, #tpu.memory_space<vmem>>, vector<1x1x16x16xbf16>,
    %c15_i32_191 = arith.constant 15 : i32
    %373 = tpu.dynamic_rotate %17 by %c15_i32_191 dim 0 : vector<16x16xf32>, i32 -> vector<16x16xf32>
    %c1_i32_192 = arith.constant 1 : i32
    %374 = tpu.dynamic_rotate %373 by %c1_i32_192 dim 1 : vector<16x16xf32>, i32 -> vector<16x16xf32>
    %375 = arith.subf %374, %17 : vector<16x16xf32>
    %376 = arith.mulf %375, %375 : vector<16x16xf32>
    %cst_193 = arith.constant 8.100000e-01 : f32
    %377 = vector.broadcast %cst_193 : f32 to vector<16x16xf32>
    %378 = arith.addf %377, %376 : vector<16x16xf32>
    %379 = math.rsqrt %378 : vector<16x16xf32>
    %380 = arith.mulf %375, %379 : vector<16x16xf32>
    %381 = arith.truncf %380 : vector<16x16xf32> to vector<16x16xbf16>
    %c0_194 = arith.constant 0 : index
    %c30 = arith.constant 30 : index
    %c0_195 = arith.constant 0 : index
    %c0_196 = arith.constant 0 : index
    %382 = vector.load %arg3[%c0_194, %c30, %c0_195, %c0_196] : memref<1x49x16x16xbf16, #tpu.memory_space<vmem>>, vector<1x1x16x16xbf16>
    %383 = vector.shape_cast %382 : vector<1x1x16x16xbf16> to vector<16x16xbf16>
    %384 = vector.shape_cast %381 : vector<16x16xbf16> to vector<1x1x16x16xbf16>
    tpu.vector_store %arg3[%c0_194, %c30, %c0_195, %c0_196], %384 {strides = array<i32>} : memref<1x49x16x16xbf16, #tpu.memory_space<vmem>>, vector<1x1x16x16xbf16>,
    %c15_i32_197 = arith.constant 15 : i32
    %385 = tpu.dynamic_rotate %17 by %c15_i32_197 dim 0 : vector<16x16xf32>, i32 -> vector<16x16xf32>
    %386 = arith.subf %385, %17 : vector<16x16xf32>
    %387 = arith.mulf %386, %386 : vector<16x16xf32>
    %cst_198 = arith.constant 8.100000e-01 : f32
    %388 = vector.broadcast %cst_198 : f32 to vector<16x16xf32>
    %389 = arith.addf %388, %387 : vector<16x16xf32>
    %390 = math.rsqrt %389 : vector<16x16xf32>
    %391 = arith.mulf %386, %390 : vector<16x16xf32>
    %392 = arith.truncf %391 : vector<16x16xf32> to vector<16x16xbf16>
    %c0_199 = arith.constant 0 : index
    %c31 = arith.constant 31 : index
    %c0_200 = arith.constant 0 : index
    %c0_201 = arith.constant 0 : index
    %393 = vector.load %arg3[%c0_199, %c31, %c0_200, %c0_201] : memref<1x49x16x16xbf16, #tpu.memory_space<vmem>>, vector<1x1x16x16xbf16>
    %394 = vector.shape_cast %393 : vector<1x1x16x16xbf16> to vector<16x16xbf16>
    %395 = vector.shape_cast %392 : vector<16x16xbf16> to vector<1x1x16x16xbf16>
    tpu.vector_store %arg3[%c0_199, %c31, %c0_200, %c0_201], %395 {strides = array<i32>} : memref<1x49x16x16xbf16, #tpu.memory_space<vmem>>, vector<1x1x16x16xbf16>,
    %c15_i32_202 = arith.constant 15 : i32
    %396 = tpu.dynamic_rotate %17 by %c15_i32_202 dim 0 : vector<16x16xf32>, i32 -> vector<16x16xf32>
    %c15_i32_203 = arith.constant 15 : i32
    %397 = tpu.dynamic_rotate %396 by %c15_i32_203 dim 1 : vector<16x16xf32>, i32 -> vector<16x16xf32>
    %398 = arith.subf %397, %17 : vector<16x16xf32>
    %399 = arith.mulf %398, %398 : vector<16x16xf32>
    %cst_204 = arith.constant 8.100000e-01 : f32
    %400 = vector.broadcast %cst_204 : f32 to vector<16x16xf32>
    %401 = arith.addf %400, %399 : vector<16x16xf32>
    %402 = math.rsqrt %401 : vector<16x16xf32>
    %403 = arith.mulf %398, %402 : vector<16x16xf32>
    %404 = arith.truncf %403 : vector<16x16xf32> to vector<16x16xbf16>
    %c0_205 = arith.constant 0 : index
    %c32 = arith.constant 32 : index
    %c0_206 = arith.constant 0 : index
    %c0_207 = arith.constant 0 : index
    %405 = vector.load %arg3[%c0_205, %c32, %c0_206, %c0_207] : memref<1x49x16x16xbf16, #tpu.memory_space<vmem>>, vector<1x1x16x16xbf16>
    %406 = vector.shape_cast %405 : vector<1x1x16x16xbf16> to vector<16x16xbf16>
    %407 = vector.shape_cast %404 : vector<16x16xbf16> to vector<1x1x16x16xbf16>
    tpu.vector_store %arg3[%c0_205, %c32, %c0_206, %c0_207], %407 {strides = array<i32>} : memref<1x49x16x16xbf16, #tpu.memory_space<vmem>>, vector<1x1x16x16xbf16>,
    %c15_i32_208 = arith.constant 15 : i32
    %408 = tpu.dynamic_rotate %17 by %c15_i32_208 dim 0 : vector<16x16xf32>, i32 -> vector<16x16xf32>
    %c14_i32_209 = arith.constant 14 : i32
    %409 = tpu.dynamic_rotate %408 by %c14_i32_209 dim 1 : vector<16x16xf32>, i32 -> vector<16x16xf32>
    %410 = arith.subf %409, %17 : vector<16x16xf32>
    %411 = arith.mulf %410, %410 : vector<16x16xf32>
    %cst_210 = arith.constant 8.100000e-01 : f32
    %412 = vector.broadcast %cst_210 : f32 to vector<16x16xf32>
    %413 = arith.addf %412, %411 : vector<16x16xf32>
    %414 = math.rsqrt %413 : vector<16x16xf32>
    %415 = arith.mulf %410, %414 : vector<16x16xf32>
    %416 = arith.truncf %415 : vector<16x16xf32> to vector<16x16xbf16>
    %c0_211 = arith.constant 0 : index
    %c33 = arith.constant 33 : index
    %c0_212 = arith.constant 0 : index
    %c0_213 = arith.constant 0 : index
    %417 = vector.load %arg3[%c0_211, %c33, %c0_212, %c0_213] : memref<1x49x16x16xbf16, #tpu.memory_space<vmem>>, vector<1x1x16x16xbf16>
    %418 = vector.shape_cast %417 : vector<1x1x16x16xbf16> to vector<16x16xbf16>
    %419 = vector.shape_cast %416 : vector<16x16xbf16> to vector<1x1x16x16xbf16>
    tpu.vector_store %arg3[%c0_211, %c33, %c0_212, %c0_213], %419 {strides = array<i32>} : memref<1x49x16x16xbf16, #tpu.memory_space<vmem>>, vector<1x1x16x16xbf16>,
    %c15_i32_214 = arith.constant 15 : i32
    %420 = tpu.dynamic_rotate %17 by %c15_i32_214 dim 0 : vector<16x16xf32>, i32 -> vector<16x16xf32>
    %c13_i32_215 = arith.constant 13 : i32
    %421 = tpu.dynamic_rotate %420 by %c13_i32_215 dim 1 : vector<16x16xf32>, i32 -> vector<16x16xf32>
    %422 = arith.subf %421, %17 : vector<16x16xf32>
    %423 = arith.mulf %422, %422 : vector<16x16xf32>
    %cst_216 = arith.constant 8.100000e-01 : f32
    %424 = vector.broadcast %cst_216 : f32 to vector<16x16xf32>
    %425 = arith.addf %424, %423 : vector<16x16xf32>
    %426 = math.rsqrt %425 : vector<16x16xf32>
    %427 = arith.mulf %422, %426 : vector<16x16xf32>
    %428 = arith.truncf %427 : vector<16x16xf32> to vector<16x16xbf16>
    %c0_217 = arith.constant 0 : index
    %c34 = arith.constant 34 : index
    %c0_218 = arith.constant 0 : index
    %c0_219 = arith.constant 0 : index
    %429 = vector.load %arg3[%c0_217, %c34, %c0_218, %c0_219] : memref<1x49x16x16xbf16, #tpu.memory_space<vmem>>, vector<1x1x16x16xbf16>
    %430 = vector.shape_cast %429 : vector<1x1x16x16xbf16> to vector<16x16xbf16>
    %431 = vector.shape_cast %428 : vector<16x16xbf16> to vector<1x1x16x16xbf16>
    tpu.vector_store %arg3[%c0_217, %c34, %c0_218, %c0_219], %431 {strides = array<i32>} : memref<1x49x16x16xbf16, #tpu.memory_space<vmem>>, vector<1x1x16x16xbf16>,
    %c14_i32_220 = arith.constant 14 : i32
    %432 = tpu.dynamic_rotate %17 by %c14_i32_220 dim 0 : vector<16x16xf32>, i32 -> vector<16x16xf32>
    %c3_i32_221 = arith.constant 3 : i32
    %433 = tpu.dynamic_rotate %432 by %c3_i32_221 dim 1 : vector<16x16xf32>, i32 -> vector<16x16xf32>
    %434 = arith.subf %433, %17 : vector<16x16xf32>
    %435 = arith.mulf %434, %434 : vector<16x16xf32>
    %cst_222 = arith.constant 8.100000e-01 : f32
    %436 = vector.broadcast %cst_222 : f32 to vector<16x16xf32>
    %437 = arith.addf %436, %435 : vector<16x16xf32>
    %438 = math.rsqrt %437 : vector<16x16xf32>
    %439 = arith.mulf %434, %438 : vector<16x16xf32>
    %440 = arith.truncf %439 : vector<16x16xf32> to vector<16x16xbf16>
    %c0_223 = arith.constant 0 : index
    %c35 = arith.constant 35 : index
    %c0_224 = arith.constant 0 : index
    %c0_225 = arith.constant 0 : index
    %441 = vector.load %arg3[%c0_223, %c35, %c0_224, %c0_225] : memref<1x49x16x16xbf16, #tpu.memory_space<vmem>>, vector<1x1x16x16xbf16>
    %442 = vector.shape_cast %441 : vector<1x1x16x16xbf16> to vector<16x16xbf16>
    %443 = vector.shape_cast %440 : vector<16x16xbf16> to vector<1x1x16x16xbf16>
    tpu.vector_store %arg3[%c0_223, %c35, %c0_224, %c0_225], %443 {strides = array<i32>} : memref<1x49x16x16xbf16, #tpu.memory_space<vmem>>, vector<1x1x16x16xbf16>,
    %c14_i32_226 = arith.constant 14 : i32
    %444 = tpu.dynamic_rotate %17 by %c14_i32_226 dim 0 : vector<16x16xf32>, i32 -> vector<16x16xf32>
    %c2_i32_227 = arith.constant 2 : i32
    %445 = tpu.dynamic_rotate %444 by %c2_i32_227 dim 1 : vector<16x16xf32>, i32 -> vector<16x16xf32>
    %446 = arith.subf %445, %17 : vector<16x16xf32>
    %447 = arith.mulf %446, %446 : vector<16x16xf32>
    %cst_228 = arith.constant 8.100000e-01 : f32
    %448 = vector.broadcast %cst_228 : f32 to vector<16x16xf32>
    %449 = arith.addf %448, %447 : vector<16x16xf32>
    %450 = math.rsqrt %449 : vector<16x16xf32>
    %451 = arith.mulf %446, %450 : vector<16x16xf32>
    %452 = arith.truncf %451 : vector<16x16xf32> to vector<16x16xbf16>
    %c0_229 = arith.constant 0 : index
    %c36 = arith.constant 36 : index
    %c0_230 = arith.constant 0 : index
    %c0_231 = arith.constant 0 : index
    %453 = vector.load %arg3[%c0_229, %c36, %c0_230, %c0_231] : memref<1x49x16x16xbf16, #tpu.memory_space<vmem>>, vector<1x1x16x16xbf16>
    %454 = vector.shape_cast %453 : vector<1x1x16x16xbf16> to vector<16x16xbf16>
    %455 = vector.shape_cast %452 : vector<16x16xbf16> to vector<1x1x16x16xbf16>
    tpu.vector_store %arg3[%c0_229, %c36, %c0_230, %c0_231], %455 {strides = array<i32>} : memref<1x49x16x16xbf16, #tpu.memory_space<vmem>>, vector<1x1x16x16xbf16>,
    %c14_i32_232 = arith.constant 14 : i32
    %456 = tpu.dynamic_rotate %17 by %c14_i32_232 dim 0 : vector<16x16xf32>, i32 -> vector<16x16xf32>
    %c1_i32_233 = arith.constant 1 : i32
    %457 = tpu.dynamic_rotate %456 by %c1_i32_233 dim 1 : vector<16x16xf32>, i32 -> vector<16x16xf32>
    %458 = arith.subf %457, %17 : vector<16x16xf32>
    %459 = arith.mulf %458, %458 : vector<16x16xf32>
    %cst_234 = arith.constant 8.100000e-01 : f32
    %460 = vector.broadcast %cst_234 : f32 to vector<16x16xf32>
    %461 = arith.addf %460, %459 : vector<16x16xf32>
    %462 = math.rsqrt %461 : vector<16x16xf32>
    %463 = arith.mulf %458, %462 : vector<16x16xf32>
    %464 = arith.truncf %463 : vector<16x16xf32> to vector<16x16xbf16>
    %c0_235 = arith.constant 0 : index
    %c37 = arith.constant 37 : index
    %c0_236 = arith.constant 0 : index
    %c0_237 = arith.constant 0 : index
    %465 = vector.load %arg3[%c0_235, %c37, %c0_236, %c0_237] : memref<1x49x16x16xbf16, #tpu.memory_space<vmem>>, vector<1x1x16x16xbf16>
    %466 = vector.shape_cast %465 : vector<1x1x16x16xbf16> to vector<16x16xbf16>
    %467 = vector.shape_cast %464 : vector<16x16xbf16> to vector<1x1x16x16xbf16>
    tpu.vector_store %arg3[%c0_235, %c37, %c0_236, %c0_237], %467 {strides = array<i32>} : memref<1x49x16x16xbf16, #tpu.memory_space<vmem>>, vector<1x1x16x16xbf16>,
    %c14_i32_238 = arith.constant 14 : i32
    %468 = tpu.dynamic_rotate %17 by %c14_i32_238 dim 0 : vector<16x16xf32>, i32 -> vector<16x16xf32>
    %469 = arith.subf %468, %17 : vector<16x16xf32>
    %470 = arith.mulf %469, %469 : vector<16x16xf32>
    %cst_239 = arith.constant 8.100000e-01 : f32
    %471 = vector.broadcast %cst_239 : f32 to vector<16x16xf32>
    %472 = arith.addf %471, %470 : vector<16x16xf32>
    %473 = math.rsqrt %472 : vector<16x16xf32>
    %474 = arith.mulf %469, %473 : vector<16x16xf32>
    %475 = arith.truncf %474 : vector<16x16xf32> to vector<16x16xbf16>
    %c0_240 = arith.constant 0 : index
    %c38 = arith.constant 38 : index
    %c0_241 = arith.constant 0 : index
    %c0_242 = arith.constant 0 : index
    %476 = vector.load %arg3[%c0_240, %c38, %c0_241, %c0_242] : memref<1x49x16x16xbf16, #tpu.memory_space<vmem>>, vector<1x1x16x16xbf16>
    %477 = vector.shape_cast %476 : vector<1x1x16x16xbf16> to vector<16x16xbf16>
    %478 = vector.shape_cast %475 : vector<16x16xbf16> to vector<1x1x16x16xbf16>
    tpu.vector_store %arg3[%c0_240, %c38, %c0_241, %c0_242], %478 {strides = array<i32>} : memref<1x49x16x16xbf16, #tpu.memory_space<vmem>>, vector<1x1x16x16xbf16>,
    %c14_i32_243 = arith.constant 14 : i32
    %479 = tpu.dynamic_rotate %17 by %c14_i32_243 dim 0 : vector<16x16xf32>, i32 -> vector<16x16xf32>
    %c15_i32_244 = arith.constant 15 : i32
    %480 = tpu.dynamic_rotate %479 by %c15_i32_244 dim 1 : vector<16x16xf32>, i32 -> vector<16x16xf32>
    %481 = arith.subf %480, %17 : vector<16x16xf32>
    %482 = arith.mulf %481, %481 : vector<16x16xf32>
    %cst_245 = arith.constant 8.100000e-01 : f32
    %483 = vector.broadcast %cst_245 : f32 to vector<16x16xf32>
    %484 = arith.addf %483, %482 : vector<16x16xf32>
    %485 = math.rsqrt %484 : vector<16x16xf32>
    %486 = arith.mulf %481, %485 : vector<16x16xf32>
    %487 = arith.truncf %486 : vector<16x16xf32> to vector<16x16xbf16>
    %c0_246 = arith.constant 0 : index
    %c39 = arith.constant 39 : index
    %c0_247 = arith.constant 0 : index
    %c0_248 = arith.constant 0 : index
    %488 = vector.load %arg3[%c0_246, %c39, %c0_247, %c0_248] : memref<1x49x16x16xbf16, #tpu.memory_space<vmem>>, vector<1x1x16x16xbf16>
    %489 = vector.shape_cast %488 : vector<1x1x16x16xbf16> to vector<16x16xbf16>
    %490 = vector.shape_cast %487 : vector<16x16xbf16> to vector<1x1x16x16xbf16>
    tpu.vector_store %arg3[%c0_246, %c39, %c0_247, %c0_248], %490 {strides = array<i32>} : memref<1x49x16x16xbf16, #tpu.memory_space<vmem>>, vector<1x1x16x16xbf16>,
    %c14_i32_249 = arith.constant 14 : i32
    %491 = tpu.dynamic_rotate %17 by %c14_i32_249 dim 0 : vector<16x16xf32>, i32 -> vector<16x16xf32>
    %c14_i32_250 = arith.constant 14 : i32
    %492 = tpu.dynamic_rotate %491 by %c14_i32_250 dim 1 : vector<16x16xf32>, i32 -> vector<16x16xf32>
    %493 = arith.subf %492, %17 : vector<16x16xf32>
    %494 = arith.mulf %493, %493 : vector<16x16xf32>
    %cst_251 = arith.constant 8.100000e-01 : f32
    %495 = vector.broadcast %cst_251 : f32 to vector<16x16xf32>
    %496 = arith.addf %495, %494 : vector<16x16xf32>
    %497 = math.rsqrt %496 : vector<16x16xf32>
    %498 = arith.mulf %493, %497 : vector<16x16xf32>
    %499 = arith.truncf %498 : vector<16x16xf32> to vector<16x16xbf16>
    %c0_252 = arith.constant 0 : index
    %c40 = arith.constant 40 : index
    %c0_253 = arith.constant 0 : index
    %c0_254 = arith.constant 0 : index
    %500 = vector.load %arg3[%c0_252, %c40, %c0_253, %c0_254] : memref<1x49x16x16xbf16, #tpu.memory_space<vmem>>, vector<1x1x16x16xbf16>
    %501 = vector.shape_cast %500 : vector<1x1x16x16xbf16> to vector<16x16xbf16>
    %502 = vector.shape_cast %499 : vector<16x16xbf16> to vector<1x1x16x16xbf16>
    tpu.vector_store %arg3[%c0_252, %c40, %c0_253, %c0_254], %502 {strides = array<i32>} : memref<1x49x16x16xbf16, #tpu.memory_space<vmem>>, vector<1x1x16x16xbf16>,
    %c14_i32_255 = arith.constant 14 : i32
    %503 = tpu.dynamic_rotate %17 by %c14_i32_255 dim 0 : vector<16x16xf32>, i32 -> vector<16x16xf32>
    %c13_i32_256 = arith.constant 13 : i32
    %504 = tpu.dynamic_rotate %503 by %c13_i32_256 dim 1 : vector<16x16xf32>, i32 -> vector<16x16xf32>
    %505 = arith.subf %504, %17 : vector<16x16xf32>
    %506 = arith.mulf %505, %505 : vector<16x16xf32>
    %cst_257 = arith.constant 8.100000e-01 : f32
    %507 = vector.broadcast %cst_257 : f32 to vector<16x16xf32>
    %508 = arith.addf %507, %506 : vector<16x16xf32>
    %509 = math.rsqrt %508 : vector<16x16xf32>
    %510 = arith.mulf %505, %509 : vector<16x16xf32>
    %511 = arith.truncf %510 : vector<16x16xf32> to vector<16x16xbf16>
    %c0_258 = arith.constant 0 : index
    %c41 = arith.constant 41 : index
    %c0_259 = arith.constant 0 : index
    %c0_260 = arith.constant 0 : index
    %512 = vector.load %arg3[%c0_258, %c41, %c0_259, %c0_260] : memref<1x49x16x16xbf16, #tpu.memory_space<vmem>>, vector<1x1x16x16xbf16>
    %513 = vector.shape_cast %512 : vector<1x1x16x16xbf16> to vector<16x16xbf16>
    %514 = vector.shape_cast %511 : vector<16x16xbf16> to vector<1x1x16x16xbf16>
    tpu.vector_store %arg3[%c0_258, %c41, %c0_259, %c0_260], %514 {strides = array<i32>} : memref<1x49x16x16xbf16, #tpu.memory_space<vmem>>, vector<1x1x16x16xbf16>,
    %c13_i32_261 = arith.constant 13 : i32
    %515 = tpu.dynamic_rotate %17 by %c13_i32_261 dim 0 : vector<16x16xf32>, i32 -> vector<16x16xf32>
    %c3_i32_262 = arith.constant 3 : i32
    %516 = tpu.dynamic_rotate %515 by %c3_i32_262 dim 1 : vector<16x16xf32>, i32 -> vector<16x16xf32>
    %517 = arith.subf %516, %17 : vector<16x16xf32>
    %518 = arith.mulf %517, %517 : vector<16x16xf32>
    %cst_263 = arith.constant 8.100000e-01 : f32
    %519 = vector.broadcast %cst_263 : f32 to vector<16x16xf32>
    %520 = arith.addf %519, %518 : vector<16x16xf32>
    %521 = math.rsqrt %520 : vector<16x16xf32>
    %522 = arith.mulf %517, %521 : vector<16x16xf32>
    %523 = arith.truncf %522 : vector<16x16xf32> to vector<16x16xbf16>
    %c0_264 = arith.constant 0 : index
    %c42 = arith.constant 42 : index
    %c0_265 = arith.constant 0 : index
    %c0_266 = arith.constant 0 : index
    %524 = vector.load %arg3[%c0_264, %c42, %c0_265, %c0_266] : memref<1x49x16x16xbf16, #tpu.memory_space<vmem>>, vector<1x1x16x16xbf16>
    %525 = vector.shape_cast %524 : vector<1x1x16x16xbf16> to vector<16x16xbf16>
    %526 = vector.shape_cast %523 : vector<16x16xbf16> to vector<1x1x16x16xbf16>
    tpu.vector_store %arg3[%c0_264, %c42, %c0_265, %c0_266], %526 {strides = array<i32>} : memref<1x49x16x16xbf16, #tpu.memory_space<vmem>>, vector<1x1x16x16xbf16>,
    %c13_i32_267 = arith.constant 13 : i32
    %527 = tpu.dynamic_rotate %17 by %c13_i32_267 dim 0 : vector<16x16xf32>, i32 -> vector<16x16xf32>
    %c2_i32_268 = arith.constant 2 : i32
    %528 = tpu.dynamic_rotate %527 by %c2_i32_268 dim 1 : vector<16x16xf32>, i32 -> vector<16x16xf32>
    %529 = arith.subf %528, %17 : vector<16x16xf32>
    %530 = arith.mulf %529, %529 : vector<16x16xf32>
    %cst_269 = arith.constant 8.100000e-01 : f32
    %531 = vector.broadcast %cst_269 : f32 to vector<16x16xf32>
    %532 = arith.addf %531, %530 : vector<16x16xf32>
    %533 = math.rsqrt %532 : vector<16x16xf32>
    %534 = arith.mulf %529, %533 : vector<16x16xf32>
    %535 = arith.truncf %534 : vector<16x16xf32> to vector<16x16xbf16>
    %c0_270 = arith.constant 0 : index
    %c43 = arith.constant 43 : index
    %c0_271 = arith.constant 0 : index
    %c0_272 = arith.constant 0 : index
    %536 = vector.load %arg3[%c0_270, %c43, %c0_271, %c0_272] : memref<1x49x16x16xbf16, #tpu.memory_space<vmem>>, vector<1x1x16x16xbf16>
    %537 = vector.shape_cast %536 : vector<1x1x16x16xbf16> to vector<16x16xbf16>
    %538 = vector.shape_cast %535 : vector<16x16xbf16> to vector<1x1x16x16xbf16>
    tpu.vector_store %arg3[%c0_270, %c43, %c0_271, %c0_272], %538 {strides = array<i32>} : memref<1x49x16x16xbf16, #tpu.memory_space<vmem>>, vector<1x1x16x16xbf16>,
    %c13_i32_273 = arith.constant 13 : i32
    %539 = tpu.dynamic_rotate %17 by %c13_i32_273 dim 0 : vector<16x16xf32>, i32 -> vector<16x16xf32>
    %c1_i32_274 = arith.constant 1 : i32
    %540 = tpu.dynamic_rotate %539 by %c1_i32_274 dim 1 : vector<16x16xf32>, i32 -> vector<16x16xf32>
    %541 = arith.subf %540, %17 : vector<16x16xf32>
    %542 = arith.mulf %541, %541 : vector<16x16xf32>
    %cst_275 = arith.constant 8.100000e-01 : f32
    %543 = vector.broadcast %cst_275 : f32 to vector<16x16xf32>
    %544 = arith.addf %543, %542 : vector<16x16xf32>
    %545 = math.rsqrt %544 : vector<16x16xf32>
    %546 = arith.mulf %541, %545 : vector<16x16xf32>
    %547 = arith.truncf %546 : vector<16x16xf32> to vector<16x16xbf16>
    %c0_276 = arith.constant 0 : index
    %c44 = arith.constant 44 : index
    %c0_277 = arith.constant 0 : index
    %c0_278 = arith.constant 0 : index
    %548 = vector.load %arg3[%c0_276, %c44, %c0_277, %c0_278] : memref<1x49x16x16xbf16, #tpu.memory_space<vmem>>, vector<1x1x16x16xbf16>
    %549 = vector.shape_cast %548 : vector<1x1x16x16xbf16> to vector<16x16xbf16>
    %550 = vector.shape_cast %547 : vector<16x16xbf16> to vector<1x1x16x16xbf16>
    tpu.vector_store %arg3[%c0_276, %c44, %c0_277, %c0_278], %550 {strides = array<i32>} : memref<1x49x16x16xbf16, #tpu.memory_space<vmem>>, vector<1x1x16x16xbf16>,
    %c13_i32_279 = arith.constant 13 : i32
    %551 = tpu.dynamic_rotate %17 by %c13_i32_279 dim 0 : vector<16x16xf32>, i32 -> vector<16x16xf32>
    %552 = arith.subf %551, %17 : vector<16x16xf32>
    %553 = arith.mulf %552, %552 : vector<16x16xf32>
    %cst_280 = arith.constant 8.100000e-01 : f32
    %554 = vector.broadcast %cst_280 : f32 to vector<16x16xf32>
    %555 = arith.addf %554, %553 : vector<16x16xf32>
    %556 = math.rsqrt %555 : vector<16x16xf32>
    %557 = arith.mulf %552, %556 : vector<16x16xf32>
    %558 = arith.truncf %557 : vector<16x16xf32> to vector<16x16xbf16>
    %c0_281 = arith.constant 0 : index
    %c45 = arith.constant 45 : index
    %c0_282 = arith.constant 0 : index
    %c0_283 = arith.constant 0 : index
    %559 = vector.load %arg3[%c0_281, %c45, %c0_282, %c0_283] : memref<1x49x16x16xbf16, #tpu.memory_space<vmem>>, vector<1x1x16x16xbf16>
    %560 = vector.shape_cast %559 : vector<1x1x16x16xbf16> to vector<16x16xbf16>
    %561 = vector.shape_cast %558 : vector<16x16xbf16> to vector<1x1x16x16xbf16>
    tpu.vector_store %arg3[%c0_281, %c45, %c0_282, %c0_283], %561 {strides = array<i32>} : memref<1x49x16x16xbf16, #tpu.memory_space<vmem>>, vector<1x1x16x16xbf16>,
    %c13_i32_284 = arith.constant 13 : i32
    %562 = tpu.dynamic_rotate %17 by %c13_i32_284 dim 0 : vector<16x16xf32>, i32 -> vector<16x16xf32>
    %c15_i32_285 = arith.constant 15 : i32
    %563 = tpu.dynamic_rotate %562 by %c15_i32_285 dim 1 : vector<16x16xf32>, i32 -> vector<16x16xf32>
    %564 = arith.subf %563, %17 : vector<16x16xf32>
    %565 = arith.mulf %564, %564 : vector<16x16xf32>
    %cst_286 = arith.constant 8.100000e-01 : f32
    %566 = vector.broadcast %cst_286 : f32 to vector<16x16xf32>
    %567 = arith.addf %566, %565 : vector<16x16xf32>
    %568 = math.rsqrt %567 : vector<16x16xf32>
    %569 = arith.mulf %564, %568 : vector<16x16xf32>
    %570 = arith.truncf %569 : vector<16x16xf32> to vector<16x16xbf16>
    %c0_287 = arith.constant 0 : index
    %c46 = arith.constant 46 : index
    %c0_288 = arith.constant 0 : index
    %c0_289 = arith.constant 0 : index
    %571 = vector.load %arg3[%c0_287, %c46, %c0_288, %c0_289] : memref<1x49x16x16xbf16, #tpu.memory_space<vmem>>, vector<1x1x16x16xbf16>
    %572 = vector.shape_cast %571 : vector<1x1x16x16xbf16> to vector<16x16xbf16>
    %573 = vector.shape_cast %570 : vector<16x16xbf16> to vector<1x1x16x16xbf16>
    tpu.vector_store %arg3[%c0_287, %c46, %c0_288, %c0_289], %573 {strides = array<i32>} : memref<1x49x16x16xbf16, #tpu.memory_space<vmem>>, vector<1x1x16x16xbf16>,
    %c13_i32_290 = arith.constant 13 : i32
    %574 = tpu.dynamic_rotate %17 by %c13_i32_290 dim 0 : vector<16x16xf32>, i32 -> vector<16x16xf32>
    %c14_i32_291 = arith.constant 14 : i32
    %575 = tpu.dynamic_rotate %574 by %c14_i32_291 dim 1 : vector<16x16xf32>, i32 -> vector<16x16xf32>
    %576 = arith.subf %575, %17 : vector<16x16xf32>
    %577 = arith.mulf %576, %576 : vector<16x16xf32>
    %cst_292 = arith.constant 8.100000e-01 : f32
    %578 = vector.broadcast %cst_292 : f32 to vector<16x16xf32>
    %579 = arith.addf %578, %577 : vector<16x16xf32>
    %580 = math.rsqrt %579 : vector<16x16xf32>
    %581 = arith.mulf %576, %580 : vector<16x16xf32>
    %582 = arith.truncf %581 : vector<16x16xf32> to vector<16x16xbf16>
    %c0_293 = arith.constant 0 : index
    %c47 = arith.constant 47 : index
    %c0_294 = arith.constant 0 : index
    %c0_295 = arith.constant 0 : index
    %583 = vector.load %arg3[%c0_293, %c47, %c0_294, %c0_295] : memref<1x49x16x16xbf16, #tpu.memory_space<vmem>>, vector<1x1x16x16xbf16>
    %584 = vector.shape_cast %583 : vector<1x1x16x16xbf16> to vector<16x16xbf16>
    %585 = vector.shape_cast %582 : vector<16x16xbf16> to vector<1x1x16x16xbf16>
    tpu.vector_store %arg3[%c0_293, %c47, %c0_294, %c0_295], %585 {strides = array<i32>} : memref<1x49x16x16xbf16, #tpu.memory_space<vmem>>, vector<1x1x16x16xbf16>,
    %c13_i32_296 = arith.constant 13 : i32
    %586 = tpu.dynamic_rotate %17 by %c13_i32_296 dim 0 : vector<16x16xf32>, i32 -> vector<16x16xf32>
    %c13_i32_297 = arith.constant 13 : i32
    %587 = tpu.dynamic_rotate %586 by %c13_i32_297 dim 1 : vector<16x16xf32>, i32 -> vector<16x16xf32>
    %588 = arith.subf %587, %17 : vector<16x16xf32>
    %589 = arith.mulf %588, %588 : vector<16x16xf32>
    %cst_298 = arith.constant 8.100000e-01 : f32
    %590 = vector.broadcast %cst_298 : f32 to vector<16x16xf32>
    %591 = arith.addf %590, %589 : vector<16x16xf32>
    %592 = math.rsqrt %591 : vector<16x16xf32>
    %593 = arith.mulf %588, %592 : vector<16x16xf32>
    %594 = arith.truncf %593 : vector<16x16xf32> to vector<16x16xbf16>
    %c0_299 = arith.constant 0 : index
    %c48 = arith.constant 48 : index
    %c0_300 = arith.constant 0 : index
    %c0_301 = arith.constant 0 : index
    %595 = vector.load %arg3[%c0_299, %c48, %c0_300, %c0_301] : memref<1x49x16x16xbf16, #tpu.memory_space<vmem>>, vector<1x1x16x16xbf16>
    %596 = vector.shape_cast %595 : vector<1x1x16x16xbf16> to vector<16x16xbf16>
    %597 = vector.shape_cast %594 : vector<16x16xbf16> to vector<1x1x16x16xbf16>
    tpu.vector_store %arg3[%c0_299, %c48, %c0_300, %c0_301], %597 {strides = array<i32>} : memref<1x49x16x16xbf16, #tpu.memory_space<vmem>>, vector<1x1x16x16xbf16>,
    %cst_302 = arith.constant 0.000000e+00 : f32
    %598 = vector.broadcast %cst_302 : f32 to vector<16x16xf32>
    %cst_303 = arith.constant 0.000000e+00 : f32
    %599 = vector.broadcast %cst_303 : f32 to vector<16x16xf32>
    %c0_304 = arith.constant 0 : index
    %c0_305 = arith.constant 0 : index
    %c0_306 = arith.constant 0 : index
    %c0_307 = arith.constant 0 : index
    %600 = vector.load %arg1[%c0_304, %c0_305, %c0_306, %c0_307] : memref<1x3x16x16xf32, #tpu.memory_space<vmem>>, vector<1x1x16x16xf32>
    %601 = vector.shape_cast %600 : vector<1x1x16x16xf32> to vector<16x16xf32>
    %c15_i32_308 = arith.constant 15 : i32
    %602 = tpu.dynamic_rotate %601 by %c15_i32_308 dim 1 : vector<16x16xf32>, i32 -> vector<16x16xf32>
    %603 = arith.subf %602, %601 : vector<16x16xf32>
    %604 = math.absf %603 : vector<16x16xf32>
    %605 = arith.addf %598, %604 : vector<16x16xf32>
    %c15_i32_309 = arith.constant 15 : i32
    %606 = tpu.dynamic_rotate %601 by %c15_i32_309 dim 0 : vector<16x16xf32>, i32 -> vector<16x16xf32>
    %607 = arith.subf %606, %601 : vector<16x16xf32>
    %608 = math.absf %607 : vector<16x16xf32>
    %609 = arith.addf %599, %608 : vector<16x16xf32>
    %c0_310 = arith.constant 0 : index
    %c1_311 = arith.constant 1 : index
    %c0_312 = arith.constant 0 : index
    %c0_313 = arith.constant 0 : index
    %610 = vector.load %arg1[%c0_310, %c1_311, %c0_312, %c0_313] : memref<1x3x16x16xf32, #tpu.memory_space<vmem>>, vector<1x1x16x16xf32>
    %611 = vector.shape_cast %610 : vector<1x1x16x16xf32> to vector<16x16xf32>
    %c15_i32_314 = arith.constant 15 : i32
    %612 = tpu.dynamic_rotate %611 by %c15_i32_314 dim 1 : vector<16x16xf32>, i32 -> vector<16x16xf32>
    %613 = arith.subf %612, %611 : vector<16x16xf32>
    %614 = math.absf %613 : vector<16x16xf32>
    %615 = arith.addf %605, %614 : vector<16x16xf32>
    %c15_i32_315 = arith.constant 15 : i32
    %616 = tpu.dynamic_rotate %611 by %c15_i32_315 dim 0 : vector<16x16xf32>, i32 -> vector<16x16xf32>
    %617 = arith.subf %616, %611 : vector<16x16xf32>
    %618 = math.absf %617 : vector<16x16xf32>
    %619 = arith.addf %609, %618 : vector<16x16xf32>
    %c0_316 = arith.constant 0 : index
    %c2_317 = arith.constant 2 : index
    %c0_318 = arith.constant 0 : index
    %c0_319 = arith.constant 0 : index
    %620 = vector.load %arg1[%c0_316, %c2_317, %c0_318, %c0_319] : memref<1x3x16x16xf32, #tpu.memory_space<vmem>>, vector<1x1x16x16xf32>
    %621 = vector.shape_cast %620 : vector<1x1x16x16xf32> to vector<16x16xf32>
    %c15_i32_320 = arith.constant 15 : i32
    %622 = tpu.dynamic_rotate %621 by %c15_i32_320 dim 1 : vector<16x16xf32>, i32 -> vector<16x16xf32>
    %623 = arith.subf %622, %621 : vector<16x16xf32>
    %624 = math.absf %623 : vector<16x16xf32>
    %625 = arith.addf %615, %624 : vector<16x16xf32>
    %c15_i32_321 = arith.constant 15 : i32
    %626 = tpu.dynamic_rotate %621 by %c15_i32_321 dim 0 : vector<16x16xf32>, i32 -> vector<16x16xf32>
    %627 = arith.subf %626, %621 : vector<16x16xf32>
    %628 = math.absf %627 : vector<16x16xf32>
    %629 = arith.addf %619, %628 : vector<16x16xf32>
    %cst_322 = arith.constant 0.333333343 : f32
    %630 = vector.broadcast %cst_322 : f32 to vector<16x16xf32>
    %631 = arith.mulf %625, %630 : vector<16x16xf32>
    %cst_323 = arith.constant 0.333333343 : f32
    %632 = vector.broadcast %cst_323 : f32 to vector<16x16xf32>
    %633 = arith.mulf %629, %632 : vector<16x16xf32>
    %634 = tpu.iota {dimensions = array<i32: 1>} : vector<16x16xi32>
    %635 = arith.sitofp %634 : vector<16x16xi32> to vector<16x16xf32>
    %636 = tpu.iota {dimensions = array<i32: 0>} : vector<16x16xi32>
    %637 = arith.sitofp %636 : vector<16x16xi32> to vector<16x16xf32>
    %c15_i32_324 = arith.constant 15 : i32
    %638 = tpu.dynamic_rotate %635 by %c15_i32_324 dim 1 : vector<16x16xf32>, i32 -> vector<16x16xf32>
    %639 = arith.subf %638, %635 : vector<16x16xf32>
    %640 = math.absf %639 : vector<16x16xf32>
    %c15_i32_325 = arith.constant 15 : i32
    %641 = tpu.dynamic_rotate %637 by %c15_i32_325 dim 0 : vector<16x16xf32>, i32 -> vector<16x16xf32>
    %642 = arith.subf %641, %637 : vector<16x16xf32>
    %643 = math.absf %642 : vector<16x16xf32>
    %cst_326 = arith.constant 5.000000e-01 : f32
    %644 = vector.broadcast %cst_326 : f32 to vector<16x16xf32>
    %645 = arith.cmpf ogt, %640, %644 : vector<16x16xf32>
    %cst_327 = arith.constant 1.500000e+00 : f32
    %646 = vector.broadcast %cst_327 : f32 to vector<16x16xf32>
    %647 = arith.cmpf olt, %640, %646 : vector<16x16xf32>
    %648 = arith.andi %645, %647 : vector<16x16xi1>
    %cst_328 = arith.constant 0.000000e+00 : f32
    %649 = vector.broadcast %cst_328 : f32 to vector<16x16xf32>
    %650 = arith.subf %649, %631 : vector<16x16xf32>
    %cst_329 = arith.constant 1.500000e+02 : f32
    %651 = vector.broadcast %cst_329 : f32 to vector<16x16xf32>
    %652 = arith.mulf %650, %651 : vector<16x16xf32>
    %653 = math.exp %652 : vector<16x16xf32>
    %cst_330 = arith.constant 0.000000e+00 : f32
    %654 = vector.broadcast %cst_330 : f32 to vector<16x16xf32>
    %655 = arith.select %648, %653, %654 : vector<16x16xi1>, vector<16x16xf32>
    %cst_331 = arith.constant 5.000000e-01 : f32
    %656 = vector.broadcast %cst_331 : f32 to vector<16x16xf32>
    %657 = arith.cmpf ogt, %643, %656 : vector<16x16xf32>
    %cst_332 = arith.constant 1.500000e+00 : f32
    %658 = vector.broadcast %cst_332 : f32 to vector<16x16xf32>
    %659 = arith.cmpf olt, %643, %658 : vector<16x16xf32>
    %660 = arith.andi %657, %659 : vector<16x16xi1>
    %cst_333 = arith.constant 0.000000e+00 : f32
    %661 = vector.broadcast %cst_333 : f32 to vector<16x16xf32>
    %662 = arith.subf %661, %633 : vector<16x16xf32>
    %cst_334 = arith.constant 1.500000e+02 : f32
    %663 = vector.broadcast %cst_334 : f32 to vector<16x16xf32>
    %664 = arith.mulf %662, %663 : vector<16x16xf32>
    %665 = math.exp %664 : vector<16x16xf32>
    %cst_335 = arith.constant 0.000000e+00 : f32
    %666 = vector.broadcast %cst_335 : f32 to vector<16x16xf32>
    %667 = arith.select %660, %665, %666 : vector<16x16xi1>, vector<16x16xf32>
    %c0_336 = arith.constant 0 : index
    %c0_337 = arith.constant 0 : index
    %c0_338 = arith.constant 0 : index
    %c0_339 = arith.constant 0 : index
    %668 = vector.load %arg4[%c0_336, %c0_337, %c0_338, %c0_339] : memref<1x2x16x16xf32, #tpu.memory_space<vmem>>, vector<1x1x16x16xf32>
    %669 = vector.shape_cast %668 : vector<1x1x16x16xf32> to vector<16x16xf32>
    %670 = vector.shape_cast %655 : vector<16x16xf32> to vector<1x1x16x16xf32>
    tpu.vector_store %arg4[%c0_336, %c0_337, %c0_338, %c0_339], %670 {strides = array<i32>} : memref<1x2x16x16xf32, #tpu.memory_space<vmem>>, vector<1x1x16x16xf32>,
    %c0_340 = arith.constant 0 : index
    %c1_341 = arith.constant 1 : index
    %c0_342 = arith.constant 0 : index
    %c0_343 = arith.constant 0 : index
    %671 = vector.load %arg4[%c0_340, %c1_341, %c0_342, %c0_343] : memref<1x2x16x16xf32, #tpu.memory_space<vmem>>, vector<1x1x16x16xf32>
    %672 = vector.shape_cast %671 : vector<1x1x16x16xf32> to vector<16x16xf32>
    %673 = vector.shape_cast %667 : vector<16x16xf32> to vector<1x1x16x16xf32>
    tpu.vector_store %arg4[%c0_340, %c1_341, %c0_342, %c0_343], %673 {strides = array<i32>} : memref<1x2x16x16xf32, #tpu.memory_space<vmem>>, vector<1x1x16x16xf32>,
    return
  }
  func.func @transform_0(%arg0: i32) -> (i32, i32, i32, i32) {
    %c0_i32 = arith.constant 0 : i32
    %c0_i32_0 = arith.constant 0 : i32
    %c0_i32_1 = arith.constant 0 : i32
    %c0_i32_2 = arith.constant 0 : i32
    return %arg0, %c0_i32, %c0_i32_0, %c0_i32_1 : i32, i32, i32, i32
  }
  func.func @transform_1(%arg0: i32) -> (i32, i32, i32, i32) {
    %c0_i32 = arith.constant 0 : i32
    %c0_i32_0 = arith.constant 0 : i32
    %c0_i32_1 = arith.constant 0 : i32
    %c0_i32_2 = arith.constant 0 : i32
    return %arg0, %c0_i32, %c0_i32_0, %c0_i32_1 : i32, i32, i32, i32
  }
  func.func @transform_2(%arg0: i32) -> (i32, i32, i32, i32) {
    %c0_i32 = arith.constant 0 : i32
    %c0_i32_0 = arith.constant 0 : i32
    %c0_i32_1 = arith.constant 0 : i32
    %c0_i32_2 = arith.constant 0 : i32
    return %arg0, %c0_i32, %c0_i32_0, %c0_i32_1 : i32, i32, i32, i32
  }
  func.func @transform_3(%arg0: i32) -> (i32, i32, i32, i32) {
    %c0_i32 = arith.constant 0 : i32
    %c0_i32_0 = arith.constant 0 : i32
    %c0_i32_1 = arith.constant 0 : i32
    %c0_i32_2 = arith.constant 0 : i32
    return %arg0, %c0_i32, %c0_i32_0, %c0_i32_1 : i32, i32, i32, i32
  }
  func.func @transform_4(%arg0: i32) -> (i32, i32, i32) {
    %c0_i32 = arith.constant 0 : i32
    %c0_i32_0 = arith.constant 0 : i32
    %c0_i32_1 = arith.constant 0 : i32
    return %arg0, %c0_i32, %c0_i32_0 : i32, i32, i32
  }
}

</mosaic_0001>

<bundles_post_ra>
// kernel: tpu_custom_call.1
= control target key start
LH: loop header
LB: loop body
LE: loop exit
PB: predicated region body
PF: predicated region fallthrough
CT: control target
= control target key end

     0   :  { %10 = vsyncpa [#allocation3], 0  ;;  %s4518_s0 = inlined_call_operand.hbm [shape: f32[2,3,16,16], index: 0, kind: input, shape index: {}]   ;;  %s4519_s1 = inlined_call_operand.hbm [shape: f32[2,3,16,16], index: 1, kind: input, shape index: {}]   ;;  %s4520_s2 = inlined_call_operand.vmem [shape: bf16[2,49,16,16], index: 2, kind: output, shape index: {0}]   ;;  %s4521_s3 = inlined_call_operand.hbm [shape: f32[2,2,16,16], index: 3, kind: output, shape index: {1}]   ;;  %s4522_s4 = inlined_call_operand.hbm [shape: bf16[2,16,16], index: 4, kind: output, shape index: {2}]  }
   0x1   :  { %12 = vsyncpa [#allocation3 + $0x1], 0 }
   0x2   :  { %13 = vsyncpa [#allocation6], 0 }
   0x3   :  { %15 = vsyncpa [#allocation6 + $0x1], 0 }
   0x4   :  { %16 = vsyncpa [#allocation4], 0 }
   0x5   :  { %18 = vsyncpa [#allocation4 + $0x1], 0 }
   0x6   :  { %19 = vsyncpa [#allocation9], 0 }
   0x7   :  { %21 = vsyncpa [#allocation9 + $0x1], 0  ;;  %s2880_s15 = smov 0   ;;  %s2882_s16 = smov 0  }
   0x8   :  { %s2884_s17 = smov 0   ;;  %s2886_s18 = smov 0  }
   0x9 LB: > { %s2901_s19 = sadd.s32 4294967295, %s2830_s18   ;;  %s2052_s20 = sadd.s32 4294967294, %s2830_s18   ;;  %s2830_s18 = sphi %s2886_s18, %s4560_s18   ;;  %s2826_s17 = sphi %s2884_s17, %s4559_s17   ;;  %s2822_s16 = sphi %s2882_s16, %s4558_s16   ;;  %s2818_s15 = sphi %s2880_s15, %s4557_s15  }
   0xa   : > { %s2905_s21 = sadd.s32 1, %s2830_s18   ;;  %s34_s22 = sadd.s32 1, %s2826_s17 }
   0xb   : > { %s31_s23 = ssub.s32 %s2830_s18, %s2905_s21  ;;  %p41_p0 = scmp.ne.s32.totalorder %s2826_s17, %s2822_s16 }
   0xc   : > { %p32_p1 = scmp.eq.s32.totalorder %s31_s23, 0  ;;  %p42_p2 = scmp.eq.s32.totalorder %s2830_s18, 0 }
   0xd   : > { %p47_p3 = scmp.ne.s32.totalorder %s2822_s16, %s2818_s15  ;;  %p48_p4 = scmp.eq.s32.totalorder %s2901_s19, 0 }
   0xe   : > { %s2917_s24 = scalar_select %p32_p1, %s2826_s17, %s34_s22  }
   0xf   : > { %p43_p5 = por %p42_p2, %p41_p0  ;;  %p2919_p6 = por %p48_p4, %p47_p3 }
  0x10   : > { %p123_p7 = scmp.eq.s32.totalorder %s2901_s19, 1  ;;  %p129_p8 = scmp.eq.s32.totalorder %s2052_s20, 1 }
  0x11   : > { %s4528_s25 = scalar_select %p2919_p6, 1, 0 }
  0x12   : > { %p2409_p10 = scmp.lt.s32.totalorder %s2830_s18, 2  ;;  %p2926_p11 = por %p123_p7, %p41_p0 }
  0x13   : > { %p2930_p12 = por %p129_p8, %p47_p3  ;;  %s2935_s28 = sand.u32 1, %s2826_s17  }
  0x14   : > { %s4529_s26 = scalar_select %p2926_p11, 1, 0 }
  0x15   : > { %s4530_s27 = scalar_select %p2930_p12, 1, 0 }
  0x16   : > { %s2382_s29 = smul.u32 768, %s2830_s18  ;;  %p2946_p13 = pnand %p2409_p10, %p43_p5 }
  0x17   : > { %s2381_s30 = smul.u32 48, %s2935_s28  ;;  %s176_s11 = scalar_lea.sflag [#allocation3], %s2935_s28 }
  0x18   : > { %s2944_s7 = scalar_lea.hbm %s4518_s0, %s2382_s29  ;;  %p2670_p1 = pneg %p2946_p13 }
  0x19   : > { %s179_s9 = scalar_lea.vmem [#allocation2], %s2381_s30  ;;  %s2668_s12 = scalar_lea.hbm %s2944_s7, 768 }
  0x1a   : > { %s186_s10 = sshll.u32 %s179_s9, 4  ;;  %p2669_p0 = scmp.ne.s32.totalorder %s2944_s7, %s2668_s12  ;;  %s2952_s10 = int_to_ptr.vmem [resolvable:$true] %s186_s10 }
  0x1b   : > { %s2673_s20 = scalar_lea.hbm %s4518_s0, 1536  ;;  %p2674_p4 = scmp.lt.u32.totalorder %s2944_s7, %s4518_s0 }
  0x1c   : > { %p2671_p2 = pnand %p2670_p1, %p2669_p0  ;;  %p2675_p5 = scmp.lt.u32.totalorder %s2673_s20, %s2668_s12 }
  0x1d   : > { %p2677_p8 = scmp.lt.u32.totalorder %s2668_s12, %s2944_s7 }
  0x1e   : > { %p2672_p3 = pneg %p2671_p2  ;;  %p2676_p7 = por %p2675_p5, %p2674_p4 }
  0x20   : > { %p2678_p10 = por %p2677_p8, %p2676_p7 }
  0x22   : > { %p2679_p9 = pnand %p2678_p10, %p2672_p3 }
  0x24   : > { %2682 = shalt.err (!%p2679_p9)
}
  0x25   : > { %s2683_s5 = scalar_lea.vmem %s2952_s10, 768  ;;  %s2832_s6 = smov [#allocation2]  }
  0x26   : > { %p2684_p0 = scmp.ne.s32.totalorder %s2952_s10, %s2683_s5  ;;  %s2688_s9 = sshll.u32 %s2832_s6, 4  ;;  %s2689_s9 = int_to_ptr.vmem [resolvable:$false] %s2688_s9 }
  0x27   : > { %s2690_s13 = scalar_lea.vmem %s2689_s9, 1536  ;;  %p2691_p11 = scmp.lt.s32.totalorder %s2952_s10, %s2689_s9 }
  0x28   : > { %p2686_p2 = pnand %p2684_p0, %p2670_p1  ;;  %p2692_p4 = scmp.lt.s32.totalorder %s2690_s13, %s2683_s5 }
  0x2a   : > { %p2687_p12 = pneg %p2686_p2  ;;  %p2693_p5 = por %p2692_p4, %p2691_p11 }
  0x2c   : > { %p2694_p7 = pnand %p2693_p5, %p2687_p12 }
  0x2e   : > { %2697 = shalt.err (!%p2694_p7)
}
  0x2f   : > { %s2833_s12 = smov 128   ;;  %s2834_s14 = smov 8  }
  0x30   : > { %2398 = dma.hbm_to_vmem [thread:$0]  (!%p2946_p13), %s2944_s7, 768, %s2952_s10, %s176_s11, %s2833_s12, %s2833_s12, %s2834_s14  }
  0x31   : > { %p2057_p9 = scmp.ge.s32.totalorder %s2830_s18, 1  ;;  %p215_p11 = scmp.lt.s32.totalorder %s2830_s18, 3 }
  0x32   : > { %s2996_s5 = scalar_lea.hbm %s4519_s1, %s2382_s29  ;;  %s200_s6 = scalar_lea.vmem [#allocation5], %s2381_s30 }
  0x33   : > { %p2987_p12 = pnand %p2057_p9, %p215_p11  ;;  %s207_s9 = sshll.u32 %s200_s6, 4  ;;  %s3000_s9 = int_to_ptr.vmem [resolvable:$true] %s207_s9 }
  0x34   : > { %s197_s7 = scalar_lea.sflag [#allocation6], %s2935_s28  ;;  %s2698_s10 = scalar_lea.hbm %s2996_s5, 768 }
  0x35   : > { %p2699_p3 = scmp.ne.s32.totalorder %s2996_s5, %s2698_s10  ;;  %s2703_s29 = scalar_lea.hbm %s4519_s1, 1536 }
  0x36   : > { %p2704_p0 = scmp.lt.u32.totalorder %s2996_s5, %s4519_s1  ;;  %p2705_p2 = scmp.lt.u32.totalorder %s2703_s29, %s2698_s10 }
  0x37   : > { %p2701_p8 = pnand %p2699_p3, %p2670_p1  ;;  %p2707_p5 = scmp.lt.u32.totalorder %s2698_s10, %s2996_s5 }
  0x38   : > { %p2706_p4 = por %p2705_p2, %p2704_p0 }
  0x39   : > { %p2702_p10 = pneg %p2701_p8 }
  0x3a   : > { %p2708_p7 = por %p2707_p5, %p2706_p4 }
  0x3c   : > { %p2709_p9 = pnand %p2708_p7, %p2702_p10 }
  0x3e   : > { %2712 = shalt.err (!%p2709_p9)
}
  0x3f   : > { %s2713_s30 = scalar_lea.vmem %s3000_s9, 768  ;;  %s2835_s6 = smov [#allocation5]  }
  0x40   : > { %p2714_p11 = scmp.ne.s32.totalorder %s3000_s9, %s2713_s30  ;;  %s2718_s11 = sshll.u32 %s2835_s6, 4  ;;  %s2719_s11 = int_to_ptr.vmem [resolvable:$false] %s2718_s11 }
  0x41   : > { %s2720_s13 = scalar_lea.vmem %s2719_s11, 1536  ;;  %p2721_p6 = scmp.lt.s32.totalorder %s3000_s9, %s2719_s11 }
  0x42   : > { %p2716_p3 = pnand %p2714_p11, %p2670_p1  ;;  %p2722_p0 = scmp.lt.s32.totalorder %s2720_s13, %s2713_s30 }
  0x44   : > { %p2717_p8 = pneg %p2716_p3  ;;  %p2723_p2 = por %p2722_p0, %p2721_p6 }
  0x46   : > { %p2724_p4 = pnand %p2723_p2, %p2717_p8 }
  0x48   : > { %2727 = shalt.err (!%p2724_p4)
}
  0x49   : > { %2401 = dma.hbm_to_vmem [thread:$0]  (!%p2946_p13), %s2996_s5, 768, %s3000_s9, %s197_s7, %s2833_s12, %s2833_s12, %s2834_s14  }
  0x4a   : > { %219 = sbr.rel (%p2987_p12) target bundleno = 751 (0x2ef), region = 28 }
  0x51   : > { %s3034_s10 = sand.u32 1, %s2822_s16   ;;  %p4533_p6 = scmp.ne.s32.totalorder %s4528_s25, 0 }
  0x52   : > { %s2385_s29 = smul.u32 48, %s3034_s10  ;;  %s222_s22 = scalar_lea.sflag [#allocation3], %s3034_s10 }
  0x54   : > { %s3038_s8 = scalar_lea.vmem [#allocation2], %s2385_s29 }
  0x55   : > { %2801 = dma.done.wait (%p4533_p6), %s222_s22, 768  }
  0x56   : > { %2803 = vsyncadd (%p4533_p6), %s222_s22, 4294966528  ;;  %s231_s28 = scalar_lea.sflag [#allocation6], %s3034_s10  ;;  %s3045_s12 = scalar_lea.vmem [#allocation5], %s2385_s29 }
  0x57   : > { %2805 = dma.done.wait (%p4533_p6), %s231_s28, 768  }
  0x58   : > { %2807 = vsyncadd (%p4533_p6), %s231_s28, 4294966528  ;;  %v320_v0 = vlaneseq  ;;  %v3052_v1 = vld [vmem:[%s3038_s8] sm:$0xff]  ;;  %v3055_v2 = vld [vmem:[%s3038_s8 + $0x10] sm:$0xff]  ;;  %s2836_s25 = smov 13   ;;  %s2837_s14 = smov 14   ;;  %vm315_vm6 = vcmask 125952  }
  0x59   : > { %v3058_v3 = vld [vmem:[%s3038_s8 + $0x20] sm:$0xff]  ;;  %v286_v4 = vadd.f32 %v3055_v2, %v3052_v1  ;;  %v3063_v5 = vld [vmem:[%s3038_s8 + $0x8] sm:$0xff]  ;;  %v3066_v6 = vld [vmem:[%s3038_s8 + $0x18] sm:$0xff]  ;;  %p274_p13 = scmp.lt.s32.totalorder %s2901_s19, 1  ;;  %s2838_s20 = smov 15   ;;  %vm325_vm7 = vcmask 1047680  }
  0x5a   : > { %v3069_v7 = vld [vmem:[%s3038_s8 + $0x28] sm:$0xff]  ;;  %v287_v8 = vadd.f32 %v3066_v6, %v3063_v5  ;;  %v3074_v9 = vshrl.u32 %v320_v0, 7  ;;  %s2839_s9 = smov 16   ;;  %s2840_s7 = smov 1  }
  0x5b   : > { %v296_v10 = vadd.f32 %v3058_v3, %v286_v4  ;;  %s3172_s5 = scalar_select %p274_p13, %s2901_s19, 1 }
  0x5c   : > { %v297_v11 = vadd.f32 %v3069_v7, %v287_v8  ;;  %vm322_vm0 = vcmp.lt.s32.totalorder %v3074_v9, 3  ;;  %vm548_vm1 = vcmp.lt.s32.totalorder %v3074_v9, 2  ;;  %vm736_vm2 = vcmp.lt.s32.totalorder %v3074_v9, 1  ;;  %s2841_s30 = smov 2   ;;  %s2842_s29 = smov 3  }
  0x5d   : > { %v3078_v12 = vmul.f32 85.0, %v296_v10  ;;  %vm1107_vm3 = vcmp.lt.s32.totalorder %v3074_v9, 7  ;;  %vm1295_vm4 = vcmp.lt.s32.totalorder %v3074_v9, 6  ;;  %vm1483_vm5 = vcmp.lt.s32.totalorder %v3074_v9, 5  ;;  %s2386_s23 = smul.u32 392, %s3172_s5  ;;  %s2843_s22 = smov 115  }
  0x5e   : > { %v3080_v13 = vmul.f32 85.0, %v297_v11  ;;  %s2844_s28 = smov 114   ;;  %s2848_s5 = smov 125  }
  0x5f   : > { %340 = vrot.lane.b32.xlu0 %v3078_v12, %s2836_s25  ;;  %v3087_v14 = vsub.f32 %v3078_v12, %v3078_v12  ;;  %v318_v15 = vrot.slane %v3078_v12, 5  ;;  %v546_v16 = vrot.slane %v3078_v12, 6  ;;  %v734_v17 = vrot.slane %v3078_v12, 7  ;;  %s3234_s13 = scalar_lea.vmem %s4520_s2, %s2386_s23  ;;  %s2379_s23 = sshll.u32 %s2901_s19, 9 }
  0x60   : > { %342 = vrot.lane.b32.xlu1 %v3080_v13, %s2836_s25  ;;  %v3095_v18 = vsub.f32 %v3080_v13, %v3080_v13  ;;  %v319_v19 = vrot.slane %v3080_v13, 5  ;;  %v547_v20 = vrot.slane %v3080_v13, 6  ;;  %v735_v21 = vrot.slane %v3080_v13, 7  ;;  %s2845_s25 = smov 113   ;;  %s4313_s11 = scalar_lea.hbm %s4521_s3, %s2379_s23 }
  0x61   : > { %v1011_v22 = vmul.f32 %v3087_v14, %v3087_v14  ;;  %v1105_v48 = vrot.slane %v3078_v12, 1  ;;  %v1106_v50 = vrot.slane %v3080_v13, 1  ;;  %v1293_v51 = vrot.slane %v3078_v12, 2  ;;  %p4554_p12 = scmp.ne.s32.totalorder %s4529_s26, 0 }
  0x62   : > { %v1012_v23 = vmul.f32 %v3095_v18, %v3095_v18  ;;  %v3107_v24 = vsel %vm322_vm0, %v319_v19, %v318_v15  ;;  %v3111_v25 = vsel %vm322_vm0, %v318_v15, %v319_v19  ;;  %v3115_v26 = vsel %vm548_vm1, %v546_v16, %v547_v20 }
  0x63   : > { %v1013_v27 = vadd.f32 0.81, %v1011_v22  ;;  %370 = vrot.lane.b32.xlu0 %v3078_v12, %s2837_s14  ;;  %v3120_v28 = vsub.f32 %v3107_v24, %v3078_v12  ;;  %v3124_v29 = vsub.f32 %v3111_v25, %v3080_v13  ;;  %v3128_v30 = vsub.f32 %v3115_v26, %v3080_v13 }
  0x64   : > { %v1014_v31 = vadd.f32 0.81, %v1012_v23  ;;  %372 = vrot.lane.b32.xlu1 %v3080_v13, %s2837_s14  ;;  %v3133_v32 = vsel %vm548_vm1, %v547_v20, %v546_v16  ;;  %v3137_v33 = vsel %vm736_vm2, %v735_v21, %v734_v17  ;;  %v3162_v44 = vsel %vm736_vm2, %v734_v17, %v735_v21  ;;  %s2846_s14 = smov 127  }
  0x65   : > { %2462 = vrsqrt.f32 %v1013_v27  ;;  %v434_v34 = vmul.f32 %v3120_v28, %v3120_v28  ;;  %v435_v35 = vmul.f32 %v3124_v29, %v3124_v29  ;;  %v641_v36 = vmul.f32 %v3128_v30, %v3128_v30 }
  0x66   : > { %2464 = vrsqrt.f32 %v1014_v31  ;;  %v3148_v37 = vsub.f32 %v3133_v32, %v3078_v12  ;;  %v3152_v38 = vsub.f32 %v3137_v33, %v3078_v12  ;;  %v3166_v45 = vsub.f32 %v3162_v44, %v3080_v13 }
  0x67   : > { %401 = vrot.lane.b32.xlu0 %v3078_v12, %s2838_s20  ;;  %v436_v39 = vadd.f32 0.81, %v434_v34  ;;  %v437_v40 = vadd.f32 0.81, %v435_v35  ;;  %v643_v41 = vadd.f32 0.81, %v641_v36  ;;  %v3187_v54 = vsel %vm1107_vm3, %v1105_v48, %v1106_v50 }
  0x68   : > { %403 = vrot.lane.b32.xlu1 %v3080_v13, %s2838_s20  ;;  %v640_v42 = vmul.f32 %v3148_v37, %v3148_v37  ;;  %v828_v43 = vmul.f32 %v3152_v38, %v3152_v38  ;;  %v829_v49 = vmul.f32 %v3166_v45, %v3166_v45  ;;  %v1294_v52 = vrot.slane %v3080_v13, 2  ;;  %s2847_s20 = smov 126  }
  0x69   : > { %2466 = vrsqrt.f32 %v436_v39  ;;  %v1481_v55 = vrot.slane %v3078_v12, 3  ;;  %v1482_v56 = vrot.slane %v3080_v13, 3  ;;  %v3197_v58 = vsub.f32 %v3187_v54, %v3078_v12 }
  0x6a   : > { %2468 = vrsqrt.f32 %v437_v40  ;;  %v642_v46 = vadd.f32 0.81, %v640_v42  ;;  %v830_v47 = vadd.f32 0.81, %v828_v43  ;;  %v831_v53 = vadd.f32 0.81, %v829_v49 }
  0x6b   : > { %326 = vrot.lane.b32.xlu0 %v3107_v24, %s2839_s9  ;;  %2470 = vrsqrt.f32 %v643_v41  ;;  %v3201_v59 = vsel %vm1295_vm4, %v1293_v51, %v1294_v52  ;;  %v1199_v4 = vmul.f32 %v3197_v58, %v3197_v58  ;;  %v3215_v8 = vsel %vm1483_vm5, %v1481_v55, %v1482_v56 }
  0x6c   : > { %455 = vrot.lane.b32.xlu1 %v3080_v13, %s2840_s7  ;;  %2472 = vrsqrt.f32 %v642_v46  ;;  %4534 = vst [vmem:[#allocation14_spill] sm:$0xff] %v3201_v59  ;;  %v3208_v62 = vsub.f32 %v3201_v59, %v3078_v12  ;;  %4535 = vst [vmem:[#allocation15_spill] sm:$0xff] %v3215_v8  ;;  %v3219_v10 = vsel %vm1107_vm3, %v1106_v50, %v1105_v48  ;;  %vm1850_vm1 = vcmask 130048  }
  0x6d   : > { %2474 = vrsqrt.f32 %v830_v47  ;;  %v3225_v15 = vsub.f32 %v3215_v8, %v3078_v12  ;;  %v3229_v16 = vsub.f32 %v3219_v10, %v3080_v13  ;;  %v1201_v19 = vadd.f32 0.81, %v1199_v4 }
  0x6e   : > { %2476 = vrsqrt.f32 %v831_v53  ;;  %v3269_v49 = vsel %vm1483_vm5, %v1482_v56, %v1481_v55 }
  0x6f   : > { %v2463_v57 = vpop.eup %2462  ;;  %329 = vrot.lane.b32.xlu0 %v3111_v25, %s2839_s9  ;;  %v1575_v23 = vmul.f32 %v3225_v15, %v3225_v15  ;;  %v1200_v27 = vmul.f32 %v3229_v16, %v3229_v16  ;;  %2478 = vrsqrt.f32 %v1201_v19  ;;  %4536 = vst [vmem:[#allocation16_spill] sm:$0xff] %v3269_v49 }
  0x70   : > { %v2465_v60 = vpop.eup %2464  ;;  %v1017_v61 = vmul.f32 %v2463_v57, %v3087_v14  ;;  %486 = vrot.lane.b32.xlu1 %v3080_v13, %s2841_s30  ;;  %v1387_v14 = vmul.f32 %v3208_v62, %v3208_v62 }
  0x71   : > { %v1018_v63 = vmul.f32 %v2465_v60, %v3095_v18  ;;  %v1577_v39 = vadd.f32 0.81, %v1575_v23  ;;  %v1202_v43 = vadd.f32 0.81, %v1200_v27  ;;  %v1788_v27 = vand.u32 127, %v320_v0 }
  0x72   : > { %v2329_v11 = vpack.c.bf16 %v1017_v61, %v1017_v61  ;;  %v1389_v22 = vadd.f32 0.81, %v1387_v14 }
  0x73   : > { %v2467_v17 = vpop.eup %2466  ;;  %v2330_v18 = vpack.c.bf16 %v1018_v63, %v1018_v63  ;;  %453 = vrot.lane.b32.xlu0 %v3078_v12, %s2840_s7 }
  0x74   : > { %v2469_v20 = vpop.eup %2468  ;;  %2167 = vst.msk [vmem:[%s3234_s13 + $0xc0] sm:$0xf] %vm315_vm6, %v2329_v11  ;;  %v440_v21 = vmul.f32 %v2467_v17, %v3120_v28  ;;  %517 = vrot.lane.b32.xlu1 %v3080_v13, %s2842_s29  ;;  %2480 = vrsqrt.f32 %v1389_v22 }
  0x75   : > { %v2471_v31 = vpop.eup %2470  ;;  %2168 = vst.msk [vmem:[%s3234_s13 + $0xc4] sm:$0xf] %vm315_vm6, %v2330_v18  ;;  %v441_v34 = vmul.f32 %v2469_v20, %v3124_v29  ;;  %v3256_v29 = vsel %vm1295_vm4, %v1294_v52, %v1293_v51  ;;  %2482 = vrsqrt.f32 %v1577_v39  ;;  %v1574_v52 = vsub.f32 %v3269_v49, %v3080_v13 }
  0x76   : > { %v2473_v35 = vpop.eup %2472  ;;  %v2287_v28 = vpack.c.bf16 %v440_v21, %v440_v21  ;;  %v647_v36 = vmul.f32 %v2471_v31, %v3128_v30  ;;  %v1386_v47 = vsub.f32 %v3256_v29, %v3080_v13  ;;  %2484 = vrsqrt.f32 %v1202_v43 }
  0x77   : > { %v2475_v40 = vpop.eup %2474  ;;  %v2288_v41 = vpack.c.bf16 %v441_v34, %v441_v34  ;;  %484 = vrot.lane.b32.xlu0 %v3078_v12, %s2841_s30  ;;  %v646_v42 = vmul.f32 %v2473_v35, %v3148_v37  ;;  %v1576_v56 = vmul.f32 %v1574_v52, %v1574_v52  ;;  %v3337_v31 = vcvt.s32.f32 %v1788_v27 }
  0x78   : > { %2083 = vst.msk [vmem:[%s3234_s13 + $0x18] sm:$0xf] %vm315_vm6, %v2287_v28  ;;  %554 = vrot.lane.b32.xlu1 %v3115_v26, %s2839_s9  ;;  %v2302_v30 = vpack.c.bf16 %v647_v36, %v647_v36  ;;  %v834_v46 = vmul.f32 %v2475_v40, %v3152_v38  ;;  %v2477_v37 = vpop.eup %2476  ;;  %v1388_v51 = vmul.f32 %v1386_v47, %v1386_v47 }
  0x79   : > { %2084 = vst.msk [vmem:[%s3234_s13 + $0x1c] sm:$0xf] %vm315_vm6, %v2288_v41  ;;  %v2301_v48 = vpack.c.bf16 %v646_v42, %v646_v42  ;;  %v835_v38 = vmul.f32 %v2477_v37, %v3166_v45  ;;  %v1578_v45 = vadd.f32 0.81, %v1576_v56  ;;  %v2479_v57 = vpop.eup %2478 }
  0x7a   : > { %2112 = vst.msk [vmem:[%s3234_s13 + $0x54] sm:$0xf] %vm315_vm6, %v2302_v30  ;;  %v2315_v50 = vpack.c.bf16 %v834_v46, %v834_v46  ;;  %v1390_v55 = vadd.f32 0.81, %v1388_v51  ;;  %v1205_v61 = vmul.f32 %v2479_v57, %v3197_v58 }
  0x7b   : > { %515 = vrot.lane.b32.xlu0 %v3078_v12, %s2842_s29  ;;  %2111 = vst.msk [vmem:[%s3234_s13 + $0x50] sm:$0xf] %vm315_vm6, %v2301_v48  ;;  %v2316_v53 = vpack.c.bf16 %v835_v38, %v835_v38  ;;  %s2059_s29 = sshll.u32 %s3034_s10, 3 }
  0x7c   : > { %1671 = vrot.lane.b32.xlu1 %v3052_v1, %s2839_s9  ;;  %2139 = vst.msk [vmem:[%s3234_s13 + $0x88] sm:$0xf] %vm315_vm6, %v2315_v50  ;;  %2486 = vrsqrt.f32 %v1390_v55  ;;  %v2343_v11 = vpack.c.bf16 %v1205_v61, %v1205_v61 }
  0x7d   : > { %2140 = vst.msk [vmem:[%s3234_s13 + $0x8c] sm:$0xf] %vm315_vm6, %v2316_v53  ;;  %2488 = vrsqrt.f32 %v1578_v45 }
  0x7e   : > { %v2481_v60 = vpop.eup %2480  ;;  %2195 = vst.msk [vmem:[%s3234_s13 + $0xf8] sm:$0xf] %vm315_vm6, %v2343_v11 }
  0x7f   : > { %551 = vrot.lane.b32.xlu0 %v3133_v32, %s2839_s9  ;;  %v1393_v63 = vmul.f32 %v2481_v60, %v3208_v62  ;;  %v2483_v4 = vpop.eup %2482 }
  0x80   : > { %1709 = vrot.lane.b32.xlu1 %v3055_v2, %s2839_s9  ;;  %v2485_v14 = vpop.eup %2484  ;;  %v1581_v18 = vmul.f32 %v2483_v4, %v3225_v15 }
  0x81   : > { %v2357_v17 = vpack.c.bf16 %v1393_v63, %v1393_v63  ;;  %v1206_v58 = vmul.f32 %v2485_v14, %v3229_v16 }
  0x82   : > { %v2371_v62 = vpack.c.bf16 %v1581_v18, %v1581_v18 }
  0x83   : > { %739 = vrot.lane.b32.xlu0 %v3137_v33, %s2839_s9  ;;  %2223 = vst.msk [vmem:[%s3234_s13 + $0x130] sm:$0xf] %vm315_vm6, %v2357_v17  ;;  %v2344_v19 = vpack.c.bf16 %v1206_v58, %v1206_v58 }
  0x84   : > { %1747 = vrot.lane.b32.xlu1 %v3058_v3, %s2839_s9  ;;  %2251 = vst.msk [vmem:[%s3234_s13 + $0x168] sm:$0xf] %vm315_vm6, %v2371_v62 }
  0x85   : > { %2196 = vst.msk [vmem:[%s3234_s13 + $0xfc] sm:$0xf] %vm315_vm6, %v2344_v19 }
  0x86   : > { %v2487_v20 = vpop.eup %2486 }
  0x87   : > { %1674 = vrot.lane.b32.xlu0 %v3063_v5, %s2839_s9  ;;  %v1394_v15 = vmul.f32 %v2487_v20, %v1386_v47  ;;  %v2489_v21 = vpop.eup %2488 }
  0x88   : > { %742 = vrot.lane.b32.xlu1 %v3162_v44, %s2839_s9  ;;  %v1582_v22 = vmul.f32 %v2489_v21, %v1574_v52 }
  0x89   : > { %v2358_v16 = vpack.c.bf16 %v1394_v15, %v1394_v15 }
  0x8a   : > { %v2372_v23 = vpack.c.bf16 %v1582_v22, %v1582_v22 }
  0x8b   : > { %1712 = vrot.lane.b32.xlu0 %v3066_v6, %s2839_s9  ;;  %2224 = vst.msk [vmem:[%s3234_s13 + $0x134] sm:$0xf] %vm315_vm6, %v2358_v16 }
  0x8c   : > { %925 = vrot.lane.b32.xlu1 %v3080_v13, %s2839_s9  ;;  %2252 = vst.msk [vmem:[%s3234_s13 + $0x16c] sm:$0xf] %vm315_vm6, %v2372_v23 }
  0x8f   : > { %1750 = vrot.lane.b32.xlu0 %v3069_v7, %s2839_s9 }
  0x90   : > { %1113 = vrot.lane.b32.xlu1 %v3219_v10, %s2839_s9 }
  0x93   : > { %922 = vrot.lane.b32.xlu0 %v3078_v12, %s2839_s9 }
  0x94   : > { %1301 = vrot.lane.b32.xlu1 %v3256_v29, %s2839_s9 }
  0x97   : > { %1110 = vrot.lane.b32.xlu0 %v3187_v54, %s2839_s9 }
  0x98   : > { %1489 = vrot.lane.b32.xlu1 %v3269_v49, %s2839_s9 }
  0x9b   : > { %1298 = vrot.lane.b32.xlu0 %v3201_v59, %s2839_s9 }
  0x9c   : > { %1687 = vrot.lane.b32.xlu1 %v3063_v5, %s2840_s7 }
  0x9f   : > { %1486 = vrot.lane.b32.xlu0 %v3215_v8, %s2839_s9 }
  0xa0   : > { %1725 = vrot.lane.b32.xlu1 %v3066_v6, %s2840_s7 }
  0xa3   : > { %1793 = vrot.lane.b32.xlu0 %v3337_v31, %s2839_s9 }
  0xa4   : > { %1763 = vrot.lane.b32.xlu1 %v3069_v7, %s2840_s7 }
  0xa7   : > { %1685 = vrot.lane.b32.xlu0 %v3052_v1, %s2840_s7 }
  0xa8   : > { %1800 = vrot.lane.b32.xlu1 %v3337_v31, %s2840_s7 }
  0xab   : > { %1723 = vrot.lane.b32.xlu0 %v3055_v2, %s2840_s7 }
  0xaf   : > { %1761 = vrot.lane.b32.xlu0 %v3058_v3, %s2840_s7 }
  0xd1   : > { %v3353_v0 = vpop.permute.xlu0 %340 }
  0xd2   : > { %v3355_v34 = vpop.permute.xlu1 %342 }
  0xd5   : > { %v3357_v35 = vpop.permute.xlu0 %370 }
  0xd6   : > { %v3359_v28 = vpop.permute.xlu1 %372 }
  0xd9   : > { %v3361_v36 = vpop.permute.xlu0 %401 }
  0xda   : > { %v3363_v39 = vpop.permute.xlu1 %403 }
  0xdd   : > { %v327_v40 = vpop.permute.xlu0 %326 }
  0xde   : > { %v3365_v41 = vpop.permute.xlu1 %455  ;;  %v328_v18 = vsel %vm325_vm7, %v327_v40, %v3107_v24 }
  0xe1   : > { %v330_v42 = vpop.permute.xlu0 %329 }
  0xe2   : > { %v3367_v43 = vpop.permute.xlu1 %486  ;;  %v331_v62 = vsel %vm325_vm7, %v330_v42, %v3111_v25 }
  0xe5   : > { %v3369_v30 = vpop.permute.xlu0 %453 }
  0xe6   : > { %v3371_v46 = vpop.permute.xlu1 %517 }
  0xe9   : > { %v3373_v47 = vpop.permute.xlu0 %484 }
  0xea   : > { %v555_v37 = vpop.permute.xlu1 %554 }
  0xeb   : > { %v556_v19 = vsel %vm325_vm7, %v555_v37, %v3115_v26 }
  0xed   : > { %v3375_v48 = vpop.permute.xlu0 %515 }
  0xee   : > { %v1672_v50 = vpop.permute.xlu1 %1671 }
  0xef   : > { %v1673_v40 = vsel %vm325_vm7, %v1672_v50, %v3052_v1 }
  0xf1   : > { %v552_v38 = vpop.permute.xlu0 %551 }
  0xf2   : > { %v1710_v51 = vpop.permute.xlu1 %1709 }
  0xf5   : > { %v740_v52 = vpop.permute.xlu0 %739 }
  0xf6   : > { %v1748_v53 = vpop.permute.xlu1 %1747  ;;  %v741_v16 = vsel %vm325_vm7, %v740_v52, %v3137_v33  ;;  %v1711_v52 = vsel %vm325_vm7, %v1710_v51, %v3055_v2  ;;  %v553_v51 = vsel %vm325_vm7, %v552_v38, %v3133_v32 }
  0xf7   : > { %v1749_v50 = vsel %vm325_vm7, %v1748_v53, %v3058_v3 }
  0xf9   : > { %v1675_v55 = vpop.permute.xlu0 %1674 }
  0xfa   : > { %v1676_v56 = vsel %vm325_vm7, %v1675_v55, %v3063_v5  ;;  %v743_v45 = vpop.permute.xlu1 %742 }
  0xfb   : > { %1679 = vrot.lane.b32.xlu1 %v1676_v56, %s2839_s9 }
  0xfd   : > { %v1713_v57 = vpop.permute.xlu0 %1712 }
  0xfe   : > { %v1714_v60 = vsel %vm325_vm7, %v1713_v57, %v3066_v6  ;;  %v926_v63 = vpop.permute.xlu1 %925  ;;  %v744_v57 = vsel %vm325_vm7, %v743_v45, %v3162_v44 }
  0xff   : > { %1717 = vrot.lane.b32.xlu1 %v1714_v60, %s2839_s9  ;;  %v927_v11 = vsel %vm325_vm7, %v926_v63, %v3080_v13 }
 0x101   : > { %v1751_v61 = vpop.permute.xlu0 %1750 }
 0x102   : > { %v1752_v4 = vsel %vm325_vm7, %v1751_v61, %v3069_v7  ;;  %v1114_v15 = vpop.permute.xlu1 %1113 }
 0x103   : > { %1755 = vrot.lane.b32.xlu1 %v1752_v4, %s2839_s9  ;;  %v1115_v27 = vsel %vm325_vm7, %v1114_v15, %v3219_v10 }
 0x105   : > { %v923_v14 = vpop.permute.xlu0 %922 }
 0x106   : > { %v1302_v23 = vpop.permute.xlu1 %1301  ;;  %v924_v56 = vsel %vm325_vm7, %v923_v14, %v3078_v12 }
 0x107   : > { %930 = vrot.lane.b32.xlu1 %v927_v11, %s2839_s9  ;;  %v1303_v42 = vsel %vm325_vm7, %v1302_v23, %v3256_v29 }
 0x109   : > { %v1111_v17 = vpop.permute.xlu0 %1110 }
 0x10a   : > { %v1490_v37 = vpop.permute.xlu1 %1489  ;;  %v1112_v53 = vsel %vm325_vm7, %v1111_v17, %v3187_v54 }
 0x10b   : > { %332 = vrot.lane.b32.xlu1 %v328_v18, %s2839_s9  ;;  %v1491_v55 = vsel %vm325_vm7, %v1490_v37, %v3269_v49 }
 0x10d   : > { %v1299_v58 = vpop.permute.xlu0 %1298 }
 0x10e   : > { %v1300_v60 = vsel %vm325_vm7, %v1299_v58, %v3201_v59  ;;  %v3440_v61 = vpop.permute.xlu1 %1687 }
 0x10f   : > { %334 = vrot.lane.b32.xlu1 %v331_v62, %s2839_s9 }
 0x111   : > { %v1487_v20 = vpop.permute.xlu0 %1486 }
 0x112   : > { %v1488_v38 = vsel %vm325_vm7, %v1487_v20, %v3215_v8  ;;  %v3442_v45 = vpop.permute.xlu1 %1725 }
 0x113   : > { %559 = vrot.lane.b32.xlu1 %v556_v19, %s2839_s9 }
 0x115   : > { %v1794_v21 = vpop.permute.xlu0 %1793 }
 0x116   : > { %v1795_v22 = vsel %vm325_vm7, %v1794_v21, %v3337_v31  ;;  %v3444_v63 = vpop.permute.xlu1 %1763 }
 0x117   : > { %745 = vrot.lane.b32.xlu1 %v741_v16, %s2839_s9  ;;  %1796 = vrot.lane.b32.xlu0 %v1795_v22, %s2839_s9 }
 0x119   : > { %v1686_v18 = vpop.permute.xlu0 %1685 }
 0x11a   : > { %v3446_v4 = vpop.permute.xlu1 %1800 }
 0x11b   : > { %1118 = vrot.lane.b32.xlu1 %v1115_v27, %s2839_s9  ;;  %1677 = vrot.lane.b32.xlu0 %v1673_v40, %s2839_s9 }
 0x11d   : > { %v1724_v21 = vpop.permute.xlu0 %1723 }
 0x11f   : > { %1306 = vrot.lane.b32.xlu1 %v1303_v42, %s2839_s9  ;;  %1715 = vrot.lane.b32.xlu0 %v1711_v52, %s2839_s9 }
 0x123   : > { %1494 = vrot.lane.b32.xlu1 %v1491_v55, %s2839_s9  ;;  %1753 = vrot.lane.b32.xlu0 %v1749_v50, %s2839_s9 }
 0x127   : > { %928 = vrot.lane.b32.xlu0 %v924_v56, %s2839_s9 }
 0x12b   : > { %557 = vrot.lane.b32.xlu0 %v553_v51, %s2839_s9 }
 0x12f   : > { %747 = vrot.lane.b32.xlu0 %v744_v57, %s2839_s9 }
 0x133   : > { %1116 = vrot.lane.b32.xlu0 %v1112_v53, %s2839_s9 }
 0x137   : > { %1304 = vrot.lane.b32.xlu0 %v1300_v60, %s2839_s9 }
 0x13b   : > { %1492 = vrot.lane.b32.xlu0 %v1488_v38, %s2839_s9 }
 0x16d   : > { %v1680_v11 = vpop.permute.xlu1 %1679 }
 0x171   : > { %v1718_v14 = vpop.permute.xlu1 %1717 }
 0x175   : > { %v1756_v17 = vpop.permute.xlu1 %1755 }
 0x179   : > { %v931_v58 = vpop.permute.xlu1 %930 }
 0x17a   : > { %v933_v62 = vsel %vm325_vm7, %v931_v58, %v3080_v13  ;;  %v1762_v13 = vpop.permute.xlu0 %1761 }
 0x17b   : > { %v935_v19 = vsub.f32 %v933_v62, %v3355_v34  ;;  %v960_v20 = vsub.f32 %v933_v62, %v3359_v28  ;;  %v985_v15 = vsub.f32 %v933_v62, %v3363_v39  ;;  %v1031_v27 = vsub.f32 %v933_v62, %v3365_v41 }
 0x17c   : > { %v1056_v55 = vsub.f32 %v933_v62, %v3367_v43  ;;  %v3456_v51 = vsub.f32 %v933_v62, %v3371_v46 }
 0x17d   : > { %v937_v16 = vmul.f32 %v935_v19, %v935_v19  ;;  %v962_v22 = vmul.f32 %v960_v20, %v960_v20  ;;  %v987_v23 = vmul.f32 %v985_v15, %v985_v15  ;;  %v1033_v52 = vmul.f32 %v1031_v27, %v1031_v27 }
 0x17e   : > { %v1058_v56 = vmul.f32 %v1056_v55, %v1056_v55  ;;  %v1083_v60 = vmul.f32 %v3456_v51, %v3456_v51 }
 0x17f   : > { %v939_v40 = vadd.f32 0.81, %v937_v16  ;;  %v964_v42 = vadd.f32 0.81, %v962_v22  ;;  %v989_v37 = vadd.f32 0.81, %v987_v23 }
 0x180   : > { %v1035_v50 = vadd.f32 0.81, %v1033_v52  ;;  %v1060_v53 = vadd.f32 0.81, %v1058_v56  ;;  %v1085_v23 = vadd.f32 0.81, %v1083_v60 }
 0x181   : > { %2490 = vrsqrt.f32 %v939_v40  ;;  %v333_v40 = vpop.permute.xlu1 %332 }
 0x182   : > { %2492 = vrsqrt.f32 %v964_v42 }
 0x183   : > { %2494 = vrsqrt.f32 %v989_v37 }
 0x184   : > { %2496 = vrsqrt.f32 %v1035_v50  ;;  %v3467_v50 = vsel %vm325_vm7, %v333_v40, %v3107_v24 }
 0x185   : > { %2498 = vrsqrt.f32 %v1060_v53  ;;  %v3476_v24 = vsub.f32 %v3467_v50, %v3353_v0 }
 0x186   : > { %2500 = vrsqrt.f32 %v1085_v23  ;;  %v1758_v23 = vsel %vm325_vm7, %v1756_v17, %v3069_v7 }
 0x189   : > { %v3458_v57 = vpop.permute.xlu0 %1796 }
 0x18b   : > { %v2491_v38 = vpop.eup %2490 }
 0x18c   : > { %v2493_v58 = vpop.eup %2492  ;;  %v943_v16 = vmul.f32 %v2491_v38, %v935_v19  ;;  %v1720_v19 = vsel %vm325_vm7, %v1718_v14, %v3066_v6 }
 0x18d   : > { %v1678_v22 = vpop.permute.xlu0 %1677  ;;  %v968_v37 = vmul.f32 %v2493_v58, %v960_v20  ;;  %v2495_v52 = vpop.eup %2494  ;;  %v1730_v14 = vsub.f32 %v1720_v19, %v3442_v45  ;;  %v348_v45 = vmul.f32 %v3476_v24, %v3476_v24 }
 0x18e   : > { %v2324_v42 = vpack.c.bf16 %v943_v16, %v943_v16  ;;  %v1681_v62 = vsel %vm325_vm7, %v1678_v22, %v3052_v1  ;;  %v993_v60 = vmul.f32 %v2495_v52, %v985_v15  ;;  %v2497_v38 = vpop.eup %2496  ;;  %v1682_v22 = vsel %vm325_vm7, %v1680_v11, %v3063_v5 }
 0x18f   : > { %v2326_v20 = vpack.c.bf16 %v968_v37, %v968_v37  ;;  %v1691_v58 = vsub.f32 %v1681_v62, %v1686_v18  ;;  %v2499_v37 = vpop.eup %2498  ;;  %v1732_v11 = vand.u32 2147483647, %v1730_v14 }
 0x190   : > { %952 = vrot.lane.b32.xlu0 %v2324_v42, %s2843_s22  ;;  %v1039_v42 = vmul.f32 %v2497_v38, %v1031_v27  ;;  %v1064_v38 = vmul.f32 %v2499_v37, %v1056_v55 }
 0x191   : > { %v1716_v56 = vpop.permute.xlu0 %1715  ;;  %v1693_v52 = vand.u32 2147483647, %v1691_v58 }
 0x192   : > { %v1719_v53 = vsel %vm325_vm7, %v1716_v56, %v3055_v2  ;;  %v1692_v56 = vsub.f32 %v1682_v22, %v3440_v61  ;;  %v3494_v61 = vsub.f32 %v3467_v50, %v3357_v35 }
 0x193   : > { %v1729_v16 = vsub.f32 %v1719_v53, %v1724_v21  ;;  %v2328_v21 = vpack.c.bf16 %v993_v60, %v993_v60  ;;  %v1768_v53 = vsub.f32 %v1758_v23, %v3444_v63  ;;  %v2332_v60 = vpack.c.bf16 %v1039_v42, %v1039_v42  ;;  %v2501_v63 = vpop.eup %2500 }
 0x194   : > { %977 = vrot.lane.b32.xlu0 %v2326_v20, %s2844_s28  ;;  %v1694_v14 = vand.u32 2147483647, %v1692_v56  ;;  %v2334_v42 = vpack.c.bf16 %v1064_v38, %v1064_v38  ;;  %v1089_v37 = vmul.f32 %v2501_v63, %v3456_v51 }
 0x195   : > { %v1731_v40 = vand.u32 2147483647, %v1729_v16  ;;  %v1754_v15 = vpop.permute.xlu0 %1753  ;;  %v1770_v23 = vand.u32 2147483647, %v1768_v53 }
 0x196   : > { %v1757_v18 = vsel %vm325_vm7, %v1754_v15, %v3058_v3  ;;  %v1734_v56 = vadd.f32 %v1732_v11, %v1694_v14  ;;  %v2336_v63 = vpack.c.bf16 %v1089_v37, %v1089_v37  ;;  %v1697_v37 = vrot.slane %v3052_v1, 1 }
 0x197   : > { %v1767_v62 = vsub.f32 %v1757_v18, %v1762_v13  ;;  %v1733_v17 = vadd.f32 %v1731_v40, %v1693_v52  ;;  %v378_v52 = vmul.f32 %v3494_v61, %v3494_v61 }
 0x198   : > { %1002 = vrot.lane.b32.xlu0 %v2328_v21, %s2845_s25  ;;  %v1772_v14 = vadd.f32 %v1770_v23, %v1734_v56  ;;  %v1698_v56 = vrot.slane %v3063_v5, 1 }
 0x199   : > { %v1769_v19 = vand.u32 2147483647, %v1767_v62  ;;  %v929_v20 = vpop.permute.xlu0 %928  ;;  %v3520_v62 = vsub.f32 %v3467_v50, %v3361_v36 }
 0x19a   : > { %v932_v27 = vsel %vm325_vm7, %v929_v20, %v3078_v12  ;;  %v350_v12 = vadd.f32 0.81, %v348_v45  ;;  %v3528_v20 = vsub.f32 %v3467_v50, %v3369_v30 }
 0x19b   : > { %v1771_v13 = vadd.f32 %v1769_v19, %v1733_v17  ;;  %v3497_v58 = vsub.f32 %v932_v27, %v3353_v0  ;;  %v3500_v16 = vsub.f32 %v932_v27, %v3357_v35  ;;  %v3503_v22 = vsub.f32 %v932_v27, %v3361_v36 }
 0x19c   : > { %1048 = vrot.lane.b32.xlu0 %v2332_v60, %s2846_s14  ;;  %v3507_v55 = vsub.f32 %v932_v27, %v3369_v30  ;;  %v1798_v19 = vsel %vm325_vm7, %v3458_v57, %v3337_v31  ;;  %2502 = vrsqrt.f32 %v350_v12  ;;  %v3533_v38 = vsub.f32 %v932_v27, %v3373_v47 }
 0x19d   : > { %v1783_v40 = vmul.f32 0.33333334, %v1771_v13  ;;  %v936_v15 = vmul.f32 %v3497_v58, %v3497_v58  ;;  %v961_v18 = vmul.f32 %v3500_v16, %v3500_v16  ;;  %v986_v21 = vmul.f32 %v3503_v22, %v3503_v22 }
 0x19e   : > { %v1032_v11 = vmul.f32 %v3507_v55, %v3507_v55  ;;  %v380_v31 = vadd.f32 0.81, %v378_v52  ;;  %v409_v57 = vmul.f32 %v3520_v62, %v3520_v62  ;;  %v1803_v12 = vsub.f32 %v1798_v19, %v3446_v4  ;;  %v558_v19 = vpop.permute.xlu0 %557 }
 0x19f   : > { %v1816_v53 = vsub.f32 0.0, %v1783_v40  ;;  %v938_v45 = vadd.f32 0.81, %v936_v15  ;;  %v963_v17 = vadd.f32 0.81, %v961_v18  ;;  %v3541_v40 = vsub.f32 %v3467_v50, %v3373_v47  ;;  %v335_v15 = vpop.permute.xlu1 %334 }
 0x1a0   : > { %1073 = vrot.lane.b32.xlu0 %v2334_v42, %s2847_s20  ;;  %v988_v51 = vadd.f32 0.81, %v986_v21  ;;  %v1034_v18 = vadd.f32 0.81, %v1032_v11  ;;  %v1057_v21 = vmul.f32 %v3533_v38, %v3533_v38  ;;  %v3546_v42 = vsub.f32 %v932_v27, %v3375_v48 }
 0x1a1   : > { %v1818_v60 = vmul.f32 150.0, %v1816_v53  ;;  %2504 = vrsqrt.f32 %v938_v45  ;;  %v411_v23 = vadd.f32 0.81, %v409_v57  ;;  %v461_v4 = vmul.f32 %v3528_v20, %v3528_v20 }
 0x1a2   : > { %2506 = vrsqrt.f32 %v963_v17  ;;  %v1735_v52 = vrot.slane %v3055_v2, 1  ;;  %v1784_v53 = vmul.f32 0.33333334, %v1772_v14  ;;  %v3555_v45 = vsel %vm325_vm7, %v335_v15, %v3111_v25 }
 0x1a3   : > { %v1820_v13 = vmul.f32 1.442695, %v1818_v60  ;;  %2508 = vrsqrt.f32 %v988_v51  ;;  %v1804_v17 = vand.u32 2147483647, %v1803_v12  ;;  %v492_v27 = vmul.f32 %v3541_v40, %v3541_v40 }
 0x1a4   : > { %1098 = vrot.lane.b32.xlu0 %v2336_v63, %s2848_s5  ;;  %v1059_v51 = vadd.f32 0.81, %v1057_v21  ;;  %v1082_v60 = vmul.f32 %v3546_v42, %v3546_v42  ;;  %v3563_v11 = vsub.f32 %v3467_v50, %v3375_v48  ;;  %v1736_v25 = vrot.slane %v3066_v6, 1 }
 0x1a5   : > { %2510 = vpow2.f32 %v1820_v13  ;;  %v463_v57 = vadd.f32 0.81, %v461_v4  ;;  %v1699_v14 = vsel %vm1107_vm3, %v1697_v37, %v1698_v56  ;;  %v3572_v15 = vsel %vm325_vm7, %v558_v19, %v3133_v32 }
 0x1a6   : > { %2512 = vrsqrt.f32 %v380_v31  ;;  %v2503_v63 = vpop.eup %2502  ;;  %v3576_v50 = vsub.f32 %v3555_v45, %v3355_v34  ;;  %vm1813_vm8 = vcmp.gt.f32.partialorder %v1804_v17, 0.5  ;;  %vm1814_vm9 = vcmp.lt.f32.partialorder %v1804_v17, 1.5 }
 0x1a7   : > { %2514 = vrsqrt.f32 %v1034_v18  ;;  %v1817_v4 = vsub.f32 0.0, %v1784_v53  ;;  %v1084_v31 = vadd.f32 0.81, %v1082_v60  ;;  %v523_v12 = vmul.f32 %v3563_v11, %v3563_v11  ;;  %vm3595_vm10 = vmand %vm1813_vm8, %vm1814_vm9 }
 0x1a8   : > { %2516 = vrsqrt.f32 %v411_v23  ;;  %v494_v23 = vadd.f32 0.81, %v492_v27  ;;  %v3584_v19 = vsub.f32 %v3572_v15, %v3353_v0  ;;  %v1701_v53 = vsub.f32 %v1699_v14, %v3052_v1 }
 0x1a9   : > { %2518 = vrsqrt.f32 %v1059_v51  ;;  %v3591_v27 = vsel %vm1107_vm3, %v1735_v52, %v1736_v25  ;;  %v525_v17 = vadd.f32 0.81, %v523_v12 }
 0x1aa   : > { %2520 = vrsqrt.f32 %v463_v57  ;;  %v1738_v57 = vsel %vm1107_vm3, %v1736_v25, %v1735_v52 }
 0x1ab   : > { %v2505_v13 = vpop.eup %2504  ;;  %2522 = vrsqrt.f32 %v494_v23 }
 0x1ac   : > { %v2507_v18 = vpop.eup %2506  ;;  %v942_v21 = vmul.f32 %v2505_v13, %v3497_v58  ;;  %v1700_v58 = vsel %vm1107_vm3, %v1698_v56, %v1697_v37  ;;  %v349_v37 = vmul.f32 %v3576_v50, %v3576_v50  ;;  %v1819_v56 = vmul.f32 150.0, %v1817_v4 }
 0x1ad   : > { %v2509_v8 = vpop.eup %2508  ;;  %v967_v32 = vmul.f32 %v2507_v18, %v3500_v16  ;;  %v354_v16 = vmul.f32 %v2503_v63, %v3476_v24  ;;  %2524 = vrsqrt.f32 %v1084_v31  ;;  %v3610_v24 = vsub.f32 %v3555_v45, %v3359_v28 }
 0x1ae   : > { %v2323_v49 = vpack.c.bf16 %v942_v21, %v942_v21  ;;  %v992_v52 = vmul.f32 %v2509_v8, %v3503_v22  ;;  %v1702_v13 = vsub.f32 %v1700_v58, %v3063_v5  ;;  %v1739_v31 = vsub.f32 %v3591_v27, %v3055_v2 }
 0x1af   : > { %v2511_v59 = vpop.eup %2510  ;;  %v2325_v63 = vpack.c.bf16 %v967_v32, %v967_v32  ;;  %v2281_v14 = vpack.c.bf16 %v354_v16, %v354_v16  ;;  %v1740_v21 = vsub.f32 %v1738_v57, %v3066_v6  ;;  %v4539_v8 = vrot.slane %v3069_v7, 1 }
 0x1b0   : > { %v2513_v60 = vpop.eup %2512  ;;  %950 = vrot.lane.b32.xlu1 %v2323_v49, %s2843_s22  ;;  %v1824_v1 = vsel %vm3595_vm10, %v2511_v59, 0.0  ;;  %v565_v49 = vmul.f32 %v3584_v19, %v3584_v19  ;;  %v3617_v59 = vsub.f32 %v3572_v15, %v3357_v35  ;;  %v4540_v22 = vrot.slane %v3058_v3, 1 }
 0x1b1   : > { %1844 = vrot.lane.b32.xlu0 %v1824_v1, %s2846_s14  ;;  %v2515_v25 = vpop.eup %2514  ;;  %v384_v12 = vmul.f32 %v2513_v60, %v3494_v61  ;;  %v351_v5 = vadd.f32 0.81, %v349_v37  ;;  %v3635_v2 = vsub.f32 %v3555_v45, %v3363_v39  ;;  %v1822_v4 = vmul.f32 1.442695, %v1819_v56 }
 0x1b2   : > { %v2517_v18 = vpop.eup %2516  ;;  %v3630_v23 = vsel %vm1107_vm3, %v4540_v22, %v4539_v8  ;;  %2526 = vrsqrt.f32 %v525_v17  ;;  %v379_v6 = vmul.f32 %v3610_v24, %v3610_v24  ;;  %v3642_v61 = vsub.f32 %v3572_v15, %v3361_v36 }
 0x1b3   : > { %v2327_v32 = vpack.c.bf16 %v992_v52, %v992_v52  ;;  %v1038_v58 = vmul.f32 %v2515_v25, %v3507_v55  ;;  %v567_v27 = vadd.f32 0.81, %v565_v49  ;;  %v590_v16 = vmul.f32 %v3617_v59, %v3617_v59  ;;  %v2519_v60 = vpop.eup %2518 }
 0x1b4   : > { %975 = vrot.lane.b32.xlu1 %v2325_v63, %s2844_s28  ;;  %v3647_v57 = vand.u32 2147483647, %v1701_v53  ;;  %v1704_v1 = vand.u32 2147483647, %v1702_v13  ;;  %v2283_v37 = vpack.c.bf16 %v384_v12, %v384_v12  ;;  %v415_v56 = vmul.f32 %v2517_v18, %v3520_v62  ;;  %v2521_v17 = vpop.eup %2520  ;;  %v560_v62 = vpop.permute.xlu1 %559 }
 0x1b5   : > { %362 = vrot.lane.b32.xlu0 %v2281_v14, %s2843_s22  ;;  %v4541_v63 = vmov %v4540_v22  ;;  %v4542_v14 = vmov %v4539_v8  ;;  %2528 = vrsqrt.f32 %v351_v5  ;;  %v410_v55 = vmul.f32 %v3635_v2, %v3635_v2  ;;  %v2523_v25 = vpop.eup %2522  ;;  %v2666_v5 = vld [vmem:[%s3038_s8 + $0x28] sm:$0xff] }
 0x1b6   : > { %v1776_v52 = vsel %vm1107_vm3, %v4542_v14, %v4541_v63  ;;  %v3661_v53 = vsub.f32 %v3555_v45, %v3365_v41  ;;  %2530 = vpow2.f32 %v1822_v4  ;;  %v381_v3 = vadd.f32 0.81, %v379_v6 }
 0x1b7   : > { %v615_v7 = vmul.f32 %v3642_v61, %v3642_v61  ;;  %v3668_v49 = vsub.f32 %v3572_v15, %v3369_v30  ;;  %v2331_v13 = vpack.c.bf16 %v1038_v58, %v1038_v58  ;;  %v1063_v12 = vmul.f32 %v2519_v60, %v3533_v38  ;;  %v2525_v8 = vpop.eup %2524 }
 0x1b8   : > { %1000 = vrot.lane.b32.xlu1 %v2327_v32, %s2845_s25  ;;  %2532 = vrsqrt.f32 %v567_v27  ;;  %v592_v18 = vadd.f32 0.81, %v590_v16  ;;  %v1742_v22 = vand.u32 2147483647, %v1740_v21  ;;  %v1778_v4 = vsub.f32 %v1776_v52, %v2666_v5  ;;  %v748_v27 = vpop.permute.xlu0 %747 }
 0x1b9   : > { %392 = vrot.lane.b32.xlu0 %v2283_v37, %s2844_s28  ;;  %v2285_v32 = vpack.c.bf16 %v415_v56, %v415_v56  ;;  %v467_v6 = vmul.f32 %v2521_v17, %v3528_v20  ;;  %v3675_v37 = vsel %vm325_vm7, %v560_v62, %v3115_v26  ;;  %v412_v63 = vadd.f32 0.81, %v410_v55 }
 0x1ba   : > { %v462_v58 = vmul.f32 %v3661_v53, %v3661_v53  ;;  %v3682_v38 = vsub.f32 %v3555_v45, %v3367_v43  ;;  %2534 = vrsqrt.f32 %v381_v3  ;;  %v617_v21 = vadd.f32 0.81, %v615_v7 }
 0x1bb   : > { %v661_v20 = vmul.f32 %v3668_v49, %v3668_v49  ;;  %v3689_v26 = vsub.f32 %v3555_v45, %v3371_v46  ;;  %v2333_v16 = vpack.c.bf16 %v1063_v12, %v1063_v12  ;;  %v1088_v60 = vmul.f32 %v2525_v8, %v3546_v42 }
 0x1bc   : > { %1046 = vrot.lane.b32.xlu1 %v2331_v13, %s2846_s14  ;;  %2536 = vrsqrt.f32 %v592_v18  ;;  %v3694_v56 = vsub.f32 %v3572_v15, %v3373_v47  ;;  %v2527_v17 = vpop.eup %2526  ;;  %v1741_v14 = vand.u32 2147483647, %v1739_v31  ;;  %v1744_v52 = vadd.f32 %v1742_v22, %v1704_v1 }
 0x1bd   : > { %423 = vrot.lane.b32.xlu0 %v2285_v32, %s2845_s25  ;;  %v2289_v55 = vpack.c.bf16 %v467_v6, %v467_v6  ;;  %v498_v62 = vmul.f32 %v2523_v25, %v3541_v40  ;;  %v1780_v3 = vand.u32 2147483647, %v1778_v4  ;;  %2538 = vrsqrt.f32 %v412_v63  ;;  %v2667_v4 = vld [vmem:[%s3038_s8 + $0x20] sm:$0xff]  ;;  %s2058_s8 = sshll.u32 %s3034_s10, 5 }
 0x1be   : > { %v464_v45 = vadd.f32 0.81, %v462_v58  ;;  %v493_v7 = vmul.f32 %v3682_v38, %v3682_v38  ;;  %v3702_v42 = vsel %vm325_vm7, %v748_v27, %v3162_v44  ;;  %v524_v31 = vmul.f32 %v3689_v26, %v3689_v26  ;;  %s3921_s9 = scalar_lea.vmem [#allocation7], %s2058_s8 }
 0x1bf   : > { %v3709_v40 = vsub.f32 %v3572_v15, %v3375_v48  ;;  %v3713_v1 = vsub.f32 %v3675_v37, %v3355_v34  ;;  %v2529_v25 = vpop.eup %2528  ;;  %v2335_v13 = vpack.c.bf16 %v1088_v60, %v1088_v60  ;;  %2540 = vrsqrt.f32 %v617_v21  ;;  %s1883_s7 = sshll.u32 %s3921_s9, 4  ;;  %s4298_s7 = int_to_ptr.vmem [resolvable:$true] %s1883_s7 }
 0x1c0   : > { %1071 = vrot.lane.b32.xlu1 %v2333_v16, %s2847_s20  ;;  %v663_v12 = vadd.f32 0.81, %v661_v20  ;;  %v686_v44 = vmul.f32 %v3694_v56, %v3694_v56  ;;  %v2531_v18 = vpop.eup %2530  ;;  %v2291_v8 = vpack.c.bf16 %v498_v62, %v498_v62  ;;  %v529_v22 = vmul.f32 %v2527_v17, %v3563_v11 }
 0x1c1   : > { %475 = vrot.lane.b32.xlu0 %v2289_v55, %s2846_s14  ;;  %v3720_v5 = vsub.f32 %v3675_v37, %v3359_v28  ;;  %v1777_v32 = vsub.f32 %v3630_v23, %v2667_v4  ;;  %v1782_v6 = vadd.f32 %v1780_v3, %v1744_v52  ;;  %v495_v63 = vadd.f32 0.81, %v493_v7 }
 0x1c2   : > { %v2533_v15 = vpop.eup %2532  ;;  %v3727_v58 = vsub.f32 %v3702_v42, %v3355_v34  ;;  %v355_v11 = vmul.f32 %v2529_v25, %v3576_v50  ;;  %2542 = vrsqrt.f32 %v464_v45  ;;  %v526_v21 = vadd.f32 0.81, %v524_v31 }
 0x1c3   : > { %v566_v20 = vmul.f32 %v3713_v1, %v3713_v1  ;;  %v1743_v27 = vadd.f32 %v1741_v14, %v3647_v57  ;;  %2544 = vrsqrt.f32 %v663_v12  ;;  %v688_v23 = vadd.f32 0.81, %v686_v44 }
 0x1c4   : > { %1096 = vrot.lane.b32.xlu1 %v2335_v13, %s2848_s5  ;;  %v711_v16 = vmul.f32 %v3709_v40, %v3709_v40  ;;  %v2535_v60 = vpop.eup %2534  ;;  %v1825_v17 = vsel %vm3595_vm10, %v2531_v18, 0.0  ;;  %v2293_v52 = vpack.c.bf16 %v529_v22, %v529_v22  ;;  %v571_v55 = vmul.f32 %v2533_v15, %v3584_v19 }
 0x1c5   : > { %506 = vrot.lane.b32.xlu0 %v2291_v8, %s2847_s20  ;;  %v591_v50 = vmul.f32 %v3720_v5, %v3720_v5  ;;  %v1779_v3 = vand.u32 2147483647, %v1777_v32  ;;  %v1786_v45 = vmul.f32 0.33333334, %v1782_v6  ;;  %2546 = vrsqrt.f32 %v495_v63 }
 0x1c6   : > { %v2537_v62 = vpop.eup %2536  ;;  %v754_v57 = vmul.f32 %v3727_v58, %v3727_v58  ;;  %v2282_v14 = vpack.c.bf16 %v355_v11, %v355_v11  ;;  %2548 = vrsqrt.f32 %v526_v21  ;;  %v568_v51 = vadd.f32 0.81, %v566_v20 }
 0x1c7   : > { %v3747_v19 = vsub.f32 %v3702_v42, %v3359_v28  ;;  %v2539_v7 = vpop.eup %2538  ;;  %v385_v31 = vmul.f32 %v2535_v60, %v3610_v24  ;;  %2550 = vrsqrt.f32 %v688_v23  ;;  %v713_v25 = vadd.f32 0.81, %v711_v16 }
 0x1c8   : > { %1846 = vrot.lane.b32.xlu1 %v1825_v17, %s2846_s14  ;;  %v3752_v13 = vsub.f32 %v3675_v37, %v3363_v39  ;;  %v2295_v12 = vpack.c.bf16 %v571_v55, %v571_v55  ;;  %v596_v44 = vmul.f32 %v2537_v62, %v3617_v59  ;;  %v593_v18 = vadd.f32 0.81, %v591_v50  ;;  %v746_v17 = vpop.permute.xlu1 %745 }
 0x1c9   : > { %537 = vrot.lane.b32.xlu0 %v2293_v52, %s2848_s5  ;;  %v2541_v8 = vpop.eup %2540  ;;  %v1781_v22 = vadd.f32 %v1779_v3, %v1743_v27  ;;  %v1833_v15 = vsub.f32 0.0, %v1786_v45  ;;  %v756_v4 = vadd.f32 0.81, %v754_v57  ;;  %2552 = vrsqrt.f32 %v568_v51 }
 0x1ca   : > { %v779_v24 = vmul.f32 %v3747_v19, %v3747_v19  ;;  %v3761_v32 = vsub.f32 %v3702_v42, %v3363_v39  ;;  %v2284_v6 = vpack.c.bf16 %v385_v31, %v385_v31  ;;  %v416_v59 = vmul.f32 %v2539_v7, %v3635_v2 }
 0x1cb   : > { %2554 = vrsqrt.f32 %v713_v25  ;;  %v616_v63 = vmul.f32 %v3752_v13, %v3752_v13  ;;  %v2297_v21 = vpack.c.bf16 %v596_v44, %v596_v44  ;;  %v621_v20 = vmul.f32 %v2541_v8, %v3642_v61 }
 0x1cc   : > { %364 = vrot.lane.b32.xlu1 %v2282_v14, %s2843_s22  ;;  %v2543_v11 = vpop.eup %2542  ;;  %2556 = vrsqrt.f32 %v593_v18  ;;  %v3769_v27 = vsub.f32 %v3675_v37, %v3365_v41  ;;  %v1785_v16 = vmul.f32 0.33333334, %v1781_v22  ;;  %v1835_v60 = vmul.f32 150.0, %v1833_v15  ;;  %v1119_v18 = vpop.permute.xlu1 %1118 }
 0x1cd   : > { %579 = vrot.lane.b32.xlu0 %v2295_v12, %s2843_s22  ;;  %v2545_v23 = vpop.eup %2544  ;;  %2558 = vrsqrt.f32 %v756_v4  ;;  %v781_v2 = vadd.f32 0.81, %v779_v24  ;;  %v804_v52 = vmul.f32 %v3761_v32, %v3761_v32  ;;  %v2286_v61 = vpack.c.bf16 %v416_v59, %v416_v59 }
 0x1ce   : > { %v468_v50 = vmul.f32 %v2543_v11, %v3661_v53  ;;  %v618_v62 = vadd.f32 0.81, %v616_v63  ;;  %v3778_v3 = vsub.f32 %v3702_v42, %v3365_v41  ;;  %v2299_v57 = vpack.c.bf16 %v621_v20, %v621_v20 }
 0x1cf   : > { %v2547_v55 = vpop.eup %2546  ;;  %v667_v14 = vmul.f32 %v2545_v23, %v3668_v49  ;;  %v662_v51 = vmul.f32 %v3769_v27, %v3769_v27  ;;  %v3785_v7 = vsub.f32 %v3675_v37, %v3367_v43  ;;  %v1832_v25 = vsub.f32 0.0, %v1785_v16 }
 0x1d0   : > { %394 = vrot.lane.b32.xlu1 %v2284_v6, %s2844_s28  ;;  %v2549_v45 = vpop.eup %2548  ;;  %v1838_v12 = vmul.f32 1.442695, %v1835_v60  ;;  %v499_v53 = vmul.f32 %v2547_v55, %v3682_v38  ;;  %2560 = vrsqrt.f32 %v781_v2  ;;  %v806_v44 = vadd.f32 0.81, %v804_v52 }
 0x1d1   : > { %604 = vrot.lane.b32.xlu0 %v2297_v21, %s2844_s28  ;;  %v2551_v31 = vpop.eup %2550  ;;  %v3792_v49 = vsub.f32 %v3702_v42, %v3367_v43  ;;  %v2290_v8 = vpack.c.bf16 %v468_v50, %v468_v50  ;;  %v530_v22 = vmul.f32 %v2549_v45, %v3689_v26  ;;  %2562 = vrsqrt.f32 %v618_v62 }
 0x1d2   : > { %v850_v15 = vmul.f32 %v3778_v3, %v3778_v3  ;;  %v2303_v24 = vpack.c.bf16 %v667_v14, %v667_v14  ;;  %v692_v6 = vmul.f32 %v2551_v31, %v3694_v56  ;;  %v664_v59 = vadd.f32 0.81, %v662_v51 }
 0x1d3   : > { %v2553_v4 = vpop.eup %2552  ;;  %v687_v38 = vmul.f32 %v3785_v7, %v3785_v7  ;;  %v1834_v11 = vmul.f32 150.0, %v1832_v25  ;;  %2564 = vpow2.f32 %v1838_v12  ;;  %v3802_v21 = vsel %vm325_vm7, %v746_v17, %v3137_v33 }
 0x1d4   : > { %425 = vrot.lane.b32.xlu1 %v2286_v61, %s2845_s25  ;;  %v3807_v26 = vsub.f32 %v3675_v37, %v3371_v46  ;;  %v3811_v56 = vsel %vm325_vm7, %v1119_v18, %v3219_v10  ;;  %v2292_v23 = vpack.c.bf16 %v499_v53, %v499_v53  ;;  %2566 = vrsqrt.f32 %v806_v44 }
 0x1d5   : > { %629 = vrot.lane.b32.xlu0 %v2299_v57, %s2845_s25  ;;  %v2555_v63 = vpop.eup %2554  ;;  %v875_v16 = vmul.f32 %v3792_v49, %v3792_v49  ;;  %v2294_v60 = vpack.c.bf16 %v530_v22, %v530_v22  ;;  %v572_v17 = vmul.f32 %v2553_v4, %v3713_v1  ;;  %v852_v2 = vadd.f32 0.81, %v850_v15 }
 0x1d6   : > { %v2557_v20 = vpop.eup %2556  ;;  %v3819_v37 = vsub.f32 %v3702_v42, %v3371_v46  ;;  %v2305_v52 = vpack.c.bf16 %v692_v6, %v692_v6  ;;  %v717_v10 = vmul.f32 %v2555_v63, %v3709_v40  ;;  %2568 = vrsqrt.f32 %v664_v59 }
 0x1d7   : > { %v2559_v33 = vpop.eup %2558  ;;  %v689_v55 = vadd.f32 0.81, %v687_v38  ;;  %v597_v61 = vmul.f32 %v2557_v20, %v3720_v5  ;;  %v712_v50 = vmul.f32 %v3807_v26, %v3807_v26  ;;  %v3828_v1 = vsub.f32 %v3802_v21, %v3353_v0 }
 0x1d8   : > { %477 = vrot.lane.b32.xlu1 %v2290_v8, %s2846_s14  ;;  %v1790_v62 = vadd.s32 8, %v3074_v9  ;;  %v760_v42 = vmul.f32 %v2559_v33, %v3727_v58  ;;  %v877_v40 = vadd.f32 0.81, %v875_v16  ;;  %v3835_v45 = vsub.f32 %v3811_v56, %v3355_v34 }
 0x1d9   : > { %675 = vrot.lane.b32.xlu0 %v2303_v24, %s2846_s14  ;;  %v1791_v5 = vcvt.s32.f32 %v3074_v9  ;;  %2570 = vrsqrt.f32 %v852_v2  ;;  %v900_v57 = vmul.f32 %v3819_v37, %v3819_v37  ;;  %v1836_v51 = vmul.f32 1.442695, %v1834_v11 }
 0x1da   : > { %v1792_v14 = vcvt.s32.f32 %v1790_v62  ;;  %v2561_v31 = vpop.eup %2560  ;;  %v2307_v25 = vpack.c.bf16 %v717_v10, %v717_v10  ;;  %2572 = vrsqrt.f32 %v689_v55  ;;  %v3842_v12 = vsub.f32 %v3802_v21, %v3357_v35 }
 0x1db   : > { %v1805_v58 = vrot.slane %v1791_v5, 1  ;;  %v2563_v53 = vpop.eup %2562  ;;  %v714_v44 = vadd.f32 0.81, %v712_v50  ;;  %v753_v18 = vmul.f32 %v3828_v1, %v3828_v1  ;;  %2574 = vpow2.f32 %v1836_v51 }
 0x1dc   : > { %508 = vrot.lane.b32.xlu1 %v2292_v23, %s2847_s20  ;;  %v1806_v8 = vrot.slane %v1792_v14, 1  ;;  %v2296_v22 = vpack.c.bf16 %v572_v17, %v572_v17  ;;  %v2310_v15 = vpack.c.bf16 %v760_v42, %v760_v42  ;;  %2576 = vrsqrt.f32 %v877_v40 }
 0x1dd   : > { %700 = vrot.lane.b32.xlu0 %v2305_v52, %s2847_s20  ;;  %v1125_v4 = vmul.f32 %v3835_v45, %v3835_v45  ;;  %v2565_v24 = vpop.eup %2564  ;;  %v902_v6 = vadd.f32 0.81, %v900_v57  ;;  %v3852_v59 = vsub.f32 %v3811_v56, %v3359_v28  ;;  %v785_v20 = vmul.f32 %v2561_v31, %v3747_v19 }
 0x1de   : > { %v1807_v38 = vsel %vm1107_vm3, %v1805_v58, %v1806_v8  ;;  %v1808_v63 = vsel %vm1107_vm3, %v1806_v8, %v1805_v58  ;;  %v2567_v11 = vpop.eup %2566  ;;  %v778_v23 = vmul.f32 %v3842_v12, %v3842_v12  ;;  %v622_v17 = vmul.f32 %v2563_v53, %v3752_v13 }
 0x1df   : > { %v1809_v16 = vsub.f32 %v1807_v38, %v1791_v5  ;;  %v1810_v33 = vsub.f32 %v1808_v63, %v1792_v14  ;;  %2578 = vrsqrt.f32 %v714_v44  ;;  %v755_v2 = vadd.f32 0.81, %v753_v18 }
 0x1e0   : > { %539 = vrot.lane.b32.xlu1 %v2294_v60, %s2848_s5  ;;  %v2298_v60 = vpack.c.bf16 %v597_v61, %v597_v61  ;;  %v2569_v52 = vpop.eup %2568  ;;  %v1127_v9 = vadd.f32 0.81, %v1125_v4  ;;  %v3866_v19 = vsub.f32 %v3802_v21, %v3361_v36  ;;  %v810_v50 = vmul.f32 %v2567_v11, %v3761_v32  ;;  %v1307_v11 = vpop.permute.xlu1 %1306 }
 0x1e1   : > { %725 = vrot.lane.b32.xlu0 %v2307_v25, %s2848_s5  ;;  %v1811_v10 = vand.u32 2147483647, %v1809_v16  ;;  %v1812_v55 = vand.u32 2147483647, %v1810_v33  ;;  %2580 = vrsqrt.f32 %v902_v6  ;;  %v1150_v61 = vmul.f32 %v3852_v59, %v3852_v59 }
 0x1e2   : > { %v3873_v13 = vsub.f32 %v3811_v56, %v3363_v39  ;;  %v2312_v62 = vpack.c.bf16 %v785_v20, %v785_v20  ;;  %v780_v42 = vadd.f32 0.81, %v778_v23  ;;  %v2300_v32 = vpack.c.bf16 %v622_v17, %v622_v17 }
 0x1e3   : > { %vm3875_vm11 = vcmp.gt.f32.partialorder %v1811_v10, 0.5  ;;  %vm3879_vm12 = vcmp.gt.f32.partialorder %v1812_v55, 0.5  ;;  %v2571_v57 = vpop.eup %2570  ;;  %v668_v14 = vmul.f32 %v2569_v52, %v3769_v27  ;;  %vm3886_vm13 = vcmp.lt.f32.partialorder %v1811_v10, 1.5 }
 0x1e4   : > { %581 = vrot.lane.b32.xlu1 %v2296_v22, %s2843_s22  ;;  %vm3890_vm14 = vcmp.lt.f32.partialorder %v1812_v55, 1.5  ;;  %v2573_v25 = vpop.eup %2572  ;;  %2582 = vrsqrt.f32 %v755_v2  ;;  %v803_v58 = vmul.f32 %v3866_v19, %v3866_v19  ;;  %v3899_v53 = vsub.f32 %v3802_v21, %v3369_v30  ;;  %vm1830_vm15 = vmand %vm3875_vm11, %vm3886_vm13 }
 0x1e5   : > { %769 = vrot.lane.b32.xlu0 %v2310_v15, %s2843_s22  ;;  %v3903_v27 = vsub.f32 %v3811_v56, %v3365_v41  ;;  %v2575_v44 = vpop.eup %2574  ;;  %v2314_v18 = vpack.c.bf16 %v810_v50, %v810_v50  ;;  %2584 = vrsqrt.f32 %v1127_v9  ;;  %v1152_v8 = vadd.f32 0.81, %v1150_v61  ;;  %vm1831_vm0 = vmand %vm3879_vm12, %vm3890_vm14 }
 0x1e6   : > { %v1175_v22 = vmul.f32 %v3873_v13, %v3873_v13  ;;  %v2577_v15 = vpop.eup %2576  ;;  %v856_v4 = vmul.f32 %v2571_v57, %v3778_v3  ;;  %v1840_v6 = vsel %vm1830_vm15, %v2575_v44, 0.0  ;;  %v1841_v38 = vsel %vm1831_vm0, %v2565_v24, 0.0  ;;  %v1117_v3 = vpop.permute.xlu0 %1116 }
 0x1e7   : > { %2586 = vrsqrt.f32 %v780_v42  ;;  %v3919_v63 = vsub.f32 %v3802_v21, %v3373_v47  ;;  %2269 = vst.msk [vmem:[%s3921_s9 + $0x10] sm:$0xff] %vm1850_vm1, %v1840_v6  ;;  %2270 = vst.msk [vmem:[%s3921_s9 + $0x18] sm:$0xff] %vm1850_vm1, %v1841_v38  ;;  %v805_v24 = vadd.f32 0.81, %v803_v58  ;;  %v849_v20 = vmul.f32 %v3899_v53, %v3899_v53 }
 0x1e8   : > { %606 = vrot.lane.b32.xlu1 %v2298_v60, %s2844_s28  ;;  %v1221_v23 = vmul.f32 %v3903_v27, %v3903_v27  ;;  %v3934_v16 = vsub.f32 %v3811_v56, %v3367_v43  ;;  %v2304_v60 = vpack.c.bf16 %v668_v14, %v668_v14  ;;  %v693_v17 = vmul.f32 %v2573_v25, %v3785_v7 }
 0x1e9   : > { %794 = vrot.lane.b32.xlu0 %v2312_v62, %s2844_s28  ;;  %v2579_v33 = vpop.eup %2578  ;;  %2588 = vrsqrt.f32 %v1152_v8  ;;  %v1177_v2 = vadd.f32 0.81, %v1175_v22  ;;  %v2318_v52 = vpack.c.bf16 %v856_v4, %v856_v4  ;;  %v881_v9 = vmul.f32 %v2577_v15, %v3792_v49 }
 0x1ea   : > { %v3940_v55 = vsel %vm325_vm7, %v1307_v11, %v3256_v29  ;;  %v3944_v50 = vsel %vm325_vm7, %v1117_v3, %v3187_v54  ;;  %v874_v61 = vmul.f32 %v3919_v63, %v3919_v63  ;;  %v3951_v7 = vsub.f32 %v3802_v21, %v3375_v48  ;;  %v3982_v4 = vpop.permute.xlu0 %1304 }
 0x1eb   : > { %v2581_v10 = vpop.eup %2580  ;;  %2590 = vrsqrt.f32 %v805_v24  ;;  %v851_v49 = vadd.f32 0.81, %v849_v20  ;;  %v1223_v62 = vadd.f32 0.81, %v1221_v23  ;;  %v1246_v29 = vmul.f32 %v3934_v16, %v3934_v16 }
 0x1ec   : > { %631 = vrot.lane.b32.xlu1 %v2300_v32, %s2845_s25  ;;  %v2306_v42 = vpack.c.bf16 %v693_v17, %v693_v17  ;;  %v718_v54 = vmul.f32 %v2579_v33, %v3807_v26  ;;  %2592 = vrsqrt.f32 %v1177_v2  ;;  %v3959_v40 = vsub.f32 %v3811_v56, %v3371_v46 }
 0x1ed   : > { %819 = vrot.lane.b32.xlu0 %v2314_v18, %s2845_s25  ;;  %v2320_v57 = vpack.c.bf16 %v881_v9, %v881_v9  ;;  %v906_v21 = vmul.f32 %v2581_v10, %v3819_v37  ;;  %v876_v14 = vadd.f32 0.81, %v874_v61  ;;  %v899_v51 = vmul.f32 %v3951_v7, %v3951_v7 }
 0x1ee   : > { %v2583_v5 = vpop.eup %2582  ;;  %v3967_v31 = vsub.f32 %v3944_v50, %v3353_v0  ;;  %2594 = vrsqrt.f32 %v851_v49  ;;  %v1248_v26 = vadd.f32 0.81, %v1246_v29  ;;  %v3972_v56 = vsub.f32 %v3940_v55, %v3355_v34  ;;  %v4010_v61 = vpop.permute.xlu0 %1492 }
 0x1ef   : > { %v2585_v32 = vpop.eup %2584  ;;  %v2308_v25 = vpack.c.bf16 %v718_v54, %v718_v54  ;;  %v759_v58 = vmul.f32 %v2583_v5, %v3828_v1  ;;  %2596 = vrsqrt.f32 %v1223_v62  ;;  %v1271_v44 = vmul.f32 %v3959_v40, %v3959_v40 }
 0x1f0   : > { %677 = vrot.lane.b32.xlu1 %v2304_v60, %s2846_s14  ;;  %v2322_v18 = vpack.c.bf16 %v906_v21, %v906_v21  ;;  %v1131_v8 = vmul.f32 %v2585_v32, %v3835_v45  ;;  %v3980_v22 = vsub.f32 %v3944_v50, %v3357_v35  ;;  %2598 = vrsqrt.f32 %v876_v14 }
 0x1f1   : > { %865 = vrot.lane.b32.xlu0 %v2318_v52, %s2846_s14  ;;  %v2587_v37 = vpop.eup %2586  ;;  %v901_v6 = vadd.f32 0.81, %v899_v51  ;;  %v1124_v1 = vmul.f32 %v3967_v31, %v3967_v31  ;;  %2600 = vrsqrt.f32 %v1248_v26  ;;  %v1313_v45 = vmul.f32 %v3972_v56, %v3972_v56 }
 0x1f2   : > { %v3992_v38 = vsub.f32 %v3940_v55, %v3359_v28  ;;  %v2309_v11 = vpack.c.bf16 %v759_v58, %v759_v58  ;;  %v784_v3 = vmul.f32 %v2587_v37, %v3842_v12  ;;  %v1273_v24 = vadd.f32 0.81, %v1271_v44 }
 0x1f3   : > { %v2589_v15 = vpop.eup %2588  ;;  %v3997_v20 = vsub.f32 %v3944_v50, %v3361_v36  ;;  %v2338_v33 = vpack.c.bf16 %v1131_v8, %v1131_v8  ;;  %v1149_v17 = vmul.f32 %v3980_v22, %v3980_v22  ;;  %2602 = vrsqrt.f32 %v901_v6 }
 0x1f4   : > { %702 = vrot.lane.b32.xlu1 %v2306_v42, %s2847_s20  ;;  %v1156_v60 = vmul.f32 %v2589_v15, %v3852_v59  ;;  %v1126_v52 = vadd.f32 0.81, %v1124_v1  ;;  %v1315_v12 = vadd.f32 0.81, %v1313_v45  ;;  %v1338_v9 = vmul.f32 %v3992_v38, %v3992_v38 }
 0x1f5   : > { %890 = vrot.lane.b32.xlu0 %v2320_v57, %s2847_s20  ;;  %v2591_v23 = vpop.eup %2590  ;;  %v4008_v10 = vsub.f32 %v3940_v55, %v3363_v39  ;;  %v2311_v59 = vpack.c.bf16 %v784_v3, %v784_v3  ;;  %2604 = vrsqrt.f32 %v1273_v24  ;;  %v1174_v62 = vmul.f32 %v3997_v20, %v3997_v20 }
 0x1f6   : > { %v2593_v2 = vpop.eup %2592  ;;  %v809_v49 = vmul.f32 %v2591_v23, %v3866_v19  ;;  %v2340_v42 = vpack.c.bf16 %v1156_v60, %v1156_v60  ;;  %v1151_v5 = vadd.f32 0.81, %v1149_v17  ;;  %2606 = vrsqrt.f32 %v1126_v52  ;;  %v1495_v60 = vpop.permute.xlu1 %1494 }
 0x1f7   : > { %v1181_v54 = vmul.f32 %v2593_v2, %v3873_v13  ;;  %v4019_v21 = vsub.f32 %v3944_v50, %v3369_v30  ;;  %2608 = vrsqrt.f32 %v1315_v12  ;;  %v1340_v19 = vadd.f32 0.81, %v1338_v9  ;;  %v4551_v2 = vld [vmem:[#allocation14_spill] sm:$0xff] }
 0x1f8   : > { %727 = vrot.lane.b32.xlu1 %v2308_v25, %s2848_s5  ;;  %v2595_v29 = vpop.eup %2594  ;;  %v1363_v32 = vmul.f32 %v4008_v10, %v4008_v10  ;;  %v2313_v13 = vpack.c.bf16 %v809_v49, %v809_v49  ;;  %v1176_v37 = vadd.f32 0.81, %v1174_v62  ;;  %v4027_v25 = vsub.f32 %v3940_v55, %v3365_v41 }
 0x1f9   : > { %915 = vrot.lane.b32.xlu0 %v2322_v18, %s2848_s5  ;;  %v2597_v57 = vpop.eup %2596  ;;  %v855_v26 = vmul.f32 %v2595_v29, %v3899_v53  ;;  %v2342_v44 = vpack.c.bf16 %v1181_v54, %v1181_v54  ;;  %2610 = vrsqrt.f32 %v1151_v5  ;;  %v4034_v8 = vsub.f32 %v3944_v50, %v3373_v47  ;;  %v4552_v54 = vld [vmem:[#allocation16_spill] sm:$0xff] }
 0x1fa   : > { %v2599_v14 = vpop.eup %2598  ;;  %v1227_v18 = vmul.f32 %v2597_v57, %v3903_v27  ;;  %v1220_v53 = vmul.f32 %v4019_v21, %v4019_v21  ;;  %v1365_v6 = vadd.f32 0.81, %v1363_v32  ;;  %2612 = vrsqrt.f32 %v1340_v19 }
 0x1fb   : > { %v2601_v58 = vpop.eup %2600  ;;  %v880_v15 = vmul.f32 %v2599_v14, %v3919_v63  ;;  %v1409_v27 = vmul.f32 %v4027_v25, %v4027_v25  ;;  %v4045_v3 = vsub.f32 %v3940_v55, %v3367_v43  ;;  %2614 = vrsqrt.f32 %v1176_v37 }
 0x1fc   : > { %767 = vrot.lane.b32.xlu1 %v2309_v11, %s2843_s22  ;;  %v2317_v11 = vpack.c.bf16 %v855_v26, %v855_v26  ;;  %v2346_v24 = vpack.c.bf16 %v1227_v18, %v1227_v18  ;;  %v1252_v23 = vmul.f32 %v2601_v58, %v3934_v16  ;;  %v1245_v63 = vmul.f32 %v4034_v8, %v4034_v8 }
 0x1fd   : > { %1140 = vrot.lane.b32.xlu0 %v2338_v33, %s2843_s22  ;;  %v2603_v1 = vpop.eup %2602  ;;  %v1222_v17 = vadd.f32 0.81, %v1220_v53  ;;  %v4056_v52 = vsel %vm325_vm7, %v3982_v4, %v4551_v2  ;;  %v2319_v12 = vpack.c.bf16 %v880_v15, %v880_v15  ;;  %v4062_v9 = vsub.f32 %v3944_v50, %v3375_v48 }
 0x1fe   : > { %v905_v16 = vmul.f32 %v2603_v1, %v3951_v7  ;;  %2616 = vrsqrt.f32 %v1365_v6  ;;  %v1411_v62 = vadd.f32 0.81, %v1409_v27  ;;  %v1434_v29 = vmul.f32 %v4045_v3, %v4045_v3 }
 0x1ff   : > { %v2605_v33 = vpop.eup %2604  ;;  %v4068_v4 = vsub.f32 %v3940_v55, %v3371_v46  ;;  %v4072_v5 = vsel %vm325_vm7, %v1495_v60, %v4552_v54  ;;  %v2348_v50 = vpack.c.bf16 %v1252_v23, %v1252_v23  ;;  %v1247_v57 = vadd.f32 0.81, %v1245_v63 }
 0x200   : > { %792 = vrot.lane.b32.xlu1 %v2311_v59, %s2844_s28  ;;  %v2607_v59 = vpop.eup %2606  ;;  %v1277_v7 = vmul.f32 %v2605_v33, %v3959_v40  ;;  %2618 = vrsqrt.f32 %v1222_v17  ;;  %v2321_v55 = vpack.c.bf16 %v905_v16, %v905_v16  ;;  %v1270_v14 = vmul.f32 %v4062_v9, %v4062_v9 }
 0x201   : > { %1165 = vrot.lane.b32.xlu0 %v2340_v42, %s2844_s28  ;;  %v2609_v42 = vpop.eup %2608  ;;  %v1130_v32 = vmul.f32 %v2607_v59, %v3967_v31  ;;  %2620 = vrsqrt.f32 %v1411_v62  ;;  %v1436_v40 = vadd.f32 0.81, %v1434_v29  ;;  %v1459_v26 = vmul.f32 %v4068_v4, %v4068_v4 }
 0x202   : > { %v953_v51 = vpop.permute.xlu0 %952  ;;  %v4090_v37 = vsub.f32 %v4072_v5, %v3355_v34  ;;  %v2350_v31 = vpack.c.bf16 %v1277_v7, %v1277_v7  ;;  %v1319_v58 = vmul.f32 %v2609_v42, %v3972_v56  ;;  %2622 = vrsqrt.f32 %v1247_v57 }
 0x203   : > { %2156 = vst.msk [vmem:[%s3234_s13 + $0xac] sm:$0xf] %vm315_vm6, %v953_v51  ;;  %v2611_v19 = vpop.eup %2610  ;;  %v4084_v51 = vsub.f32 %v4056_v52, %v3353_v0  ;;  %v2337_v15 = vpack.c.bf16 %v1130_v32, %v1130_v32  ;;  %v1272_v6 = vadd.f32 0.81, %v1270_v14  ;;  %v4102_v1 = vsub.f32 %v4056_v52, %v3357_v35 }
 0x204   : > { %817 = vrot.lane.b32.xlu1 %v2313_v13, %s2845_s25  ;;  %v1155_v18 = vmul.f32 %v2611_v19, %v3980_v22  ;;  %2624 = vrsqrt.f32 %v1436_v40  ;;  %v4108_v22 = vsub.f32 %v4072_v5, %v3359_v28  ;;  %v2352_v27 = vpack.c.bf16 %v1319_v58, %v1319_v58 }
 0x205   : > { %1190 = vrot.lane.b32.xlu0 %v2342_v44, %s2845_s25  ;;  %v2613_v44 = vpop.eup %2612  ;;  %v1312_v34 = vmul.f32 %v4084_v51, %v4084_v51  ;;  %2626 = vrsqrt.f32 %v1272_v6  ;;  %v1337_v28 = vmul.f32 %v4102_v1, %v4102_v1  ;;  %v4120_v17 = vsub.f32 %v4056_v52, %v3361_v36 }
 0x206   : > { %v978_v45 = vpop.permute.xlu0 %977  ;;  %v2615_v53 = vpop.eup %2614  ;;  %v2339_v63 = vpack.c.bf16 %v1155_v18, %v1155_v18  ;;  %v1526_v16 = vmul.f32 %v4108_v22, %v4108_v22  ;;  %v4134_v42 = vsub.f32 %v4056_v52, %v3369_v30  ;;  %v4141_v7 = vsub.f32 %v4072_v5, %v3365_v41 }
 0x207   : > { %2160 = vst.msk [vmem:[%s3234_s13 + $0xb4] sm:$0xf] %vm315_vm6, %v978_v45  ;;  %v1461_v45 = vadd.f32 0.81, %v1459_v26  ;;  %v1180_v33 = vmul.f32 %v2615_v53, %v3997_v20  ;;  %v1314_v60 = vadd.f32 0.81, %v1312_v34  ;;  %v4126_v20 = vsub.f32 %v4072_v5, %v3363_v39 }
 0x208   : > { %863 = vrot.lane.b32.xlu1 %v2317_v11, %s2846_s14  ;;  %v1501_v11 = vmul.f32 %v4090_v37, %v4090_v37  ;;  %v2617_v23 = vpop.eup %2616  ;;  %v1362_v39 = vmul.f32 %v4120_v17, %v4120_v17  ;;  %v1528_v57 = vadd.f32 0.81, %v1526_v16  ;;  %v1408_v40 = vmul.f32 %v4134_v42, %v4134_v42 }
 0x209   : > { %1236 = vrot.lane.b32.xlu0 %v2346_v24, %s2846_s14  ;;  %v1344_v24 = vmul.f32 %v2613_v44, %v3992_v38  ;;  %2628 = vrsqrt.f32 %v1461_v45  ;;  %v2341_v29 = vpack.c.bf16 %v1180_v33, %v1180_v33  ;;  %v1551_v19 = vmul.f32 %v4126_v20, %v4126_v20 }
 0x20a   : > { %v1003_v49 = vpop.permute.xlu0 %1002  ;;  %v2619_v2 = vpop.eup %2618  ;;  %2630 = vrsqrt.f32 %v1314_v60  ;;  %v1364_v41 = vadd.f32 0.81, %v1362_v39  ;;  %v4156_v26 = vsub.f32 %v4056_v52, %v3373_v47 }
 0x20b   : > { %2164 = vst.msk [vmem:[%s3234_s13 + $0xbc] sm:$0xf] %vm315_vm6, %v1003_v49  ;;  %v2354_v59 = vpack.c.bf16 %v1344_v24, %v1344_v24  ;;  %v1369_v49 = vmul.f32 %v2617_v23, %v4008_v10  ;;  %v2621_v62 = vpop.eup %2620  ;;  %v1226_v10 = vmul.f32 %v2619_v2, %v4019_v21  ;;  %v1597_v21 = vmul.f32 %v4141_v7, %v4141_v7 }
 0x20c   : > { %888 = vrot.lane.b32.xlu1 %v2319_v12, %s2847_s20  ;;  %v1503_v12 = vadd.f32 0.81, %v1501_v11  ;;  %v2623_v54 = vpop.eup %2622  ;;  %v1415_v32 = vmul.f32 %v2621_v62, %v4027_v25  ;;  %v1433_v45 = vmul.f32 %v4156_v26, %v4156_v26  ;;  %v4181_v24 = vsub.f32 %v4072_v5, %v3371_v46 }
 0x20d   : > { %1261 = vrot.lane.b32.xlu0 %v2348_v50, %s2847_s20  ;;  %v1339_v50 = vadd.f32 0.81, %v1337_v28  ;;  %v2345_v25 = vpack.c.bf16 %v1226_v10, %v1226_v10 }
 0x20e   : > { %v1049_v13 = vpop.permute.xlu0 %1048  ;;  %2632 = vrsqrt.f32 %v1503_v12  ;;  %v2625_v14 = vpop.eup %2624  ;;  %v2360_v44 = vpack.c.bf16 %v1415_v32, %v1415_v32  ;;  %v1435_v46 = vadd.f32 0.81, %v1433_v45  ;;  %v1647_v12 = vmul.f32 %v4181_v24, %v4181_v24 }
 0x20f   : > { %2172 = vst.msk [vmem:[%s3234_s13 + $0xcc] sm:$0xf] %vm315_vm6, %v1049_v13  ;;  %v1251_v13 = vmul.f32 %v2623_v54, %v4034_v8  ;;  %2634 = vrsqrt.f32 %v1339_v50  ;;  %v4160_v8 = vsub.f32 %v4072_v5, %v3367_v43  ;;  %v2627_v58 = vpop.eup %2626  ;;  %v1440_v18 = vmul.f32 %v2625_v14, %v4045_v3 }
 0x210   : > { %913 = vrot.lane.b32.xlu1 %v2321_v55, %s2848_s5  ;;  %v2356_v55 = vpack.c.bf16 %v1369_v49, %v1369_v49  ;;  %2636 = vrsqrt.f32 %v1528_v57  ;;  %v1599_v43 = vadd.f32 0.81, %v1597_v21  ;;  %v4174_v3 = vsub.f32 %v4056_v52, %v3375_v48 }
 0x211   : > { %1286 = vrot.lane.b32.xlu0 %v2350_v31, %s2848_s5  ;;  %v1553_v31 = vadd.f32 0.81, %v1551_v19  ;;  %v2347_v34 = vpack.c.bf16 %v1251_v13, %v1251_v13  ;;  %2638 = vrsqrt.f32 %v1364_v41  ;;  %v2362_v33 = vpack.c.bf16 %v1440_v18, %v1440_v18 }
 0x212   : > { %v1074_v56 = vpop.permute.xlu0 %1073  ;;  %v1649_v10 = vadd.f32 0.81, %v1647_v12 }
 0x213   : > { %2176 = vst.msk [vmem:[%s3234_s13 + $0xd4] sm:$0xf] %vm315_vm6, %v1074_v56  ;;  %v2629_v53 = vpop.eup %2628  ;;  %v1410_v56 = vadd.f32 0.81, %v1408_v40  ;;  %2640 = vrsqrt.f32 %v1553_v31 }
 0x214   : > { %1138 = vrot.lane.b32.xlu1 %v2337_v15, %s2843_s22  ;;  %v4553_v15 = vld [vmem:[#allocation15_spill] sm:$0xff]  ;;  %v2631_v23 = vpop.eup %2630  ;;  %v1465_v60 = vmul.f32 %v2629_v53, %v4068_v4 }
 0x215   : > { %1328 = vrot.lane.b32.xlu0 %v2352_v27, %s2843_s22  ;;  %v4166_v6 = vsel %vm325_vm7, %v4010_v61, %v4553_v15  ;;  %v1276_v61 = vmul.f32 %v2627_v58, %v4062_v9  ;;  %v1622_v27 = vmul.f32 %v4160_v8, %v4160_v8  ;;  %2642 = vrsqrt.f32 %v1410_v56 }
 0x216   : > { %v1099_v38 = vpop.permute.xlu0 %1098  ;;  %2644 = vrsqrt.f32 %v1599_v43  ;;  %v1458_v9 = vmul.f32 %v4174_v3, %v4174_v3  ;;  %v4194_v5 = vsub.f32 %v4166_v6, %v3353_v0  ;;  %v1318_v2 = vmul.f32 %v2631_v23, %v4084_v51 }
 0x217   : > { %2180 = vst.msk [vmem:[%s3234_s13 + $0xdc] sm:$0xf] %vm315_vm6, %v1099_v38  ;;  %v2349_v28 = vpack.c.bf16 %v1276_v61, %v1276_v61  ;;  %v1624_v38 = vadd.f32 0.81, %v1622_v27  ;;  %v2364_v49 = vpack.c.bf16 %v1465_v60, %v1465_v60  ;;  %2646 = vrsqrt.f32 %v1435_v46 }
 0x218   : > { %1163 = vrot.lane.b32.xlu1 %v2339_v63, %s2844_s28  ;;  %v2633_v52 = vpop.eup %2632  ;;  %v1460_v0 = vadd.f32 0.81, %v1458_v9  ;;  %v1500_v51 = vmul.f32 %v4194_v5, %v4194_v5  ;;  %v4210_v54 = vsub.f32 %v4166_v6, %v3357_v35  ;;  %v2351_v39 = vpack.c.bf16 %v1318_v2, %v1318_v2 }
 0x219   : > { %1353 = vrot.lane.b32.xlu0 %v2354_v59, %s2844_s28  ;;  %v2635_v16 = vpop.eup %2634  ;;  %v1507_v62 = vmul.f32 %v2633_v52, %v4090_v37  ;;  %2648 = vrsqrt.f32 %v1624_v38  ;;  %v4224_v13 = vsub.f32 %v4166_v6, %v3361_v36  ;;  %v4238_v18 = vsub.f32 %v4166_v6, %v3369_v30 }
 0x21a   : > { %v1343_v37 = vmul.f32 %v2635_v16, %v4102_v1  ;;  %2650 = vrsqrt.f32 %v1460_v0  ;;  %v1502_v35 = vadd.f32 0.81, %v1500_v51  ;;  %v1525_v1 = vmul.f32 %v4210_v54, %v4210_v54 }
 0x21b   : > { %2652 = vrsqrt.f32 %v1649_v10  ;;  %v4252_v61 = vsub.f32 %v4166_v6, %v3373_v47  ;;  %v4266_v9 = vsub.f32 %v4166_v6, %v3375_v48 }
 0x21c   : > { %1188 = vrot.lane.b32.xlu1 %v2341_v29, %s2845_s25  ;;  %v2637_v29 = vpop.eup %2636  ;;  %2654 = vrsqrt.f32 %v1502_v35  ;;  %v1527_v36 = vadd.f32 0.81, %v1525_v1 }
 0x21d   : > { %1378 = vrot.lane.b32.xlu0 %v2356_v55, %s2845_s25  ;;  %v2639_v57 = vpop.eup %2638  ;;  %v2366_v55 = vpack.c.bf16 %v1507_v62, %v1507_v62  ;;  %v1532_v32 = vmul.f32 %v2637_v29, %v4108_v22  ;;  %v2353_v22 = vpack.c.bf16 %v1343_v37, %v1343_v37  ;;  %v1646_v6 = vmul.f32 %v4266_v9, %v4266_v9 }
 0x21e   : > { %v2641_v14 = vpop.eup %2640  ;;  %v1368_v21 = vmul.f32 %v2639_v57, %v4120_v17  ;;  %v1550_v17 = vmul.f32 %v4224_v13, %v4224_v13  ;;  %2656 = vrsqrt.f32 %v1527_v36 }
 0x21f   : > { %v2643_v40 = vpop.eup %2642  ;;  %v2368_v58 = vpack.c.bf16 %v1532_v32, %v1532_v32  ;;  %v1648_v0 = vadd.f32 0.81, %v1646_v6 }
 0x220   : > { %1234 = vrot.lane.b32.xlu1 %v2345_v25, %s2846_s14  ;;  %v2645_v25 = vpop.eup %2644  ;;  %v2355_v15 = vpack.c.bf16 %v1368_v21, %v1368_v21  ;;  %v1552_v30 = vadd.f32 0.81, %v1550_v17  ;;  %v2064_v21 = vld [vmem:[%s3045_s12 + $0x18] sm:$0xff] }
 0x221   : > { %1424 = vrot.lane.b32.xlu0 %v2360_v44, %s2846_s14  ;;  %v1557_v44 = vmul.f32 %v2641_v14, %v4126_v20  ;;  %v1414_v20 = vmul.f32 %v2643_v40, %v4134_v42  ;;  %v1603_v45 = vmul.f32 %v2645_v25, %v4141_v7  ;;  %v1596_v42 = vmul.f32 %v4238_v18, %v4238_v18  ;;  %v281_v40 = vld [vmem:[%s3045_s12] sm:$0xff] }
 0x222   : > { %v951_v11 = vpop.permute.xlu1 %950  ;;  %2658 = vrsqrt.f32 %v1552_v30 }
 0x223   : > { %2155 = vst.msk [vmem:[%s3234_s13 + $0xa8] sm:$0xf] %vm315_vm6, %v951_v11  ;;  %v1845_v63 = vpop.permute.xlu0 %1844  ;;  %v2370_v43 = vpack.c.bf16 %v1557_v44, %v1557_v44  ;;  %v2359_v23 = vpack.c.bf16 %v1414_v20, %v1414_v20  ;;  %v2374_v60 = vpack.c.bf16 %v1603_v45, %v1603_v45  ;;  %v1598_v47 = vadd.f32 0.81, %v1596_v42 }
 0x224   : > { %1851 = vst.msk [vmem:[%s3921_s9] sm:$0xff] %vm1850_vm1, %v1845_v63  ;;  %1259 = vrot.lane.b32.xlu1 %v2347_v34, %s2847_s20  ;;  %v2647_v34 = vpop.eup %2646 }
 0x225   : > { %1449 = vrot.lane.b32.xlu0 %v2362_v33, %s2847_s20  ;;  %v2649_v11 = vpop.eup %2648  ;;  %v1439_v7 = vmul.f32 %v2647_v34, %v4156_v26  ;;  %v1621_v26 = vmul.f32 %v4252_v61, %v4252_v61  ;;  %2660 = vrsqrt.f32 %v1598_v47 }
 0x226   : > { %v976_v4 = vpop.permute.xlu1 %975  ;;  %v2651_v63 = vpop.eup %2650  ;;  %v1628_v52 = vmul.f32 %v2649_v11, %v4160_v8 }
 0x227   : > { %2159 = vst.msk [vmem:[%s3234_s13 + $0xb0] sm:$0xf] %vm315_vm6, %v976_v4  ;;  %v363_v59 = vpop.permute.xlu0 %362  ;;  %v2653_v46 = vpop.eup %2652  ;;  %v1464_v8 = vmul.f32 %v2651_v63, %v4174_v3  ;;  %v1623_v48 = vadd.f32 0.81, %v1621_v26 }
 0x228   : > { %368 = vst.msk [vmem:[%s3234_s13] sm:$0xf] %vm315_vm6, %v363_v59  ;;  %1284 = vrot.lane.b32.xlu1 %v2349_v28, %s2848_s5  ;;  %v2361_v28 = vpack.c.bf16 %v1439_v7, %v1439_v7  ;;  %v2655_v2 = vpop.eup %2654  ;;  %v2376_v12 = vpack.c.bf16 %v1628_v52, %v1628_v52  ;;  %v1653_v16 = vmul.f32 %v2653_v46, %v4181_v24 }
 0x229   : > { %1474 = vrot.lane.b32.xlu0 %v2364_v49, %s2848_s5  ;;  %v2363_v59 = vpack.c.bf16 %v1464_v8, %v1464_v8  ;;  %v1506_v49 = vmul.f32 %v2655_v2, %v4194_v5  ;;  %v2657_v62 = vpop.eup %2656  ;;  %2662 = vrsqrt.f32 %v1623_v48 }
 0x22a   : > { %v1001_v50 = vpop.permute.xlu1 %1000  ;;  %v2378_v29 = vpack.c.bf16 %v1653_v16, %v1653_v16  ;;  %v1531_v5 = vmul.f32 %v2657_v62, %v4210_v54  ;;  %2664 = vrsqrt.f32 %v1648_v0 }
 0x22b   : > { %2163 = vst.msk [vmem:[%s3234_s13 + $0xb8] sm:$0xf] %vm315_vm6, %v1001_v50  ;;  %v393_v19 = vpop.permute.xlu0 %392  ;;  %v2365_v50 = vpack.c.bf16 %v1506_v49, %v1506_v49 }
 0x22c   : > { %2075 = vst.msk [vmem:[%s3234_s13 + $0x8] sm:$0xf] %vm315_vm6, %v393_v19  ;;  %1326 = vrot.lane.b32.xlu1 %v2351_v39, %s2843_s22  ;;  %v2659_v39 = vpop.eup %2658  ;;  %v2367_v57 = vpack.c.bf16 %v1531_v5, %v1531_v5 }
 0x22d   : > { %1516 = vrot.lane.b32.xlu0 %v2366_v55, %s2843_s22  ;;  %v1556_v19 = vmul.f32 %v2659_v39, %v4224_v13 }
 0x22e   : > { %v1047_v41 = vpop.permute.xlu1 %1046 }
 0x22f   : > { %2171 = vst.msk [vmem:[%s3234_s13 + $0xc8] sm:$0xf] %vm315_vm6, %v1047_v41  ;;  %v424_v31 = vpop.permute.xlu0 %423  ;;  %v2661_v55 = vpop.eup %2660  ;;  %v2369_v14 = vpack.c.bf16 %v1556_v19, %v1556_v19  ;;  %v282_v41 = vld [vmem:[%s3045_s12 + $0x8] sm:$0xff] }
 0x230   : > { %2079 = vst.msk [vmem:[%s3234_s13 + $0x10] sm:$0xf] %vm315_vm6, %v424_v31  ;;  %1351 = vrot.lane.b32.xlu1 %v2353_v22, %s2844_s28  ;;  %v1602_v35 = vmul.f32 %v2661_v55, %v4238_v18  ;;  %v2063_v22 = vld [vmem:[%s3045_s12 + $0x10] sm:$0xff]  ;;  %v2067_v31 = vld [vmem:[%s3045_s12 + $0x20] sm:$0xff]  ;;  %v292_v44 = vadd.f32 %v2064_v21, %v282_v41 }
 0x231   : > { %1541 = vrot.lane.b32.xlu0 %v2368_v58, %s2844_s28  ;;  %v291_v25 = vadd.f32 %v2063_v22, %v281_v40  ;;  %v2068_v58 = vld [vmem:[%s3045_s12 + $0x28] sm:$0xff] }
 0x232   : > { %v1072_v53 = vpop.permute.xlu1 %1071  ;;  %v2373_v17 = vpack.c.bf16 %v1602_v35, %v1602_v35 }
 0x233   : > { %2175 = vst.msk [vmem:[%s3234_s13 + $0xd0] sm:$0xf] %vm315_vm6, %v1072_v53  ;;  %v476_v56 = vpop.permute.xlu0 %475  ;;  %v2663_v1 = vpop.eup %2662 }
 0x234   : > { %2087 = vst.msk [vmem:[%s3234_s13 + $0x20] sm:$0xf] %vm315_vm6, %v476_v56  ;;  %1376 = vrot.lane.b32.xlu1 %v2355_v15, %s2845_s25  ;;  %v1627_v18 = vmul.f32 %v2663_v1, %v4252_v61 }
 0x235   : > { %1566 = vrot.lane.b32.xlu0 %v2370_v43, %s2845_s25 }
 0x236   : > { %v1097_v27 = vpop.permute.xlu1 %1096 }
 0x237   : > { %2179 = vst.msk [vmem:[%s3234_s13 + $0xd8] sm:$0xf] %vm315_vm6, %v1097_v27  ;;  %v507_v33 = vpop.permute.xlu0 %506 }
 0x238   : > { %2091 = vst.msk [vmem:[%s3234_s13 + $0x28] sm:$0xf] %vm315_vm6, %v507_v33  ;;  %1422 = vrot.lane.b32.xlu1 %v2359_v23, %s2846_s14 }
 0x239   : > { %1612 = vrot.lane.b32.xlu0 %v2374_v60, %s2846_s14 }
 0x23a   : > { %v1847_v4 = vpop.permute.xlu1 %1846 }
 0x23b   : > { %1852 = vst.msk [vmem:[%s3921_s9 + $0x8] sm:$0xff] %vm1850_vm1, %v1847_v4  ;;  %v538_v38 = vpop.permute.xlu0 %537 }
 0x23c   : > { %2095 = vst.msk [vmem:[%s3234_s13 + $0x30] sm:$0xf] %vm315_vm6, %v538_v38  ;;  %1447 = vrot.lane.b32.xlu1 %v2361_v28, %s2847_s20 }
 0x23d   : > { %1637 = vrot.lane.b32.xlu0 %v2376_v12, %s2847_s20 }
 0x23e   : > { %v365_v3 = vpop.permute.xlu1 %364 }
 0x23f   : > { %369 = vst.msk [vmem:[%s3234_s13 + $0x4] sm:$0xf] %vm315_vm6, %v365_v3  ;;  %v580_v24 = vpop.permute.xlu0 %579 }
 0x240   : > { %2099 = vst.msk [vmem:[%s3234_s13 + $0x38] sm:$0xf] %vm315_vm6, %v580_v24  ;;  %1472 = vrot.lane.b32.xlu1 %v2363_v59, %s2848_s5 }
 0x241   : > { %1662 = vrot.lane.b32.xlu0 %v2378_v29, %s2848_s5 }
 0x242   : > { %v395_v51 = vpop.permute.xlu1 %394 }
 0x243   : > { %2076 = vst.msk [vmem:[%s3234_s13 + $0xc] sm:$0xf] %vm315_vm6, %v395_v51  ;;  %v605_v37 = vpop.permute.xlu0 %604 }
 0x244   : > { %2103 = vst.msk [vmem:[%s3234_s13 + $0x40] sm:$0xf] %vm315_vm6, %v605_v37  ;;  %1514 = vrot.lane.b32.xlu1 %v2365_v50, %s2843_s22  ;;  %s1862_s22 = scalar_lea.sflag [#allocation4], %s3034_s10 }
 0x246   : > { %v426_v10 = vpop.permute.xlu1 %425 }
 0x247   : > { %2080 = vst.msk [vmem:[%s3234_s13 + $0x14] sm:$0xf] %vm315_vm6, %v426_v10  ;;  %v630_v54 = vpop.permute.xlu0 %629 }
 0x248   : > { %2107 = vst.msk [vmem:[%s3234_s13 + $0x48] sm:$0xf] %vm315_vm6, %v630_v54  ;;  %1539 = vrot.lane.b32.xlu1 %v2367_v57, %s2844_s28  ;;  %s2728_s28 = scalar_lea.vmem %s4298_s7, 512 }
 0x249   : > { %p2729_p1 = scmp.ne.s32.totalorder %s4298_s7, %s2728_s28 }
 0x24a   : > { %v478_v32 = vpop.permute.xlu1 %477 }
 0x24b   : > { %2088 = vst.msk [vmem:[%s3234_s13 + $0x24] sm:$0xf] %vm315_vm6, %v478_v32  ;;  %v676_v13 = vpop.permute.xlu0 %675  ;;  %p2730_p10 = pnand %p2729_p1, %p4554_p12 }
 0x24c   : > { %2115 = vst.msk [vmem:[%s3234_s13 + $0x58] sm:$0xf] %vm315_vm6, %v676_v13  ;;  %1564 = vrot.lane.b32.xlu1 %v2369_v14, %s2845_s25  ;;  %s2849_s25 = smov [#allocation7]  }
 0x24d   : > { %p2731_p5 = pneg %p2730_p10  ;;  %s2732_s8 = sshll.u32 %s2849_s25, 4  ;;  %s2733_s8 = int_to_ptr.vmem [resolvable:$false] %s2732_s8 }
 0x24e   : > { %v509_v36 = vpop.permute.xlu1 %508  ;;  %s2734_s9 = scalar_lea.vmem %s2733_s8, 1024  ;;  %p2735_p7 = scmp.lt.s32.totalorder %s4298_s7, %s2733_s8 }
 0x24f   : > { %p2736_p9 = scmp.lt.s32.totalorder %s2734_s9, %s2728_s28 }
 0x251   : > { %p2737_p11 = por %p2736_p9, %p2735_p7 }
 0x253   : > { %p2738_p3 = pnand %p2737_p11, %p2731_p5 }
 0x255   : > { %2741 = shalt.err (!%p2738_p3)
}
 0x256   : > { %s2742_s12 = scalar_lea.hbm %s4313_s11, 512  ;;  %s2746_s6 = scalar_lea.hbm %s4521_s3, 1024 }
 0x257   : > { %p2743_p8 = scmp.ne.s32.totalorder %s4313_s11, %s2742_s12  ;;  %p2747_p4 = scmp.lt.u32.totalorder %s4313_s11, %s4521_s3 }
 0x258   : > { %p2748_p6 = scmp.lt.u32.totalorder %s2746_s6, %s2742_s12  ;;  %p2750_p1 = scmp.lt.u32.totalorder %s2742_s12, %s4313_s11 }
 0x259   : > { %p2744_p0 = pnand %p2743_p8, %p4554_p12 }
 0x25a   : > { %p2749_p13 = por %p2748_p6, %p2747_p4 }
 0x25b   : > { %p2745_p2 = pneg %p2744_p0 }
 0x25c   : > { %p2751_p10 = por %p2750_p1, %p2749_p13 }
 0x25e   : > { %p2752_p5 = pnand %p2751_p10, %p2745_p2 }
 0x260   : > { %2755 = shalt.err (!%p2752_p5)
}
 0x261   : > { %s2850_s28 = smov 128   ;;  %s2851_s9 = smov 8   ;;  %v301_v53 = vadd.f32 %v2067_v31, %v291_v25  ;;  %v2665_v15 = vpop.eup %2664  ;;  %2092 = vst.msk [vmem:[%s3234_s13 + $0x2c] sm:$0xf] %vm315_vm6, %v509_v36  ;;  %v701_v20 = vpop.permute.xlu0 %700  ;;  %v302_v34 = vadd.f32 %v2068_v58, %v292_v44  ;;  %1610 = vrot.lane.b32.xlu1 %v2373_v17, %s2846_s14  ;;  %v2375_v11 = vpack.c.bf16 %v1627_v18, %v1627_v18 }
 0x262   : > { %2391 = dma.vmem_to_hbm [thread:$0]  (%p4554_p12), %s4298_s7, 512, %s4313_s11, %s1862_s22, %s2850_s28, %s2850_s28, %s2851_s9   ;;  %v540_v45 = vpop.permute.xlu1 %539  ;;  %v1652_v30 = vmul.f32 %v2665_v15, %v4266_v9 }
 0x263   : > { %2119 = vst.msk [vmem:[%s3234_s13 + $0x60] sm:$0xf] %vm315_vm6, %v701_v20  ;;  %v305_v56 = vmul.f32 85.0, %v301_v53  ;;  %s2380_s12 = sshll.u32 %s2901_s19, 7  ;;  %s273_s23 = scalar_lea.vmem [#allocation8], %s2059_s29  ;;  %v306_v43 = vmul.f32 85.0, %v302_v34 }
 0x264   : > { %s1899_s30 = sshll.u32 %s273_s23, 4  ;;  %s4356_s22 = scalar_lea.hbm %s4522_s4, %s2380_s12  ;;  %2096 = vst.msk [vmem:[%s3234_s13 + $0x34] sm:$0xf] %vm315_vm6, %v540_v45  ;;  %v2377_v7 = vpack.c.bf16 %v1652_v30, %v1652_v30  ;;  %s4358_s30 = int_to_ptr.vmem [resolvable:$true] %s1899_s30 }
 0x265   : > { %v2279_v42 = vpack.c.bf16 %v305_v56, %v305_v56  ;;  %v726_v61 = vpop.permute.xlu0 %725  ;;  %v2280_v27 = vpack.c.bf16 %v306_v43, %v306_v43  ;;  %1635 = vrot.lane.b32.xlu1 %v2375_v11, %s2847_s20  ;;  %s1867_s19 = scalar_lea.sflag [#allocation9], %s3034_s10  ;;  %s2756_s14 = scalar_lea.vmem %s4358_s30, 128 }
 0x266   : > { %2123 = vst.msk [vmem:[%s3234_s13 + $0x68] sm:$0xf] %vm315_vm6, %v726_v61  ;;  %v582_v23 = vpop.permute.xlu1 %581  ;;  %p2757_p7 = scmp.ne.s32.totalorder %s4358_s30, %s2756_s14  ;;  %s2852_s29 = smov [#allocation8]  }
 0x267   : > { %316 = vst.msk [vmem:[%s273_s23] sm:$0xf] %vm315_vm6, %v2279_v42  ;;  %317 = vst.msk [vmem:[%s273_s23 + $0x4] sm:$0xf] %vm315_vm6, %v2280_v27  ;;  %s2760_s6 = sshll.u32 %s2852_s29, 4  ;;  %s2761_s6 = int_to_ptr.vmem [resolvable:$false] %s2760_s6 }
 0x268   : > { %p2758_p9 = pnand %p2757_p7, %p4554_p12  ;;  %s2762_s25 = scalar_lea.vmem %s2761_s6, 256 }
 0x269   : > { %p2763_p3 = scmp.lt.s32.totalorder %s4358_s30, %s2761_s6  ;;  %p2764_p8 = scmp.lt.s32.totalorder %s2762_s25, %s2756_s14 }
 0x26a   : > { %p2759_p11 = pneg %p2758_p9 }
 0x26b   : > { %p2765_p0 = por %p2764_p8, %p2763_p3 }
 0x26d   : > { %p2766_p2 = pnand %p2765_p0, %p2759_p11 }
 0x26f   : > { %2769 = shalt.err (!%p2766_p2)
}
 0x270   : > { %s2770_s20 = scalar_lea.hbm %s4356_s22, 128  ;;  %s2774_s9 = scalar_lea.hbm %s4522_s4, 256 }
 0x271   : > { %p2771_p4 = scmp.ne.s32.totalorder %s4356_s22, %s2770_s20  ;;  %p2775_p1 = scmp.lt.u32.totalorder %s4356_s22, %s4522_s4 }
 0x272   : > { %p2776_p10 = scmp.lt.u32.totalorder %s2774_s9, %s2770_s20  ;;  %p2778_p7 = scmp.lt.u32.totalorder %s2770_s20, %s4356_s22 }
 0x273   : > { %p2772_p6 = pnand %p2771_p4, %p4554_p12 }
 0x274   : > { %p2777_p5 = por %p2776_p10, %p2775_p1 }
 0x275   : > { %p2773_p13 = pneg %p2772_p6 }
 0x276   : > { %p2779_p9 = por %p2778_p7, %p2777_p5 }
 0x278   : > { %p2780_p11 = pnand %p2779_p9, %p2773_p13 }
 0x27a   : > { %2783 = shalt.err (!%p2780_p11)
}
 0x27b   : > { %s2853_s7 = smov 64   ;;  %s2854_s11 = smov 4   ;;  %2100 = vst.msk [vmem:[%s3234_s13 + $0x3c] sm:$0xf] %vm315_vm6, %v582_v23  ;;  %v770_v63 = vpop.permute.xlu0 %769  ;;  %1660 = vrot.lane.b32.xlu1 %v2377_v7, %s2848_s5  ;;  %v607_v33 = vpop.permute.xlu1 %606 }
 0x27c   : > { %2392 = dma.vmem_to_hbm [thread:$0]  (%p4554_p12), %s4358_s30, 128, %s4356_s22, %s1867_s19, %s2853_s7, %s2853_s7, %s2854_s11  }
 0x27d   : > { %2128 = vst.msk [vmem:[%s3234_s13 + $0x74] sm:$0xf] %vm315_vm6, %v770_v63  ;;  %2104 = vst.msk [vmem:[%s3234_s13 + $0x44] sm:$0xf] %vm315_vm6, %v607_v33 }
 0x27f   : > { %v795_v60 = vpop.permute.xlu0 %794  ;;  %v632_v52 = vpop.permute.xlu1 %631 }
 0x280   : > { %2132 = vst.msk [vmem:[%s3234_s13 + $0x7c] sm:$0xf] %vm315_vm6, %v795_v60  ;;  %2108 = vst.msk [vmem:[%s3234_s13 + $0x4c] sm:$0xf] %vm315_vm6, %v632_v52 }
 0x283   : > { %v820_v46 = vpop.permute.xlu0 %819  ;;  %v678_v47 = vpop.permute.xlu1 %677 }
 0x284   : > { %2136 = vst.msk [vmem:[%s3234_s13 + $0x84] sm:$0xf] %vm315_vm6, %v820_v46  ;;  %2116 = vst.msk [vmem:[%s3234_s13 + $0x5c] sm:$0xf] %vm315_vm6, %v678_v47 }
 0x287   : > { %v866_v26 = vpop.permute.xlu0 %865  ;;  %v703_v9 = vpop.permute.xlu1 %702 }
 0x288   : > { %2144 = vst.msk [vmem:[%s3234_s13 + $0x94] sm:$0xf] %vm315_vm6, %v866_v26  ;;  %2120 = vst.msk [vmem:[%s3234_s13 + $0x64] sm:$0xf] %vm315_vm6, %v703_v9 }
 0x28b   : > { %v891_v4 = vpop.permute.xlu0 %890  ;;  %v728_v28 = vpop.permute.xlu1 %727 }
 0x28c   : > { %2148 = vst.msk [vmem:[%s3234_s13 + $0x9c] sm:$0xf] %vm315_vm6, %v891_v4  ;;  %2124 = vst.msk [vmem:[%s3234_s13 + $0x6c] sm:$0xf] %vm315_vm6, %v728_v28 }
 0x28f   : > { %v916_v8 = vpop.permute.xlu0 %915  ;;  %v768_v2 = vpop.permute.xlu1 %767 }
 0x290   : > { %2152 = vst.msk [vmem:[%s3234_s13 + $0xa4] sm:$0xf] %vm315_vm6, %v916_v8  ;;  %2127 = vst.msk [vmem:[%s3234_s13 + $0x70] sm:$0xf] %vm315_vm6, %v768_v2 }
 0x293   : > { %v1141_v38 = vpop.permute.xlu0 %1140  ;;  %v793_v12 = vpop.permute.xlu1 %792 }
 0x294   : > { %2184 = vst.msk [vmem:[%s3234_s13 + $0xe4] sm:$0xf] %vm315_vm6, %v1141_v38  ;;  %2131 = vst.msk [vmem:[%s3234_s13 + $0x78] sm:$0xf] %vm315_vm6, %v793_v12 }
 0x297   : > { %v1166_v16 = vpop.permute.xlu0 %1165  ;;  %v818_v48 = vpop.permute.xlu1 %817 }
 0x298   : > { %2188 = vst.msk [vmem:[%s3234_s13 + $0xec] sm:$0xf] %vm315_vm6, %v1166_v16  ;;  %2135 = vst.msk [vmem:[%s3234_s13 + $0x80] sm:$0xf] %vm315_vm6, %v818_v48 }
 0x29b   : > { %v1191_v6 = vpop.permute.xlu0 %1190  ;;  %v864_v3 = vpop.permute.xlu1 %863 }
 0x29c   : > { %2192 = vst.msk [vmem:[%s3234_s13 + $0xf4] sm:$0xf] %vm315_vm6, %v1191_v6  ;;  %2143 = vst.msk [vmem:[%s3234_s13 + $0x90] sm:$0xf] %vm315_vm6, %v864_v3 }
 0x29f   : > { %v1237_v59 = vpop.permute.xlu0 %1236  ;;  %v889_v49 = vpop.permute.xlu1 %888 }
 0x2a0   : > { %2200 = vst.msk [vmem:[%s3234_s13 + $0x104] sm:$0xf] %vm315_vm6, %v1237_v59  ;;  %2147 = vst.msk [vmem:[%s3234_s13 + $0x98] sm:$0xf] %vm315_vm6, %v889_v49 }
 0x2a3   : > { %v1262_v62 = vpop.permute.xlu0 %1261  ;;  %v914_v24 = vpop.permute.xlu1 %913 }
 0x2a4   : > { %2204 = vst.msk [vmem:[%s3234_s13 + $0x10c] sm:$0xf] %vm315_vm6, %v1262_v62  ;;  %2151 = vst.msk [vmem:[%s3234_s13 + $0xa0] sm:$0xf] %vm315_vm6, %v914_v24 }
 0x2a7   : > { %v1287_v29 = vpop.permute.xlu0 %1286  ;;  %v1139_v0 = vpop.permute.xlu1 %1138 }
 0x2a8   : > { %2208 = vst.msk [vmem:[%s3234_s13 + $0x114] sm:$0xf] %vm315_vm6, %v1287_v29  ;;  %2183 = vst.msk [vmem:[%s3234_s13 + $0xe0] sm:$0xf] %vm315_vm6, %v1139_v0 }
 0x2ab   : > { %v1329_v51 = vpop.permute.xlu0 %1328  ;;  %v1164_v50 = vpop.permute.xlu1 %1163 }
 0x2ac   : > { %2212 = vst.msk [vmem:[%s3234_s13 + $0x11c] sm:$0xf] %vm315_vm6, %v1329_v51  ;;  %2187 = vst.msk [vmem:[%s3234_s13 + $0xe8] sm:$0xf] %vm315_vm6, %v1164_v50 }
 0x2af   : > { %v1354_v5 = vpop.permute.xlu0 %1353  ;;  %v1189_v39 = vpop.permute.xlu1 %1188 }
 0x2b0   : > { %2216 = vst.msk [vmem:[%s3234_s13 + $0x124] sm:$0xf] %vm315_vm6, %v1354_v5  ;;  %2191 = vst.msk [vmem:[%s3234_s13 + $0xf0] sm:$0xf] %vm315_vm6, %v1189_v39 }
 0x2b3   : > { %v1379_v37 = vpop.permute.xlu0 %1378  ;;  %v1235_v10 = vpop.permute.xlu1 %1234 }
 0x2b4   : > { %2220 = vst.msk [vmem:[%s3234_s13 + $0x12c] sm:$0xf] %vm315_vm6, %v1379_v37  ;;  %2199 = vst.msk [vmem:[%s3234_s13 + $0x100] sm:$0xf] %vm315_vm6, %v1235_v10 }
 0x2b7   : > { %v1425_v57 = vpop.permute.xlu0 %1424  ;;  %v1260_v19 = vpop.permute.xlu1 %1259 }
 0x2b8   : > { %2228 = vst.msk [vmem:[%s3234_s13 + $0x13c] sm:$0xf] %vm315_vm6, %v1425_v57  ;;  %2203 = vst.msk [vmem:[%s3234_s13 + $0x108] sm:$0xf] %vm315_vm6, %v1260_v19 }
 0x2bb   : > { %v1450_v55 = vpop.permute.xlu0 %1449  ;;  %v1285_v54 = vpop.permute.xlu1 %1284 }
 0x2bc   : > { %2232 = vst.msk [vmem:[%s3234_s13 + $0x144] sm:$0xf] %vm315_vm6, %v1450_v55  ;;  %2207 = vst.msk [vmem:[%s3234_s13 + $0x110] sm:$0xf] %vm315_vm6, %v1285_v54 }
 0x2bf   : > { %v1475_v32 = vpop.permute.xlu0 %1474  ;;  %v1327_v14 = vpop.permute.xlu1 %1326 }
 0x2c0   : > { %2236 = vst.msk [vmem:[%s3234_s13 + $0x14c] sm:$0xf] %vm315_vm6, %v1475_v32  ;;  %2211 = vst.msk [vmem:[%s3234_s13 + $0x118] sm:$0xf] %vm315_vm6, %v1327_v14 }
 0x2c3   : > { %v1517_v35 = vpop.permute.xlu0 %1516  ;;  %v1352_v1 = vpop.permute.xlu1 %1351 }
 0x2c4   : > { %2240 = vst.msk [vmem:[%s3234_s13 + $0x154] sm:$0xf] %vm315_vm6, %v1517_v35  ;;  %2215 = vst.msk [vmem:[%s3234_s13 + $0x120] sm:$0xf] %vm315_vm6, %v1352_v1 }
 0x2c7   : > { %v1542_v13 = vpop.permute.xlu0 %1541  ;;  %v1377_v40 = vpop.permute.xlu1 %1376 }
 0x2c8   : > { %2244 = vst.msk [vmem:[%s3234_s13 + $0x15c] sm:$0xf] %vm315_vm6, %v1542_v13  ;;  %2219 = vst.msk [vmem:[%s3234_s13 + $0x128] sm:$0xf] %vm315_vm6, %v1377_v40 }
 0x2cb   : > { %v1567_v41 = vpop.permute.xlu0 %1566  ;;  %v1423_v22 = vpop.permute.xlu1 %1422 }
 0x2cc   : > { %2248 = vst.msk [vmem:[%s3234_s13 + $0x164] sm:$0xf] %vm315_vm6, %v1567_v41  ;;  %2227 = vst.msk [vmem:[%s3234_s13 + $0x138] sm:$0xf] %vm315_vm6, %v1423_v22 }
 0x2cf   : > { %v1613_v21 = vpop.permute.xlu0 %1612  ;;  %v1448_v25 = vpop.permute.xlu1 %1447 }
 0x2d0   : > { %2256 = vst.msk [vmem:[%s3234_s13 + $0x174] sm:$0xf] %vm315_vm6, %v1613_v21  ;;  %2231 = vst.msk [vmem:[%s3234_s13 + $0x140] sm:$0xf] %vm315_vm6, %v1448_v25 }
 0x2d3   : > { %v1638_v31 = vpop.permute.xlu0 %1637  ;;  %v1473_v58 = vpop.permute.xlu1 %1472 }
 0x2d4   : > { %2260 = vst.msk [vmem:[%s3234_s13 + $0x17c] sm:$0xf] %vm315_vm6, %v1638_v31  ;;  %2235 = vst.msk [vmem:[%s3234_s13 + $0x148] sm:$0xf] %vm315_vm6, %v1473_v58 }
 0x2d7   : > { %v1663_v44 = vpop.permute.xlu0 %1662  ;;  %v1515_v36 = vpop.permute.xlu1 %1514 }
 0x2d8   : > { %2264 = vst.msk [vmem:[%s3234_s13 + $0x184] sm:$0xf] %vm315_vm6, %v1663_v44  ;;  %2239 = vst.msk [vmem:[%s3234_s13 + $0x150] sm:$0xf] %vm315_vm6, %v1515_v36 }
 0x2db   : > { %v1540_v17 = vpop.permute.xlu1 %1539 }
 0x2dc   : > { %2243 = vst.msk [vmem:[%s3234_s13 + $0x158] sm:$0xf] %vm315_vm6, %v1540_v17 }
 0x2df   : > { %v1565_v18 = vpop.permute.xlu1 %1564 }
 0x2e0   : > { %2247 = vst.msk [vmem:[%s3234_s13 + $0x160] sm:$0xf] %vm315_vm6, %v1565_v18 }
 0x2e3   : > { %v1611_v53 = vpop.permute.xlu1 %1610 }
 0x2e4   : > { %2255 = vst.msk [vmem:[%s3234_s13 + $0x170] sm:$0xf] %vm315_vm6, %v1611_v53 }
 0x2e7   : > { %v1636_v15 = vpop.permute.xlu1 %1635 }
 0x2e8   : > { %2259 = vst.msk [vmem:[%s3234_s13 + $0x178] sm:$0xf] %vm315_vm6, %v1636_v15 }
 0x2ed   : > { %v1661_v20 = vpop.permute.xlu1 %1660 }
 0x2ee   : > { %2263 = vst.msk [vmem:[%s3234_s13 + $0x180] sm:$0xf] %vm315_vm6, %v1661_v20 }
 0x2ef PF: > { %s1922_s26 = sand.u32 1, %s2818_s15   ;;  %p4555_p12 = scmp.ne.s32.totalorder %s4530_s27, 0 }
 0x2f0   : > { %p4556_p3 = scmp.ge.s32.totalorder %s2830_s18, 2  ;;  %s1923_s10 = scalar_lea.sflag [#allocation4], %s1922_s26 }
 0x2f2   : > { %p2403_p8 = pnand %p4556_p3, %p4555_p12 }
 0x2f4   : > { %2809 = dma.done.wait (!%p2403_p8), %s1923_s10, 512  }
 0x2f5   : > { %2811 = vsyncadd (!%p2403_p8), %s1923_s10, 4294966784  ;;  %s1932_s5 = scalar_lea.sflag [#allocation9], %s1922_s26 }
 0x2f6   : > { %2813 = dma.done.wait (!%p2403_p8), %s1932_s5, 128  }
 0x2f7   : > { %2815 = vsyncadd (!%p2403_p8), %s1932_s5, 4294967168  ;;  %p24_p0 = scmp.ge.s32.totalorder %s2905_s21, 4   ;;  %s4557_s15 = smov %s2822_s16 }
 0x2f8   : > { %s4558_s16 = smov %s2826_s17  ;;  %s4559_s17 = smov %s2917_s24 }
 0x2f9   : > { %s4560_s18 = smov %s2905_s21  ;;  %26 = sbr.rel (!%p24_p0) target bundleno = 9 (0x9), region = 168 }
 0x300   :  { %1937 = vsyncpa [#allocation3], 1 }
 0x301   :  { %1939 = vsyncpa [#allocation3 + $0x1], 1 }
 0x302   :  { %1940 = vsyncpa [#allocation6], 1 }
 0x303   :  { %1942 = vsyncpa [#allocation6 + $0x1], 1 }
 0x304   :  { %1943 = vsyncpa [#allocation4], 1 }
 0x305   :  { %1945 = vsyncpa [#allocation4 + $0x1], 1 }
 0x306   :  { %1946 = vsyncpa [#allocation9], 1 }
 0x307   :  { %1948 = vsyncpa [#allocation9 + $0x1], 1 }

</bundles_post_ra>
